<compile_context>
chip_gen: v7x
topology: tpu7x:2x2x1
jax: 0.10.0
libtpu: 0.0.40
codegen_flags: <defaults>
</compile_context>

<pallas_src>
import jax
import jax.numpy as jnp
from jax.experimental import pallas as pl
from jax.experimental.pallas import tpu as pltpu

EMBEDDING_DIM = 64
HIDDEN_DIM = 12
N_LAYERS = 4
OUTPUT_SIZE = 1

# Hardware-friendly padded sizes (vreg = 8 sublanes x 128 lanes).
LANE = 128
SUBLANE = 8
HP = LANE              # padded hidden/state width (12 -> 128, valid lanes 0..11)
DP = LANE              # padded feature width of every layer input
GP = LANE              # PACKED gate width: all 4 gates in one 128-lane vreg
OP = LANE              # padded FC output width (1 -> 128), lane-dense store
GATE_SLOT = 16         # lanes per gate sub-slot (HIDDEN_DIM = 12 <= 16)

# Matmul operand dtype (weights + LHS casts).  Set to jnp.float32 to recover
# full-f32 matmuls; gate/elementwise math is f32 either way.
MATMUL_DTYPE = jnp.bfloat16

assert HIDDEN_DIM <= GATE_SLOT
assert EMBEDDING_DIM <= DP and HIDDEN_DIM <= HP

_VMEM = pl.BlockSpec(memory_space=pltpu.MemorySpace.VMEM)


# --------------------------------------------------------------------------
# Fused whole-network kernel
# --------------------------------------------------------------------------
def _ltlnet_kernel(x_ref, w_ih_ref, w_hh_ref, b_ref, h0_ref, c0_ref,
                   fc_w_ref, fc_b_ref,
                   out_ref, hn_ref, cn_ref,
                   xp_a, xp_b):
    """All 4 LSTM layers + FC + sigmoid in one kernel.

    x_ref    : (T*Bp, DP)  bf16  time-major flattened, zero-padded input
    w_ih_ref : (L, DP, GP) bf16  packed input->gates weights (duplicated slots)
    w_hh_ref : (L, HP, GP) bf16  packed hidden->gates weights
    b_ref    : (L, 1,  GP) f32   packed b_ih + b_hh
    h0_ref   : (L, Bp, HP) f32,  c0_ref: (L, Bp, HP) f32
    fc_w_ref : (HP, OP)    bf16, fc_b_ref: (1, OP) f32
    out_ref  : (Bp, OP)    f32   sigmoid(fc(h of last step, last layer))
    hn_ref   : (L, Bp, HP) f32,  cn_ref: (L, Bp, HP) f32
    xp_a/xp_b: (T*Bp, GP)  f32   ping-pong scratch for the hoisted/interleaved
                                 per-layer input projections
    """
    TB = x_ref.shape[0]
    L = w_hh_ref.shape[0]
    Bp = h0_ref.shape[1]
    T = TB // Bp

    # Layer 0: the whole sequence's input projection in ONE MXU matmul,
    # hoisted off the serial recurrence.
    xp_a[...] = (jnp.dot(x_ref[...], w_ih_ref[0],
                         preferred_element_type=jnp.float32) + b_ref[0])

    # TODO(synk): keep W_hh resident in the MXU across the 8 steps of a layer
    # via pltpu.matmul_push_rhs / matmul_acc_lhs / matmul_pop once that path is
    # validated on all target generations; jnp.dot re-streams it each step.
    h16 = None
    for l in range(L):                       # static: per-layer weights differ
        xp_cur, xp_nxt = (xp_a, xp_b) if l % 2 == 0 else (xp_b, xp_a)
        w_hh = w_hh_ref[l]                   # (HP, GP) bf16, live across 8 steps
        has_next = l + 1 < L
        if has_next:
            w_in_nxt = w_ih_ref[l + 1]
            b_nxt = b_ref[l + 1]

        h = h0_ref[l]                        # (Bp, HP) f32, carried as values
        c = c0_ref[l]
        h16 = h.astype(MATMUL_DTYPE)

        for t in range(T):                   # static unroll (T = 8)
            gates = (xp_cur[pl.ds(t * Bp, Bp), :]
                     + jnp.dot(h16, w_hh,
                               preferred_element_type=jnp.float32))  # (Bp, GP) f32
            sig = jax.nn.sigmoid(gates)      # 1 EUP pass: i, f, o (+ duplicates)
            tnh = jnp.tanh(gates)            # 1 EUP pass: g (+ duplicate)
            # Gate k sits at lane offsets k*16 and 128-k*16; rolling by k*16
            # brings one of the two copies to lanes 0..11 for EITHER rotate
            # direction.  Rolls go to the XLU slot (has slack).
            i_g = sig                                              # already at 0..11
            f_g = pltpu.roll(sig, shift=1 * GATE_SLOT, axis=1)
            g_g = pltpu.roll(tnh, shift=2 * GATE_SLOT, axis=1)
            o_g = pltpu.roll(sig, shift=3 * GATE_SLOT, axis=1)
            c = f_g * c + i_g * g_g          # lanes >= 12 carry bounded junk
            h = o_g * jnp.tanh(c)            # (sliced off by the wrapper)
            h16 = h.astype(MATMUL_DTYPE)
            if has_next:
                # Interleave the NEXT layer's input projection for this step;
                # the MXU is otherwise idle during the EUP-bound gate math.
                xp_nxt[pl.ds(t * Bp, Bp), :] = (
                    jnp.dot(h16, w_in_nxt,
                            preferred_element_type=jnp.float32) + b_nxt)

        hn_ref[l] = h
        cn_ref[l] = c

    # FC + sigmoid on the last timestep of the last layer
    # (== out.view(B, T)[:, -1] of the reference, valid because output_size == 1).
    out_ref[...] = jax.nn.sigmoid(
        jnp.dot(h16, fc_w_ref[...], preferred_element_type=jnp.float32)
        + fc_b_ref[...])


# --------------------------------------------------------------------------
# Weight packing (call ONCE, outside the per-call forward path)
# --------------------------------------------------------------------------
def _gate_lane_offsets(k):
    # gate k at lane offsets k*16 and (128 - k*16); k == 0 only once.
    off = k * GATE_SLOT
    return (off,) if off == 0 else (off, GP - off)


def _pack_gate_matrix(per_gate, rows):
    # per_gate: (4, In, H) -> (rows, GP) with duplicated gate sub-slots.
    _, in_dim, h = per_gate.shape
    out = jnp.zeros((rows, GP), jnp.float32)
    for k in range(4):
        for off in _gate_lane_offsets(k):
            out = out.at[:in_dim, off:off + h].set(per_gate[k])
    return out


def _pack_gate_bias(b):
    # b: (4, 1, H) (already b_ih + b_hh) -> (1, GP)
    _, _, h = b.shape
    out = jnp.zeros((1, GP), jnp.float32)
    for k in range(4):
        for off in _gate_lane_offsets(k):
            out = out.at[:, off:off + h].set(b[k])
    return out


def pack_params(params):
    """One-time packing/padding of weights into kernel layout (hoisted out of
    the per-call forward path)."""
    L, H = N_LAYERS, HIDDEN_DIM
    w_ih = jnp.stack([_pack_gate_matrix(params["lstm"][l][0], DP)
                      for l in range(L)]).astype(MATMUL_DTYPE)
    w_hh = jnp.stack([_pack_gate_matrix(params["lstm"][l][1], HP)
                      for l in range(L)]).astype(MATMUL_DTYPE)
    b = jnp.stack([_pack_gate_bias(params["lstm"][l][2]) for l in range(L)])
    fc_w = (jnp.zeros((HP, OP), jnp.float32)
            .at[:H, :OUTPUT_SIZE].set(params["fc_w"])).astype(MATMUL_DTYPE)
    fc_b = jnp.zeros((1, OP), jnp.float32).at[:, :OUTPUT_SIZE].set(params["fc_b"])
    return {"w_ih": w_ih, "w_hh": w_hh, "b": b, "fc_w": fc_w, "fc_b": fc_b}


# --------------------------------------------------------------------------
# Public forward (equivalent of LTLNet.forward(x, hidden, lens) in eval mode)
# --------------------------------------------------------------------------
def ltlnet_forward(packed, x, hidden, lens=None):
    """packed: pack_params(params); x: (B, T, E) batch-first;
    hidden = (h0, c0), each (L, B, H).  Returns (out, (hn, cn)), out: (B,)."""
    del lens  # unused by the reference forward as well
    h0, c0 = hidden
    B, T, E = x.shape
    H, L = HIDDEN_DIM, N_LAYERS
    Bp = max(SUBLANE, ((B + SUBLANE - 1) // SUBLANE) * SUBLANE)

    # time-major, zero-padded, flattened input: (T*Bp, DP) in the matmul dtype
    x_tm = jnp.transpose(x, (1, 0, 2))
    x_p = (jnp.zeros((T, Bp, DP), MATMUL_DTYPE)
           .at[:, :B, :E].set(x_tm.astype(MATMUL_DTYPE))
           .reshape(T * Bp, DP))
    h0_p = jnp.zeros((L, Bp, HP), jnp.float32).at[:, :B, :H].set(
        h0.astype(jnp.float32))
    c0_p = jnp.zeros((L, Bp, HP), jnp.float32).at[:, :B, :H].set(
        c0.astype(jnp.float32))

    # TODO(synk): if batch scales toward the reference batch_size=200, add a
    # batch-tiled grid with dimension_semantics=("parallel",) so v7x's two
    # TensorCores split the batch; unnecessary at B=2.
    out_p, hn_p, cn_p = pl.pallas_call(
        _ltlnet_kernel,
        out_shape=(jax.ShapeDtypeStruct((Bp, OP), jnp.float32),
                   jax.ShapeDtypeStruct((L, Bp, HP), jnp.float32),
                   jax.ShapeDtypeStruct((L, Bp, HP), jnp.float32)),
        in_specs=[_VMEM] * 8,
        out_specs=(_VMEM, _VMEM, _VMEM),
        scratch_shapes=[pltpu.VMEM((T * Bp, GP), jnp.float32),
                        pltpu.VMEM((T * Bp, GP), jnp.float32)],
    )(x_p, packed["w_ih"], packed["w_hh"], packed["b"],
      h0_p, c0_p, packed["fc_w"], packed["fc_b"])

    out = out_p[:B, 0]
    hn = hn_p[:, :B, :H]
    cn = cn_p[:, :B, :H]
    return out, (hn, cn)


# --------------------------------------------------------------------------
# Pure-JAX reference (mirrors the kernel's matmul dtype for validation)
# --------------------------------------------------------------------------
def ltlnet_reference(params, x, hidden):
    h0, c0 = hidden
    _, T, _ = x.shape

    def mm(a, w):
        return jnp.dot(a.astype(MATMUL_DTYPE), w.astype(MATMUL_DTYPE),
                       preferred_element_type=jnp.float32)

    y = jnp.transpose(x, (1, 0, 2)).astype(jnp.float32)
    hn, cn = [], []
    for l in range(N_LAYERS):
        w_ih, w_hh, b = params["lstm"][l]
        h, c = h0[l], c0[l]
        outs = []
        for t in range(T):
            xt = y[t]
            g = [mm(xt, w_ih[k]) + mm(h, w_hh[k]) + b[k] for k in range(4)]
            i_g = jax.nn.sigmoid(g[0])
            f_g = jax.nn.sigmoid(g[1])
            g_g = jnp.tanh(g[2])
            o_g = jax.nn.sigmoid(g[3])
            c = f_g * c + i_g * g_g
            h = o_g * jnp.tanh(c)
            outs.append(h)
        y = jnp.stack(outs)
        hn.append(h)
        cn.append(c)
    out = jax.nn.sigmoid(mm(y[-1], params["fc_w"]) + params["fc_b"])
    return out[:, 0], (jnp.stack(hn), jnp.stack(cn))


# --------------------------------------------------------------------------
# Deterministic parameter init (PyTorch-style uniform(-1/sqrt(H), 1/sqrt(H)))
# --------------------------------------------------------------------------
def init_params(key):
    bound = 1.0 / jnp.sqrt(jnp.float32(HIDDEN_DIM))
    params = {"lstm": []}
    for l in range(N_LAYERS):
        in_dim = EMBEDDING_DIM if l == 0 else HIDDEN_DIM
        key, k1, k2, k3, k4 = jax.random.split(key, 5)
        w_ih = jax.random.uniform(k1, (4, in_dim, HIDDEN_DIM), jnp.float32,
                                  -bound, bound)
        w_hh = jax.random.uniform(k2, (4, HIDDEN_DIM, HIDDEN_DIM), jnp.float32,
                                  -bound, bound)
        b_ih = jax.random.uniform(k3, (4, 1, HIDDEN_DIM), jnp.float32, -bound, bound)
        b_hh = jax.random.uniform(k4, (4, 1, HIDDEN_DIM), jnp.float32, -bound, bound)
        params["lstm"].append((w_ih, w_hh, b_ih + b_hh))
    key, k1, k2 = jax.random.split(key, 3)
    params["fc_w"] = jax.random.uniform(k1, (HIDDEN_DIM, OUTPUT_SIZE), jnp.float32,
                                        -bound, bound)
    params["fc_b"] = jax.random.uniform(k2, (1, OUTPUT_SIZE), jnp.float32,
                                        -bound, bound)
    return params


# --------------------------------------------------------------------------
if __name__ == "__main__":
    B, T = 2, 8
    key = jax.random.PRNGKey(0)
    key, kx, kp = jax.random.split(key, 3)

    params = init_params(kp)
    x = jax.random.normal(kx, (B, T, EMBEDDING_DIM), jnp.float32)
    # init_hidden(batch_size): zeros of shape (n_layers, B, H)
    h0 = jnp.zeros((N_LAYERS, B, HIDDEN_DIM), jnp.float32)
    c0 = jnp.zeros((N_LAYERS, B, HIDDEN_DIM), jnp.float32)
    lens = jnp.full((B,), T, jnp.int32)  # unused by forward; signature parity

    packed = pack_params(params)         # one-time packing, NOT on the hot path
    fwd = jax.jit(ltlnet_forward)
    out, (hn, cn) = fwd(packed, x, (h0, c0), lens)
    jax.block_until_ready((out, hn, cn))

    assert out.shape == (B,)
    assert hn.shape == (N_LAYERS, B, HIDDEN_DIM)
    assert cn.shape == (N_LAYERS, B, HIDDEN_DIM)

    # Numerical check against the pure-JAX reference (same matmul dtype).
    ref_out, (ref_hn, ref_cn) = ltlnet_reference(params, x, (h0, c0))
    err = max(float(jnp.max(jnp.abs(out - ref_out))),
              float(jnp.max(jnp.abs(hn - ref_hn))),
              float(jnp.max(jnp.abs(cn - ref_cn))))
    assert err < 5e-3, f"max abs error vs reference: {err}"

    print("KERNEL_OK")
</pallas_src>

<mosaic_0001>
module attributes {stable_mosaic.version = 11 : i64} {
  func.func @_ltlnet_kernel(%arg0: memref<64x128xbf16, #tpu.memory_space<vmem>>, %arg1: memref<4x128x128xbf16, #tpu.memory_space<vmem>>, %arg2: memref<4x128x128xbf16, #tpu.memory_space<vmem>>, %arg3: memref<4x1x128xf32, #tpu.memory_space<vmem>>, %arg4: memref<4x8x128xf32, #tpu.memory_space<vmem>>, %arg5: memref<4x8x128xf32, #tpu.memory_space<vmem>>, %arg6: memref<128x128xbf16, #tpu.memory_space<vmem>>, %arg7: memref<1x128xf32, #tpu.memory_space<vmem>>, %arg8: memref<8x128xf32, #tpu.memory_space<vmem>>, %arg9: memref<4x8x128xf32, #tpu.memory_space<vmem>>, %arg10: memref<4x8x128xf32, #tpu.memory_space<vmem>>, %arg11: memref<64x128xf32, #tpu.memory_space<vmem>>, %arg12: memref<64x128xf32, #tpu.memory_space<vmem>>) attributes {dimension_semantics = [], scalar_prefetch = 0 : i64, scratch_operands = 2 : i64, tpu.core_type = #tpu.core_type<tc>} {
    %c0 = arith.constant 0 : index
    %c0_0 = arith.constant 0 : index
    %0 = vector.load %arg0[%c0, %c0_0] : memref<64x128xbf16, #tpu.memory_space<vmem>>, vector<64x128xbf16>
    %c0_1 = arith.constant 0 : index
    %c0_2 = arith.constant 0 : index
    %c0_3 = arith.constant 0 : index
    %1 = vector.load %arg1[%c0_1, %c0_2, %c0_3] : memref<4x128x128xbf16, #tpu.memory_space<vmem>>, vector<1x128x128xbf16>
    %2 = vector.shape_cast %1 : vector<1x128x128xbf16> to vector<128x128xbf16>
    %cst = arith.constant dense<0.000000e+00> : vector<64x128xf32>
    %3 = tpu.matmul %0, %2, %cst {dimension_numbers = #tpu.dot_dimension_numbers<[1], [0], [0], [1], [0, 0, 1, 1], [], []>} : vector<64x128xbf16>, vector<128x128xbf16>, vector<64x128xf32> -> vector<64x128xf32>
    %c0_4 = arith.constant 0 : index
    %c0_5 = arith.constant 0 : index
    %c0_6 = arith.constant 0 : index
    %4 = vector.load %arg3[%c0_4, %c0_5, %c0_6] : memref<4x1x128xf32, #tpu.memory_space<vmem>>, vector<1x1x128xf32>
    %5 = vector.shape_cast %4 : vector<1x1x128xf32> to vector<1x128xf32>
    %6 = vector.broadcast %5 : vector<1x128xf32> to vector<64x128xf32>
    %7 = arith.addf %3, %6 : vector<64x128xf32>
    %c0_7 = arith.constant 0 : index
    %c0_8 = arith.constant 0 : index
    %8 = vector.load %arg11[%c0_7, %c0_8] : memref<64x128xf32, #tpu.memory_space<vmem>>, vector<64x128xf32>
    tpu.vector_store %arg11[%c0_7, %c0_8], %7 {strides = array<i32>} : memref<64x128xf32, #tpu.memory_space<vmem>>, vector<64x128xf32>,
    %c0_9 = arith.constant 0 : index
    %c0_10 = arith.constant 0 : index
    %c0_11 = arith.constant 0 : index
    %9 = vector.load %arg2[%c0_9, %c0_10, %c0_11] : memref<4x128x128xbf16, #tpu.memory_space<vmem>>, vector<1x128x128xbf16>
    %10 = vector.shape_cast %9 : vector<1x128x128xbf16> to vector<128x128xbf16>
    %c1 = arith.constant 1 : index
    %c0_12 = arith.constant 0 : index
    %c0_13 = arith.constant 0 : index
    %11 = vector.load %arg1[%c1, %c0_12, %c0_13] : memref<4x128x128xbf16, #tpu.memory_space<vmem>>, vector<1x128x128xbf16>
    %12 = vector.shape_cast %11 : vector<1x128x128xbf16> to vector<128x128xbf16>
    %c1_14 = arith.constant 1 : index
    %c0_15 = arith.constant 0 : index
    %c0_16 = arith.constant 0 : index
    %13 = vector.load %arg3[%c1_14, %c0_15, %c0_16] : memref<4x1x128xf32, #tpu.memory_space<vmem>>, vector<1x1x128xf32>
    %14 = vector.shape_cast %13 : vector<1x1x128xf32> to vector<1x128xf32>
    %c0_17 = arith.constant 0 : index
    %c0_18 = arith.constant 0 : index
    %c0_19 = arith.constant 0 : index
    %15 = vector.load %arg4[%c0_17, %c0_18, %c0_19] : memref<4x8x128xf32, #tpu.memory_space<vmem>>, vector<1x8x128xf32>
    %16 = vector.shape_cast %15 : vector<1x8x128xf32> to vector<8x128xf32>
    %c0_20 = arith.constant 0 : index
    %c0_21 = arith.constant 0 : index
    %c0_22 = arith.constant 0 : index
    %17 = vector.load %arg5[%c0_20, %c0_21, %c0_22] : memref<4x8x128xf32, #tpu.memory_space<vmem>>, vector<1x8x128xf32>
    %18 = vector.shape_cast %17 : vector<1x8x128xf32> to vector<8x128xf32>
    %19 = arith.truncf %16 : vector<8x128xf32> to vector<8x128xbf16>
    %c0_23 = arith.constant 0 : index
    %c0_24 = arith.constant 0 : index
    %20 = vector.load %arg11[%c0_23, %c0_24] : memref<64x128xf32, #tpu.memory_space<vmem>>, vector<8x128xf32>
    %cst_25 = arith.constant dense<0.000000e+00> : vector<8x128xf32>
    %21 = tpu.matmul %19, %10, %cst_25 {dimension_numbers = #tpu.dot_dimension_numbers<[1], [0], [0], [1], [0, 0, 1, 1], [], []>} : vector<8x128xbf16>, vector<128x128xbf16>, vector<8x128xf32> -> vector<8x128xf32>
    %22 = arith.addf %20, %21 : vector<8x128xf32>
    %23 = arith.negf %22 : vector<8x128xf32>
    %24 = math.exp %23 : vector<8x128xf32>
    %cst_26 = arith.constant 1.000000e+00 : f32
    %25 = vector.broadcast %cst_26 : f32 to vector<8x128xf32>
    %26 = arith.addf %25, %24 : vector<8x128xf32>
    %27 = arith.divf %25, %26 : vector<8x128xf32>
    %28 = math.tanh %22 : vector<8x128xf32>
    %c16_i32 = arith.constant 16 : i32
    %29 = tpu.dynamic_rotate %27 by %c16_i32 dim 1 : vector<8x128xf32>, i32 -> vector<8x128xf32>
    %c32_i32 = arith.constant 32 : i32
    %30 = tpu.dynamic_rotate %28 by %c32_i32 dim 1 : vector<8x128xf32>, i32 -> vector<8x128xf32>
    %c48_i32 = arith.constant 48 : i32
    %31 = tpu.dynamic_rotate %27 by %c48_i32 dim 1 : vector<8x128xf32>, i32 -> vector<8x128xf32>
    %32 = arith.mulf %29, %18 : vector<8x128xf32>
    %33 = arith.mulf %27, %30 : vector<8x128xf32>
    %34 = arith.addf %32, %33 : vector<8x128xf32>
    %35 = math.tanh %34 : vector<8x128xf32>
    %36 = arith.mulf %31, %35 : vector<8x128xf32>
    %37 = arith.truncf %36 : vector<8x128xf32> to vector<8x128xbf16>
    %cst_27 = arith.constant dense<0.000000e+00> : vector<8x128xf32>
    %38 = tpu.matmul %37, %12, %cst_27 {dimension_numbers = #tpu.dot_dimension_numbers<[1], [0], [0], [1], [0, 0, 1, 1], [], []>} : vector<8x128xbf16>, vector<128x128xbf16>, vector<8x128xf32> -> vector<8x128xf32>
    %39 = vector.broadcast %14 : vector<1x128xf32> to vector<8x128xf32>
    %40 = arith.addf %38, %39 : vector<8x128xf32>
    %c0_28 = arith.constant 0 : index
    %c0_29 = arith.constant 0 : index
    %41 = vector.load %arg12[%c0_28, %c0_29] : memref<64x128xf32, #tpu.memory_space<vmem>>, vector<8x128xf32>
    tpu.vector_store %arg12[%c0_28, %c0_29], %40 {strides = array<i32>} : memref<64x128xf32, #tpu.memory_space<vmem>>, vector<8x128xf32>,
    %c8 = arith.constant 8 : index
    %c0_30 = arith.constant 0 : index
    %42 = vector.load %arg11[%c8, %c0_30] : memref<64x128xf32, #tpu.memory_space<vmem>>, vector<8x128xf32>
    %cst_31 = arith.constant dense<0.000000e+00> : vector<8x128xf32>
    %43 = tpu.matmul %37, %10, %cst_31 {dimension_numbers = #tpu.dot_dimension_numbers<[1], [0], [0], [1], [0, 0, 1, 1], [], []>} : vector<8x128xbf16>, vector<128x128xbf16>, vector<8x128xf32> -> vector<8x128xf32>
    %44 = arith.addf %42, %43 : vector<8x128xf32>
    %45 = arith.negf %44 : vector<8x128xf32>
    %46 = math.exp %45 : vector<8x128xf32>
    %cst_32 = arith.constant 1.000000e+00 : f32
    %47 = vector.broadcast %cst_32 : f32 to vector<8x128xf32>
    %48 = arith.addf %47, %46 : vector<8x128xf32>
    %49 = arith.divf %47, %48 : vector<8x128xf32>
    %50 = math.tanh %44 : vector<8x128xf32>
    %c16_i32_33 = arith.constant 16 : i32
    %51 = tpu.dynamic_rotate %49 by %c16_i32_33 dim 1 : vector<8x128xf32>, i32 -> vector<8x128xf32>
    %c32_i32_34 = arith.constant 32 : i32
    %52 = tpu.dynamic_rotate %50 by %c32_i32_34 dim 1 : vector<8x128xf32>, i32 -> vector<8x128xf32>
    %c48_i32_35 = arith.constant 48 : i32
    %53 = tpu.dynamic_rotate %49 by %c48_i32_35 dim 1 : vector<8x128xf32>, i32 -> vector<8x128xf32>
    %54 = arith.mulf %51, %34 : vector<8x128xf32>
    %55 = arith.mulf %49, %52 : vector<8x128xf32>
    %56 = arith.addf %54, %55 : vector<8x128xf32>
    %57 = math.tanh %56 : vector<8x128xf32>
    %58 = arith.mulf %53, %57 : vector<8x128xf32>
    %59 = arith.truncf %58 : vector<8x128xf32> to vector<8x128xbf16>
    %cst_36 = arith.constant dense<0.000000e+00> : vector<8x128xf32>
    %60 = tpu.matmul %59, %12, %cst_36 {dimension_numbers = #tpu.dot_dimension_numbers<[1], [0], [0], [1], [0, 0, 1, 1], [], []>} : vector<8x128xbf16>, vector<128x128xbf16>, vector<8x128xf32> -> vector<8x128xf32>
    %61 = vector.broadcast %14 : vector<1x128xf32> to vector<8x128xf32>
    %62 = arith.addf %60, %61 : vector<8x128xf32>
    %c8_37 = arith.constant 8 : index
    %c0_38 = arith.constant 0 : index
    %63 = vector.load %arg12[%c8_37, %c0_38] : memref<64x128xf32, #tpu.memory_space<vmem>>, vector<8x128xf32>
    tpu.vector_store %arg12[%c8_37, %c0_38], %62 {strides = array<i32>} : memref<64x128xf32, #tpu.memory_space<vmem>>, vector<8x128xf32>,
    %c16 = arith.constant 16 : index
    %c0_39 = arith.constant 0 : index
    %64 = vector.load %arg11[%c16, %c0_39] : memref<64x128xf32, #tpu.memory_space<vmem>>, vector<8x128xf32>
    %cst_40 = arith.constant dense<0.000000e+00> : vector<8x128xf32>
    %65 = tpu.matmul %59, %10, %cst_40 {dimension_numbers = #tpu.dot_dimension_numbers<[1], [0], [0], [1], [0, 0, 1, 1], [], []>} : vector<8x128xbf16>, vector<128x128xbf16>, vector<8x128xf32> -> vector<8x128xf32>
    %66 = arith.addf %64, %65 : vector<8x128xf32>
    %67 = arith.negf %66 : vector<8x128xf32>
    %68 = math.exp %67 : vector<8x128xf32>
    %cst_41 = arith.constant 1.000000e+00 : f32
    %69 = vector.broadcast %cst_41 : f32 to vector<8x128xf32>
    %70 = arith.addf %69, %68 : vector<8x128xf32>
    %71 = arith.divf %69, %70 : vector<8x128xf32>
    %72 = math.tanh %66 : vector<8x128xf32>
    %c16_i32_42 = arith.constant 16 : i32
    %73 = tpu.dynamic_rotate %71 by %c16_i32_42 dim 1 : vector<8x128xf32>, i32 -> vector<8x128xf32>
    %c32_i32_43 = arith.constant 32 : i32
    %74 = tpu.dynamic_rotate %72 by %c32_i32_43 dim 1 : vector<8x128xf32>, i32 -> vector<8x128xf32>
    %c48_i32_44 = arith.constant 48 : i32
    %75 = tpu.dynamic_rotate %71 by %c48_i32_44 dim 1 : vector<8x128xf32>, i32 -> vector<8x128xf32>
    %76 = arith.mulf %73, %56 : vector<8x128xf32>
    %77 = arith.mulf %71, %74 : vector<8x128xf32>
    %78 = arith.addf %76, %77 : vector<8x128xf32>
    %79 = math.tanh %78 : vector<8x128xf32>
    %80 = arith.mulf %75, %79 : vector<8x128xf32>
    %81 = arith.truncf %80 : vector<8x128xf32> to vector<8x128xbf16>
    %cst_45 = arith.constant dense<0.000000e+00> : vector<8x128xf32>
    %82 = tpu.matmul %81, %12, %cst_45 {dimension_numbers = #tpu.dot_dimension_numbers<[1], [0], [0], [1], [0, 0, 1, 1], [], []>} : vector<8x128xbf16>, vector<128x128xbf16>, vector<8x128xf32> -> vector<8x128xf32>
    %83 = vector.broadcast %14 : vector<1x128xf32> to vector<8x128xf32>
    %84 = arith.addf %82, %83 : vector<8x128xf32>
    %c16_46 = arith.constant 16 : index
    %c0_47 = arith.constant 0 : index
    %85 = vector.load %arg12[%c16_46, %c0_47] : memref<64x128xf32, #tpu.memory_space<vmem>>, vector<8x128xf32>
    tpu.vector_store %arg12[%c16_46, %c0_47], %84 {strides = array<i32>} : memref<64x128xf32, #tpu.memory_space<vmem>>, vector<8x128xf32>,
    %c24 = arith.constant 24 : index
    %c0_48 = arith.constant 0 : index
    %86 = vector.load %arg11[%c24, %c0_48] : memref<64x128xf32, #tpu.memory_space<vmem>>, vector<8x128xf32>
    %cst_49 = arith.constant dense<0.000000e+00> : vector<8x128xf32>
    %87 = tpu.matmul %81, %10, %cst_49 {dimension_numbers = #tpu.dot_dimension_numbers<[1], [0], [0], [1], [0, 0, 1, 1], [], []>} : vector<8x128xbf16>, vector<128x128xbf16>, vector<8x128xf32> -> vector<8x128xf32>
    %88 = arith.addf %86, %87 : vector<8x128xf32>
    %89 = arith.negf %88 : vector<8x128xf32>
    %90 = math.exp %89 : vector<8x128xf32>
    %cst_50 = arith.constant 1.000000e+00 : f32
    %91 = vector.broadcast %cst_50 : f32 to vector<8x128xf32>
    %92 = arith.addf %91, %90 : vector<8x128xf32>
    %93 = arith.divf %91, %92 : vector<8x128xf32>
    %94 = math.tanh %88 : vector<8x128xf32>
    %c16_i32_51 = arith.constant 16 : i32
    %95 = tpu.dynamic_rotate %93 by %c16_i32_51 dim 1 : vector<8x128xf32>, i32 -> vector<8x128xf32>
    %c32_i32_52 = arith.constant 32 : i32
    %96 = tpu.dynamic_rotate %94 by %c32_i32_52 dim 1 : vector<8x128xf32>, i32 -> vector<8x128xf32>
    %c48_i32_53 = arith.constant 48 : i32
    %97 = tpu.dynamic_rotate %93 by %c48_i32_53 dim 1 : vector<8x128xf32>, i32 -> vector<8x128xf32>
    %98 = arith.mulf %95, %78 : vector<8x128xf32>
    %99 = arith.mulf %93, %96 : vector<8x128xf32>
    %100 = arith.addf %98, %99 : vector<8x128xf32>
    %101 = math.tanh %100 : vector<8x128xf32>
    %102 = arith.mulf %97, %101 : vector<8x128xf32>
    %103 = arith.truncf %102 : vector<8x128xf32> to vector<8x128xbf16>
    %cst_54 = arith.constant dense<0.000000e+00> : vector<8x128xf32>
    %104 = tpu.matmul %103, %12, %cst_54 {dimension_numbers = #tpu.dot_dimension_numbers<[1], [0], [0], [1], [0, 0, 1, 1], [], []>} : vector<8x128xbf16>, vector<128x128xbf16>, vector<8x128xf32> -> vector<8x128xf32>
    %105 = vector.broadcast %14 : vector<1x128xf32> to vector<8x128xf32>
    %106 = arith.addf %104, %105 : vector<8x128xf32>
    %c24_55 = arith.constant 24 : index
    %c0_56 = arith.constant 0 : index
    %107 = vector.load %arg12[%c24_55, %c0_56] : memref<64x128xf32, #tpu.memory_space<vmem>>, vector<8x128xf32>
    tpu.vector_store %arg12[%c24_55, %c0_56], %106 {strides = array<i32>} : memref<64x128xf32, #tpu.memory_space<vmem>>, vector<8x128xf32>,
    %c32 = arith.constant 32 : index
    %c0_57 = arith.constant 0 : index
    %108 = vector.load %arg11[%c32, %c0_57] : memref<64x128xf32, #tpu.memory_space<vmem>>, vector<8x128xf32>
    %cst_58 = arith.constant dense<0.000000e+00> : vector<8x128xf32>
    %109 = tpu.matmul %103, %10, %cst_58 {dimension_numbers = #tpu.dot_dimension_numbers<[1], [0], [0], [1], [0, 0, 1, 1], [], []>} : vector<8x128xbf16>, vector<128x128xbf16>, vector<8x128xf32> -> vector<8x128xf32>
    %110 = arith.addf %108, %109 : vector<8x128xf32>
    %111 = arith.negf %110 : vector<8x128xf32>
    %112 = math.exp %111 : vector<8x128xf32>
    %cst_59 = arith.constant 1.000000e+00 : f32
    %113 = vector.broadcast %cst_59 : f32 to vector<8x128xf32>
    %114 = arith.addf %113, %112 : vector<8x128xf32>
    %115 = arith.divf %113, %114 : vector<8x128xf32>
    %116 = math.tanh %110 : vector<8x128xf32>
    %c16_i32_60 = arith.constant 16 : i32
    %117 = tpu.dynamic_rotate %115 by %c16_i32_60 dim 1 : vector<8x128xf32>, i32 -> vector<8x128xf32>
    %c32_i32_61 = arith.constant 32 : i32
    %118 = tpu.dynamic_rotate %116 by %c32_i32_61 dim 1 : vector<8x128xf32>, i32 -> vector<8x128xf32>
    %c48_i32_62 = arith.constant 48 : i32
    %119 = tpu.dynamic_rotate %115 by %c48_i32_62 dim 1 : vector<8x128xf32>, i32 -> vector<8x128xf32>
    %120 = arith.mulf %117, %100 : vector<8x128xf32>
    %121 = arith.mulf %115, %118 : vector<8x128xf32>
    %122 = arith.addf %120, %121 : vector<8x128xf32>
    %123 = math.tanh %122 : vector<8x128xf32>
    %124 = arith.mulf %119, %123 : vector<8x128xf32>
    %125 = arith.truncf %124 : vector<8x128xf32> to vector<8x128xbf16>
    %cst_63 = arith.constant dense<0.000000e+00> : vector<8x128xf32>
    %126 = tpu.matmul %125, %12, %cst_63 {dimension_numbers = #tpu.dot_dimension_numbers<[1], [0], [0], [1], [0, 0, 1, 1], [], []>} : vector<8x128xbf16>, vector<128x128xbf16>, vector<8x128xf32> -> vector<8x128xf32>
    %127 = vector.broadcast %14 : vector<1x128xf32> to vector<8x128xf32>
    %128 = arith.addf %126, %127 : vector<8x128xf32>
    %c32_64 = arith.constant 32 : index
    %c0_65 = arith.constant 0 : index
    %129 = vector.load %arg12[%c32_64, %c0_65] : memref<64x128xf32, #tpu.memory_space<vmem>>, vector<8x128xf32>
    tpu.vector_store %arg12[%c32_64, %c0_65], %128 {strides = array<i32>} : memref<64x128xf32, #tpu.memory_space<vmem>>, vector<8x128xf32>,
    %c40 = arith.constant 40 : index
    %c0_66 = arith.constant 0 : index
    %130 = vector.load %arg11[%c40, %c0_66] : memref<64x128xf32, #tpu.memory_space<vmem>>, vector<8x128xf32>
    %cst_67 = arith.constant dense<0.000000e+00> : vector<8x128xf32>
    %131 = tpu.matmul %125, %10, %cst_67 {dimension_numbers = #tpu.dot_dimension_numbers<[1], [0], [0], [1], [0, 0, 1, 1], [], []>} : vector<8x128xbf16>, vector<128x128xbf16>, vector<8x128xf32> -> vector<8x128xf32>
    %132 = arith.addf %130, %131 : vector<8x128xf32>
    %133 = arith.negf %132 : vector<8x128xf32>
    %134 = math.exp %133 : vector<8x128xf32>
    %cst_68 = arith.constant 1.000000e+00 : f32
    %135 = vector.broadcast %cst_68 : f32 to vector<8x128xf32>
    %136 = arith.addf %135, %134 : vector<8x128xf32>
    %137 = arith.divf %135, %136 : vector<8x128xf32>
    %138 = math.tanh %132 : vector<8x128xf32>
    %c16_i32_69 = arith.constant 16 : i32
    %139 = tpu.dynamic_rotate %137 by %c16_i32_69 dim 1 : vector<8x128xf32>, i32 -> vector<8x128xf32>
    %c32_i32_70 = arith.constant 32 : i32
    %140 = tpu.dynamic_rotate %138 by %c32_i32_70 dim 1 : vector<8x128xf32>, i32 -> vector<8x128xf32>
    %c48_i32_71 = arith.constant 48 : i32
    %141 = tpu.dynamic_rotate %137 by %c48_i32_71 dim 1 : vector<8x128xf32>, i32 -> vector<8x128xf32>
    %142 = arith.mulf %139, %122 : vector<8x128xf32>
    %143 = arith.mulf %137, %140 : vector<8x128xf32>
    %144 = arith.addf %142, %143 : vector<8x128xf32>
    %145 = math.tanh %144 : vector<8x128xf32>
    %146 = arith.mulf %141, %145 : vector<8x128xf32>
    %147 = arith.truncf %146 : vector<8x128xf32> to vector<8x128xbf16>
    %cst_72 = arith.constant dense<0.000000e+00> : vector<8x128xf32>
    %148 = tpu.matmul %147, %12, %cst_72 {dimension_numbers = #tpu.dot_dimension_numbers<[1], [0], [0], [1], [0, 0, 1, 1], [], []>} : vector<8x128xbf16>, vector<128x128xbf16>, vector<8x128xf32> -> vector<8x128xf32>
    %149 = vector.broadcast %14 : vector<1x128xf32> to vector<8x128xf32>
    %150 = arith.addf %148, %149 : vector<8x128xf32>
    %c40_73 = arith.constant 40 : index
    %c0_74 = arith.constant 0 : index
    %151 = vector.load %arg12[%c40_73, %c0_74] : memref<64x128xf32, #tpu.memory_space<vmem>>, vector<8x128xf32>
    tpu.vector_store %arg12[%c40_73, %c0_74], %150 {strides = array<i32>} : memref<64x128xf32, #tpu.memory_space<vmem>>, vector<8x128xf32>,
    %c48 = arith.constant 48 : index
    %c0_75 = arith.constant 0 : index
    %152 = vector.load %arg11[%c48, %c0_75] : memref<64x128xf32, #tpu.memory_space<vmem>>, vector<8x128xf32>
    %cst_76 = arith.constant dense<0.000000e+00> : vector<8x128xf32>
    %153 = tpu.matmul %147, %10, %cst_76 {dimension_numbers = #tpu.dot_dimension_numbers<[1], [0], [0], [1], [0, 0, 1, 1], [], []>} : vector<8x128xbf16>, vector<128x128xbf16>, vector<8x128xf32> -> vector<8x128xf32>
    %154 = arith.addf %152, %153 : vector<8x128xf32>
    %155 = arith.negf %154 : vector<8x128xf32>
    %156 = math.exp %155 : vector<8x128xf32>
    %cst_77 = arith.constant 1.000000e+00 : f32
    %157 = vector.broadcast %cst_77 : f32 to vector<8x128xf32>
    %158 = arith.addf %157, %156 : vector<8x128xf32>
    %159 = arith.divf %157, %158 : vector<8x128xf32>
    %160 = math.tanh %154 : vector<8x128xf32>
    %c16_i32_78 = arith.constant 16 : i32
    %161 = tpu.dynamic_rotate %159 by %c16_i32_78 dim 1 : vector<8x128xf32>, i32 -> vector<8x128xf32>
    %c32_i32_79 = arith.constant 32 : i32
    %162 = tpu.dynamic_rotate %160 by %c32_i32_79 dim 1 : vector<8x128xf32>, i32 -> vector<8x128xf32>
    %c48_i32_80 = arith.constant 48 : i32
    %163 = tpu.dynamic_rotate %159 by %c48_i32_80 dim 1 : vector<8x128xf32>, i32 -> vector<8x128xf32>
    %164 = arith.mulf %161, %144 : vector<8x128xf32>
    %165 = arith.mulf %159, %162 : vector<8x128xf32>
    %166 = arith.addf %164, %165 : vector<8x128xf32>
    %167 = math.tanh %166 : vector<8x128xf32>
    %168 = arith.mulf %163, %167 : vector<8x128xf32>
    %169 = arith.truncf %168 : vector<8x128xf32> to vector<8x128xbf16>
    %cst_81 = arith.constant dense<0.000000e+00> : vector<8x128xf32>
    %170 = tpu.matmul %169, %12, %cst_81 {dimension_numbers = #tpu.dot_dimension_numbers<[1], [0], [0], [1], [0, 0, 1, 1], [], []>} : vector<8x128xbf16>, vector<128x128xbf16>, vector<8x128xf32> -> vector<8x128xf32>
    %171 = vector.broadcast %14 : vector<1x128xf32> to vector<8x128xf32>
    %172 = arith.addf %170, %171 : vector<8x128xf32>
    %c48_82 = arith.constant 48 : index
    %c0_83 = arith.constant 0 : index
    %173 = vector.load %arg12[%c48_82, %c0_83] : memref<64x128xf32, #tpu.memory_space<vmem>>, vector<8x128xf32>
    tpu.vector_store %arg12[%c48_82, %c0_83], %172 {strides = array<i32>} : memref<64x128xf32, #tpu.memory_space<vmem>>, vector<8x128xf32>,
    %c56 = arith.constant 56 : index
    %c0_84 = arith.constant 0 : index
    %174 = vector.load %arg11[%c56, %c0_84] : memref<64x128xf32, #tpu.memory_space<vmem>>, vector<8x128xf32>
    %cst_85 = arith.constant dense<0.000000e+00> : vector<8x128xf32>
    %175 = tpu.matmul %169, %10, %cst_85 {dimension_numbers = #tpu.dot_dimension_numbers<[1], [0], [0], [1], [0, 0, 1, 1], [], []>} : vector<8x128xbf16>, vector<128x128xbf16>, vector<8x128xf32> -> vector<8x128xf32>
    %176 = arith.addf %174, %175 : vector<8x128xf32>
    %177 = arith.negf %176 : vector<8x128xf32>
    %178 = math.exp %177 : vector<8x128xf32>
    %cst_86 = arith.constant 1.000000e+00 : f32
    %179 = vector.broadcast %cst_86 : f32 to vector<8x128xf32>
    %180 = arith.addf %179, %178 : vector<8x128xf32>
    %181 = arith.divf %179, %180 : vector<8x128xf32>
    %182 = math.tanh %176 : vector<8x128xf32>
    %c16_i32_87 = arith.constant 16 : i32
    %183 = tpu.dynamic_rotate %181 by %c16_i32_87 dim 1 : vector<8x128xf32>, i32 -> vector<8x128xf32>
    %c32_i32_88 = arith.constant 32 : i32
    %184 = tpu.dynamic_rotate %182 by %c32_i32_88 dim 1 : vector<8x128xf32>, i32 -> vector<8x128xf32>
    %c48_i32_89 = arith.constant 48 : i32
    %185 = tpu.dynamic_rotate %181 by %c48_i32_89 dim 1 : vector<8x128xf32>, i32 -> vector<8x128xf32>
    %186 = arith.mulf %183, %166 : vector<8x128xf32>
    %187 = arith.mulf %181, %184 : vector<8x128xf32>
    %188 = arith.addf %186, %187 : vector<8x128xf32>
    %189 = math.tanh %188 : vector<8x128xf32>
    %190 = arith.mulf %185, %189 : vector<8x128xf32>
    %191 = arith.truncf %190 : vector<8x128xf32> to vector<8x128xbf16>
    %cst_90 = arith.constant dense<0.000000e+00> : vector<8x128xf32>
    %192 = tpu.matmul %191, %12, %cst_90 {dimension_numbers = #tpu.dot_dimension_numbers<[1], [0], [0], [1], [0, 0, 1, 1], [], []>} : vector<8x128xbf16>, vector<128x128xbf16>, vector<8x128xf32> -> vector<8x128xf32>
    %193 = vector.broadcast %14 : vector<1x128xf32> to vector<8x128xf32>
    %194 = arith.addf %192, %193 : vector<8x128xf32>
    %c56_91 = arith.constant 56 : index
    %c0_92 = arith.constant 0 : index
    %195 = vector.load %arg12[%c56_91, %c0_92] : memref<64x128xf32, #tpu.memory_space<vmem>>, vector<8x128xf32>
    tpu.vector_store %arg12[%c56_91, %c0_92], %194 {strides = array<i32>} : memref<64x128xf32, #tpu.memory_space<vmem>>, vector<8x128xf32>,
    %c0_93 = arith.constant 0 : index
    %c0_94 = arith.constant 0 : index
    %c0_95 = arith.constant 0 : index
    %196 = vector.load %arg9[%c0_93, %c0_94, %c0_95] : memref<4x8x128xf32, #tpu.memory_space<vmem>>, vector<1x8x128xf32>
    %197 = vector.shape_cast %196 : vector<1x8x128xf32> to vector<8x128xf32>
    %198 = vector.shape_cast %190 : vector<8x128xf32> to vector<1x8x128xf32>
    tpu.vector_store %arg9[%c0_93, %c0_94, %c0_95], %198 {strides = array<i32>} : memref<4x8x128xf32, #tpu.memory_space<vmem>>, vector<1x8x128xf32>,
    %c0_96 = arith.constant 0 : index
    %c0_97 = arith.constant 0 : index
    %c0_98 = arith.constant 0 : index
    %199 = vector.load %arg10[%c0_96, %c0_97, %c0_98] : memref<4x8x128xf32, #tpu.memory_space<vmem>>, vector<1x8x128xf32>
    %200 = vector.shape_cast %199 : vector<1x8x128xf32> to vector<8x128xf32>
    %201 = vector.shape_cast %188 : vector<8x128xf32> to vector<1x8x128xf32>
    tpu.vector_store %arg10[%c0_96, %c0_97, %c0_98], %201 {strides = array<i32>} : memref<4x8x128xf32, #tpu.memory_space<vmem>>, vector<1x8x128xf32>,
    %c1_99 = arith.constant 1 : index
    %c0_100 = arith.constant 0 : index
    %c0_101 = arith.constant 0 : index
    %202 = vector.load %arg2[%c1_99, %c0_100, %c0_101] : memref<4x128x128xbf16, #tpu.memory_space<vmem>>, vector<1x128x128xbf16>
    %203 = vector.shape_cast %202 : vector<1x128x128xbf16> to vector<128x128xbf16>
    %c2 = arith.constant 2 : index
    %c0_102 = arith.constant 0 : index
    %c0_103 = arith.constant 0 : index
    %204 = vector.load %arg1[%c2, %c0_102, %c0_103] : memref<4x128x128xbf16, #tpu.memory_space<vmem>>, vector<1x128x128xbf16>
    %205 = vector.shape_cast %204 : vector<1x128x128xbf16> to vector<128x128xbf16>
    %c2_104 = arith.constant 2 : index
    %c0_105 = arith.constant 0 : index
    %c0_106 = arith.constant 0 : index
    %206 = vector.load %arg3[%c2_104, %c0_105, %c0_106] : memref<4x1x128xf32, #tpu.memory_space<vmem>>, vector<1x1x128xf32>
    %207 = vector.shape_cast %206 : vector<1x1x128xf32> to vector<1x128xf32>
    %c1_107 = arith.constant 1 : index
    %c0_108 = arith.constant 0 : index
    %c0_109 = arith.constant 0 : index
    %208 = vector.load %arg4[%c1_107, %c0_108, %c0_109] : memref<4x8x128xf32, #tpu.memory_space<vmem>>, vector<1x8x128xf32>
    %209 = vector.shape_cast %208 : vector<1x8x128xf32> to vector<8x128xf32>
    %c1_110 = arith.constant 1 : index
    %c0_111 = arith.constant 0 : index
    %c0_112 = arith.constant 0 : index
    %210 = vector.load %arg5[%c1_110, %c0_111, %c0_112] : memref<4x8x128xf32, #tpu.memory_space<vmem>>, vector<1x8x128xf32>
    %211 = vector.shape_cast %210 : vector<1x8x128xf32> to vector<8x128xf32>
    %212 = arith.truncf %209 : vector<8x128xf32> to vector<8x128xbf16>
    %c0_113 = arith.constant 0 : index
    %c0_114 = arith.constant 0 : index
    %213 = vector.load %arg12[%c0_113, %c0_114] : memref<64x128xf32, #tpu.memory_space<vmem>>, vector<8x128xf32>
    %cst_115 = arith.constant dense<0.000000e+00> : vector<8x128xf32>
    %214 = tpu.matmul %212, %203, %cst_115 {dimension_numbers = #tpu.dot_dimension_numbers<[1], [0], [0], [1], [0, 0, 1, 1], [], []>} : vector<8x128xbf16>, vector<128x128xbf16>, vector<8x128xf32> -> vector<8x128xf32>
    %215 = arith.addf %213, %214 : vector<8x128xf32>
    %216 = arith.negf %215 : vector<8x128xf32>
    %217 = math.exp %216 : vector<8x128xf32>
    %cst_116 = arith.constant 1.000000e+00 : f32
    %218 = vector.broadcast %cst_116 : f32 to vector<8x128xf32>
    %219 = arith.addf %218, %217 : vector<8x128xf32>
    %220 = arith.divf %218, %219 : vector<8x128xf32>
    %221 = math.tanh %215 : vector<8x128xf32>
    %c16_i32_117 = arith.constant 16 : i32
    %222 = tpu.dynamic_rotate %220 by %c16_i32_117 dim 1 : vector<8x128xf32>, i32 -> vector<8x128xf32>
    %c32_i32_118 = arith.constant 32 : i32
    %223 = tpu.dynamic_rotate %221 by %c32_i32_118 dim 1 : vector<8x128xf32>, i32 -> vector<8x128xf32>
    %c48_i32_119 = arith.constant 48 : i32
    %224 = tpu.dynamic_rotate %220 by %c48_i32_119 dim 1 : vector<8x128xf32>, i32 -> vector<8x128xf32>
    %225 = arith.mulf %222, %211 : vector<8x128xf32>
    %226 = arith.mulf %220, %223 : vector<8x128xf32>
    %227 = arith.addf %225, %226 : vector<8x128xf32>
    %228 = math.tanh %227 : vector<8x128xf32>
    %229 = arith.mulf %224, %228 : vector<8x128xf32>
    %230 = arith.truncf %229 : vector<8x128xf32> to vector<8x128xbf16>
    %cst_120 = arith.constant dense<0.000000e+00> : vector<8x128xf32>
    %231 = tpu.matmul %230, %205, %cst_120 {dimension_numbers = #tpu.dot_dimension_numbers<[1], [0], [0], [1], [0, 0, 1, 1], [], []>} : vector<8x128xbf16>, vector<128x128xbf16>, vector<8x128xf32> -> vector<8x128xf32>
    %232 = vector.broadcast %207 : vector<1x128xf32> to vector<8x128xf32>
    %233 = arith.addf %231, %232 : vector<8x128xf32>
    %c0_121 = arith.constant 0 : index
    %c0_122 = arith.constant 0 : index
    %234 = vector.load %arg11[%c0_121, %c0_122] : memref<64x128xf32, #tpu.memory_space<vmem>>, vector<8x128xf32>
    tpu.vector_store %arg11[%c0_121, %c0_122], %233 {strides = array<i32>} : memref<64x128xf32, #tpu.memory_space<vmem>>, vector<8x128xf32>,
    %c8_123 = arith.constant 8 : index
    %c0_124 = arith.constant 0 : index
    %235 = vector.load %arg12[%c8_123, %c0_124] : memref<64x128xf32, #tpu.memory_space<vmem>>, vector<8x128xf32>
    %cst_125 = arith.constant dense<0.000000e+00> : vector<8x128xf32>
    %236 = tpu.matmul %230, %203, %cst_125 {dimension_numbers = #tpu.dot_dimension_numbers<[1], [0], [0], [1], [0, 0, 1, 1], [], []>} : vector<8x128xbf16>, vector<128x128xbf16>, vector<8x128xf32> -> vector<8x128xf32>
    %237 = arith.addf %235, %236 : vector<8x128xf32>
    %238 = arith.negf %237 : vector<8x128xf32>
    %239 = math.exp %238 : vector<8x128xf32>
    %cst_126 = arith.constant 1.000000e+00 : f32
    %240 = vector.broadcast %cst_126 : f32 to vector<8x128xf32>
    %241 = arith.addf %240, %239 : vector<8x128xf32>
    %242 = arith.divf %240, %241 : vector<8x128xf32>
    %243 = math.tanh %237 : vector<8x128xf32>
    %c16_i32_127 = arith.constant 16 : i32
    %244 = tpu.dynamic_rotate %242 by %c16_i32_127 dim 1 : vector<8x128xf32>, i32 -> vector<8x128xf32>
    %c32_i32_128 = arith.constant 32 : i32
    %245 = tpu.dynamic_rotate %243 by %c32_i32_128 dim 1 : vector<8x128xf32>, i32 -> vector<8x128xf32>
    %c48_i32_129 = arith.constant 48 : i32
    %246 = tpu.dynamic_rotate %242 by %c48_i32_129 dim 1 : vector<8x128xf32>, i32 -> vector<8x128xf32>
    %247 = arith.mulf %244, %227 : vector<8x128xf32>
    %248 = arith.mulf %242, %245 : vector<8x128xf32>
    %249 = arith.addf %247, %248 : vector<8x128xf32>
    %250 = math.tanh %249 : vector<8x128xf32>
    %251 = arith.mulf %246, %250 : vector<8x128xf32>
    %252 = arith.truncf %251 : vector<8x128xf32> to vector<8x128xbf16>
    %cst_130 = arith.constant dense<0.000000e+00> : vector<8x128xf32>
    %253 = tpu.matmul %252, %205, %cst_130 {dimension_numbers = #tpu.dot_dimension_numbers<[1], [0], [0], [1], [0, 0, 1, 1], [], []>} : vector<8x128xbf16>, vector<128x128xbf16>, vector<8x128xf32> -> vector<8x128xf32>
    %254 = vector.broadcast %207 : vector<1x128xf32> to vector<8x128xf32>
    %255 = arith.addf %253, %254 : vector<8x128xf32>
    %c8_131 = arith.constant 8 : index
    %c0_132 = arith.constant 0 : index
    %256 = vector.load %arg11[%c8_131, %c0_132] : memref<64x128xf32, #tpu.memory_space<vmem>>, vector<8x128xf32>
    tpu.vector_store %arg11[%c8_131, %c0_132], %255 {strides = array<i32>} : memref<64x128xf32, #tpu.memory_space<vmem>>, vector<8x128xf32>,
    %c16_133 = arith.constant 16 : index
    %c0_134 = arith.constant 0 : index
    %257 = vector.load %arg12[%c16_133, %c0_134] : memref<64x128xf32, #tpu.memory_space<vmem>>, vector<8x128xf32>
    %cst_135 = arith.constant dense<0.000000e+00> : vector<8x128xf32>
    %258 = tpu.matmul %252, %203, %cst_135 {dimension_numbers = #tpu.dot_dimension_numbers<[1], [0], [0], [1], [0, 0, 1, 1], [], []>} : vector<8x128xbf16>, vector<128x128xbf16>, vector<8x128xf32> -> vector<8x128xf32>
    %259 = arith.addf %257, %258 : vector<8x128xf32>
    %260 = arith.negf %259 : vector<8x128xf32>
    %261 = math.exp %260 : vector<8x128xf32>
    %cst_136 = arith.constant 1.000000e+00 : f32
    %262 = vector.broadcast %cst_136 : f32 to vector<8x128xf32>
    %263 = arith.addf %262, %261 : vector<8x128xf32>
    %264 = arith.divf %262, %263 : vector<8x128xf32>
    %265 = math.tanh %259 : vector<8x128xf32>
    %c16_i32_137 = arith.constant 16 : i32
    %266 = tpu.dynamic_rotate %264 by %c16_i32_137 dim 1 : vector<8x128xf32>, i32 -> vector<8x128xf32>
    %c32_i32_138 = arith.constant 32 : i32
    %267 = tpu.dynamic_rotate %265 by %c32_i32_138 dim 1 : vector<8x128xf32>, i32 -> vector<8x128xf32>
    %c48_i32_139 = arith.constant 48 : i32
    %268 = tpu.dynamic_rotate %264 by %c48_i32_139 dim 1 : vector<8x128xf32>, i32 -> vector<8x128xf32>
    %269 = arith.mulf %266, %249 : vector<8x128xf32>
    %270 = arith.mulf %264, %267 : vector<8x128xf32>
    %271 = arith.addf %269, %270 : vector<8x128xf32>
    %272 = math.tanh %271 : vector<8x128xf32>
    %273 = arith.mulf %268, %272 : vector<8x128xf32>
    %274 = arith.truncf %273 : vector<8x128xf32> to vector<8x128xbf16>
    %cst_140 = arith.constant dense<0.000000e+00> : vector<8x128xf32>
    %275 = tpu.matmul %274, %205, %cst_140 {dimension_numbers = #tpu.dot_dimension_numbers<[1], [0], [0], [1], [0, 0, 1, 1], [], []>} : vector<8x128xbf16>, vector<128x128xbf16>, vector<8x128xf32> -> vector<8x128xf32>
    %276 = vector.broadcast %207 : vector<1x128xf32> to vector<8x128xf32>
    %277 = arith.addf %275, %276 : vector<8x128xf32>
    %c16_141 = arith.constant 16 : index
    %c0_142 = arith.constant 0 : index
    %278 = vector.load %arg11[%c16_141, %c0_142] : memref<64x128xf32, #tpu.memory_space<vmem>>, vector<8x128xf32>
    tpu.vector_store %arg11[%c16_141, %c0_142], %277 {strides = array<i32>} : memref<64x128xf32, #tpu.memory_space<vmem>>, vector<8x128xf32>,
    %c24_143 = arith.constant 24 : index
    %c0_144 = arith.constant 0 : index
    %279 = vector.load %arg12[%c24_143, %c0_144] : memref<64x128xf32, #tpu.memory_space<vmem>>, vector<8x128xf32>
    %cst_145 = arith.constant dense<0.000000e+00> : vector<8x128xf32>
    %280 = tpu.matmul %274, %203, %cst_145 {dimension_numbers = #tpu.dot_dimension_numbers<[1], [0], [0], [1], [0, 0, 1, 1], [], []>} : vector<8x128xbf16>, vector<128x128xbf16>, vector<8x128xf32> -> vector<8x128xf32>
    %281 = arith.addf %279, %280 : vector<8x128xf32>
    %282 = arith.negf %281 : vector<8x128xf32>
    %283 = math.exp %282 : vector<8x128xf32>
    %cst_146 = arith.constant 1.000000e+00 : f32
    %284 = vector.broadcast %cst_146 : f32 to vector<8x128xf32>
    %285 = arith.addf %284, %283 : vector<8x128xf32>
    %286 = arith.divf %284, %285 : vector<8x128xf32>
    %287 = math.tanh %281 : vector<8x128xf32>
    %c16_i32_147 = arith.constant 16 : i32
    %288 = tpu.dynamic_rotate %286 by %c16_i32_147 dim 1 : vector<8x128xf32>, i32 -> vector<8x128xf32>
    %c32_i32_148 = arith.constant 32 : i32
    %289 = tpu.dynamic_rotate %287 by %c32_i32_148 dim 1 : vector<8x128xf32>, i32 -> vector<8x128xf32>
    %c48_i32_149 = arith.constant 48 : i32
    %290 = tpu.dynamic_rotate %286 by %c48_i32_149 dim 1 : vector<8x128xf32>, i32 -> vector<8x128xf32>
    %291 = arith.mulf %288, %271 : vector<8x128xf32>
    %292 = arith.mulf %286, %289 : vector<8x128xf32>
    %293 = arith.addf %291, %292 : vector<8x128xf32>
    %294 = math.tanh %293 : vector<8x128xf32>
    %295 = arith.mulf %290, %294 : vector<8x128xf32>
    %296 = arith.truncf %295 : vector<8x128xf32> to vector<8x128xbf16>
    %cst_150 = arith.constant dense<0.000000e+00> : vector<8x128xf32>
    %297 = tpu.matmul %296, %205, %cst_150 {dimension_numbers = #tpu.dot_dimension_numbers<[1], [0], [0], [1], [0, 0, 1, 1], [], []>} : vector<8x128xbf16>, vector<128x128xbf16>, vector<8x128xf32> -> vector<8x128xf32>
    %298 = vector.broadcast %207 : vector<1x128xf32> to vector<8x128xf32>
    %299 = arith.addf %297, %298 : vector<8x128xf32>
    %c24_151 = arith.constant 24 : index
    %c0_152 = arith.constant 0 : index
    %300 = vector.load %arg11[%c24_151, %c0_152] : memref<64x128xf32, #tpu.memory_space<vmem>>, vector<8x128xf32>
    tpu.vector_store %arg11[%c24_151, %c0_152], %299 {strides = array<i32>} : memref<64x128xf32, #tpu.memory_space<vmem>>, vector<8x128xf32>,
    %c32_153 = arith.constant 32 : index
    %c0_154 = arith.constant 0 : index
    %301 = vector.load %arg12[%c32_153, %c0_154] : memref<64x128xf32, #tpu.memory_space<vmem>>, vector<8x128xf32>
    %cst_155 = arith.constant dense<0.000000e+00> : vector<8x128xf32>
    %302 = tpu.matmul %296, %203, %cst_155 {dimension_numbers = #tpu.dot_dimension_numbers<[1], [0], [0], [1], [0, 0, 1, 1], [], []>} : vector<8x128xbf16>, vector<128x128xbf16>, vector<8x128xf32> -> vector<8x128xf32>
    %303 = arith.addf %301, %302 : vector<8x128xf32>
    %304 = arith.negf %303 : vector<8x128xf32>
    %305 = math.exp %304 : vector<8x128xf32>
    %cst_156 = arith.constant 1.000000e+00 : f32
    %306 = vector.broadcast %cst_156 : f32 to vector<8x128xf32>
    %307 = arith.addf %306, %305 : vector<8x128xf32>
    %308 = arith.divf %306, %307 : vector<8x128xf32>
    %309 = math.tanh %303 : vector<8x128xf32>
    %c16_i32_157 = arith.constant 16 : i32
    %310 = tpu.dynamic_rotate %308 by %c16_i32_157 dim 1 : vector<8x128xf32>, i32 -> vector<8x128xf32>
    %c32_i32_158 = arith.constant 32 : i32
    %311 = tpu.dynamic_rotate %309 by %c32_i32_158 dim 1 : vector<8x128xf32>, i32 -> vector<8x128xf32>
    %c48_i32_159 = arith.constant 48 : i32
    %312 = tpu.dynamic_rotate %308 by %c48_i32_159 dim 1 : vector<8x128xf32>, i32 -> vector<8x128xf32>
    %313 = arith.mulf %310, %293 : vector<8x128xf32>
    %314 = arith.mulf %308, %311 : vector<8x128xf32>
    %315 = arith.addf %313, %314 : vector<8x128xf32>
    %316 = math.tanh %315 : vector<8x128xf32>
    %317 = arith.mulf %312, %316 : vector<8x128xf32>
    %318 = arith.truncf %317 : vector<8x128xf32> to vector<8x128xbf16>
    %cst_160 = arith.constant dense<0.000000e+00> : vector<8x128xf32>
    %319 = tpu.matmul %318, %205, %cst_160 {dimension_numbers = #tpu.dot_dimension_numbers<[1], [0], [0], [1], [0, 0, 1, 1], [], []>} : vector<8x128xbf16>, vector<128x128xbf16>, vector<8x128xf32> -> vector<8x128xf32>
    %320 = vector.broadcast %207 : vector<1x128xf32> to vector<8x128xf32>
    %321 = arith.addf %319, %320 : vector<8x128xf32>
    %c32_161 = arith.constant 32 : index
    %c0_162 = arith.constant 0 : index
    %322 = vector.load %arg11[%c32_161, %c0_162] : memref<64x128xf32, #tpu.memory_space<vmem>>, vector<8x128xf32>
    tpu.vector_store %arg11[%c32_161, %c0_162], %321 {strides = array<i32>} : memref<64x128xf32, #tpu.memory_space<vmem>>, vector<8x128xf32>,
    %c40_163 = arith.constant 40 : index
    %c0_164 = arith.constant 0 : index
    %323 = vector.load %arg12[%c40_163, %c0_164] : memref<64x128xf32, #tpu.memory_space<vmem>>, vector<8x128xf32>
    %cst_165 = arith.constant dense<0.000000e+00> : vector<8x128xf32>
    %324 = tpu.matmul %318, %203, %cst_165 {dimension_numbers = #tpu.dot_dimension_numbers<[1], [0], [0], [1], [0, 0, 1, 1], [], []>} : vector<8x128xbf16>, vector<128x128xbf16>, vector<8x128xf32> -> vector<8x128xf32>
    %325 = arith.addf %323, %324 : vector<8x128xf32>
    %326 = arith.negf %325 : vector<8x128xf32>
    %327 = math.exp %326 : vector<8x128xf32>
    %cst_166 = arith.constant 1.000000e+00 : f32
    %328 = vector.broadcast %cst_166 : f32 to vector<8x128xf32>
    %329 = arith.addf %328, %327 : vector<8x128xf32>
    %330 = arith.divf %328, %329 : vector<8x128xf32>
    %331 = math.tanh %325 : vector<8x128xf32>
    %c16_i32_167 = arith.constant 16 : i32
    %332 = tpu.dynamic_rotate %330 by %c16_i32_167 dim 1 : vector<8x128xf32>, i32 -> vector<8x128xf32>
    %c32_i32_168 = arith.constant 32 : i32
    %333 = tpu.dynamic_rotate %331 by %c32_i32_168 dim 1 : vector<8x128xf32>, i32 -> vector<8x128xf32>
    %c48_i32_169 = arith.constant 48 : i32
    %334 = tpu.dynamic_rotate %330 by %c48_i32_169 dim 1 : vector<8x128xf32>, i32 -> vector<8x128xf32>
    %335 = arith.mulf %332, %315 : vector<8x128xf32>
    %336 = arith.mulf %330, %333 : vector<8x128xf32>
    %337 = arith.addf %335, %336 : vector<8x128xf32>
    %338 = math.tanh %337 : vector<8x128xf32>
    %339 = arith.mulf %334, %338 : vector<8x128xf32>
    %340 = arith.truncf %339 : vector<8x128xf32> to vector<8x128xbf16>
    %cst_170 = arith.constant dense<0.000000e+00> : vector<8x128xf32>
    %341 = tpu.matmul %340, %205, %cst_170 {dimension_numbers = #tpu.dot_dimension_numbers<[1], [0], [0], [1], [0, 0, 1, 1], [], []>} : vector<8x128xbf16>, vector<128x128xbf16>, vector<8x128xf32> -> vector<8x128xf32>
    %342 = vector.broadcast %207 : vector<1x128xf32> to vector<8x128xf32>
    %343 = arith.addf %341, %342 : vector<8x128xf32>
    %c40_171 = arith.constant 40 : index
    %c0_172 = arith.constant 0 : index
    %344 = vector.load %arg11[%c40_171, %c0_172] : memref<64x128xf32, #tpu.memory_space<vmem>>, vector<8x128xf32>
    tpu.vector_store %arg11[%c40_171, %c0_172], %343 {strides = array<i32>} : memref<64x128xf32, #tpu.memory_space<vmem>>, vector<8x128xf32>,
    %c48_173 = arith.constant 48 : index
    %c0_174 = arith.constant 0 : index
    %345 = vector.load %arg12[%c48_173, %c0_174] : memref<64x128xf32, #tpu.memory_space<vmem>>, vector<8x128xf32>
    %cst_175 = arith.constant dense<0.000000e+00> : vector<8x128xf32>
    %346 = tpu.matmul %340, %203, %cst_175 {dimension_numbers = #tpu.dot_dimension_numbers<[1], [0], [0], [1], [0, 0, 1, 1], [], []>} : vector<8x128xbf16>, vector<128x128xbf16>, vector<8x128xf32> -> vector<8x128xf32>
    %347 = arith.addf %345, %346 : vector<8x128xf32>
    %348 = arith.negf %347 : vector<8x128xf32>
    %349 = math.exp %348 : vector<8x128xf32>
    %cst_176 = arith.constant 1.000000e+00 : f32
    %350 = vector.broadcast %cst_176 : f32 to vector<8x128xf32>
    %351 = arith.addf %350, %349 : vector<8x128xf32>
    %352 = arith.divf %350, %351 : vector<8x128xf32>
    %353 = math.tanh %347 : vector<8x128xf32>
    %c16_i32_177 = arith.constant 16 : i32
    %354 = tpu.dynamic_rotate %352 by %c16_i32_177 dim 1 : vector<8x128xf32>, i32 -> vector<8x128xf32>
    %c32_i32_178 = arith.constant 32 : i32
    %355 = tpu.dynamic_rotate %353 by %c32_i32_178 dim 1 : vector<8x128xf32>, i32 -> vector<8x128xf32>
    %c48_i32_179 = arith.constant 48 : i32
    %356 = tpu.dynamic_rotate %352 by %c48_i32_179 dim 1 : vector<8x128xf32>, i32 -> vector<8x128xf32>
    %357 = arith.mulf %354, %337 : vector<8x128xf32>
    %358 = arith.mulf %352, %355 : vector<8x128xf32>
    %359 = arith.addf %357, %358 : vector<8x128xf32>
    %360 = math.tanh %359 : vector<8x128xf32>
    %361 = arith.mulf %356, %360 : vector<8x128xf32>
    %362 = arith.truncf %361 : vector<8x128xf32> to vector<8x128xbf16>
    %cst_180 = arith.constant dense<0.000000e+00> : vector<8x128xf32>
    %363 = tpu.matmul %362, %205, %cst_180 {dimension_numbers = #tpu.dot_dimension_numbers<[1], [0], [0], [1], [0, 0, 1, 1], [], []>} : vector<8x128xbf16>, vector<128x128xbf16>, vector<8x128xf32> -> vector<8x128xf32>
    %364 = vector.broadcast %207 : vector<1x128xf32> to vector<8x128xf32>
    %365 = arith.addf %363, %364 : vector<8x128xf32>
    %c48_181 = arith.constant 48 : index
    %c0_182 = arith.constant 0 : index
    %366 = vector.load %arg11[%c48_181, %c0_182] : memref<64x128xf32, #tpu.memory_space<vmem>>, vector<8x128xf32>
    tpu.vector_store %arg11[%c48_181, %c0_182], %365 {strides = array<i32>} : memref<64x128xf32, #tpu.memory_space<vmem>>, vector<8x128xf32>,
    %c56_183 = arith.constant 56 : index
    %c0_184 = arith.constant 0 : index
    %367 = vector.load %arg12[%c56_183, %c0_184] : memref<64x128xf32, #tpu.memory_space<vmem>>, vector<8x128xf32>
    %cst_185 = arith.constant dense<0.000000e+00> : vector<8x128xf32>
    %368 = tpu.matmul %362, %203, %cst_185 {dimension_numbers = #tpu.dot_dimension_numbers<[1], [0], [0], [1], [0, 0, 1, 1], [], []>} : vector<8x128xbf16>, vector<128x128xbf16>, vector<8x128xf32> -> vector<8x128xf32>
    %369 = arith.addf %367, %368 : vector<8x128xf32>
    %370 = arith.negf %369 : vector<8x128xf32>
    %371 = math.exp %370 : vector<8x128xf32>
    %cst_186 = arith.constant 1.000000e+00 : f32
    %372 = vector.broadcast %cst_186 : f32 to vector<8x128xf32>
    %373 = arith.addf %372, %371 : vector<8x128xf32>
    %374 = arith.divf %372, %373 : vector<8x128xf32>
    %375 = math.tanh %369 : vector<8x128xf32>
    %c16_i32_187 = arith.constant 16 : i32
    %376 = tpu.dynamic_rotate %374 by %c16_i32_187 dim 1 : vector<8x128xf32>, i32 -> vector<8x128xf32>
    %c32_i32_188 = arith.constant 32 : i32
    %377 = tpu.dynamic_rotate %375 by %c32_i32_188 dim 1 : vector<8x128xf32>, i32 -> vector<8x128xf32>
    %c48_i32_189 = arith.constant 48 : i32
    %378 = tpu.dynamic_rotate %374 by %c48_i32_189 dim 1 : vector<8x128xf32>, i32 -> vector<8x128xf32>
    %379 = arith.mulf %376, %359 : vector<8x128xf32>
    %380 = arith.mulf %374, %377 : vector<8x128xf32>
    %381 = arith.addf %379, %380 : vector<8x128xf32>
    %382 = math.tanh %381 : vector<8x128xf32>
    %383 = arith.mulf %378, %382 : vector<8x128xf32>
    %384 = arith.truncf %383 : vector<8x128xf32> to vector<8x128xbf16>
    %cst_190 = arith.constant dense<0.000000e+00> : vector<8x128xf32>
    %385 = tpu.matmul %384, %205, %cst_190 {dimension_numbers = #tpu.dot_dimension_numbers<[1], [0], [0], [1], [0, 0, 1, 1], [], []>} : vector<8x128xbf16>, vector<128x128xbf16>, vector<8x128xf32> -> vector<8x128xf32>
    %386 = vector.broadcast %207 : vector<1x128xf32> to vector<8x128xf32>
    %387 = arith.addf %385, %386 : vector<8x128xf32>
    %c56_191 = arith.constant 56 : index
    %c0_192 = arith.constant 0 : index
    %388 = vector.load %arg11[%c56_191, %c0_192] : memref<64x128xf32, #tpu.memory_space<vmem>>, vector<8x128xf32>
    tpu.vector_store %arg11[%c56_191, %c0_192], %387 {strides = array<i32>} : memref<64x128xf32, #tpu.memory_space<vmem>>, vector<8x128xf32>,
    %c1_193 = arith.constant 1 : index
    %c0_194 = arith.constant 0 : index
    %c0_195 = arith.constant 0 : index
    %389 = vector.load %arg9[%c1_193, %c0_194, %c0_195] : memref<4x8x128xf32, #tpu.memory_space<vmem>>, vector<1x8x128xf32>
    %390 = vector.shape_cast %389 : vector<1x8x128xf32> to vector<8x128xf32>
    %391 = vector.shape_cast %383 : vector<8x128xf32> to vector<1x8x128xf32>
    tpu.vector_store %arg9[%c1_193, %c0_194, %c0_195], %391 {strides = array<i32>} : memref<4x8x128xf32, #tpu.memory_space<vmem>>, vector<1x8x128xf32>,
    %c1_196 = arith.constant 1 : index
    %c0_197 = arith.constant 0 : index
    %c0_198 = arith.constant 0 : index
    %392 = vector.load %arg10[%c1_196, %c0_197, %c0_198] : memref<4x8x128xf32, #tpu.memory_space<vmem>>, vector<1x8x128xf32>
    %393 = vector.shape_cast %392 : vector<1x8x128xf32> to vector<8x128xf32>
    %394 = vector.shape_cast %381 : vector<8x128xf32> to vector<1x8x128xf32>
    tpu.vector_store %arg10[%c1_196, %c0_197, %c0_198], %394 {strides = array<i32>} : memref<4x8x128xf32, #tpu.memory_space<vmem>>, vector<1x8x128xf32>,
    %c2_199 = arith.constant 2 : index
    %c0_200 = arith.constant 0 : index
    %c0_201 = arith.constant 0 : index
    %395 = vector.load %arg2[%c2_199, %c0_200, %c0_201] : memref<4x128x128xbf16, #tpu.memory_space<vmem>>, vector<1x128x128xbf16>
    %396 = vector.shape_cast %395 : vector<1x128x128xbf16> to vector<128x128xbf16>
    %c3 = arith.constant 3 : index
    %c0_202 = arith.constant 0 : index
    %c0_203 = arith.constant 0 : index
    %397 = vector.load %arg1[%c3, %c0_202, %c0_203] : memref<4x128x128xbf16, #tpu.memory_space<vmem>>, vector<1x128x128xbf16>
    %398 = vector.shape_cast %397 : vector<1x128x128xbf16> to vector<128x128xbf16>
    %c3_204 = arith.constant 3 : index
    %c0_205 = arith.constant 0 : index
    %c0_206 = arith.constant 0 : index
    %399 = vector.load %arg3[%c3_204, %c0_205, %c0_206] : memref<4x1x128xf32, #tpu.memory_space<vmem>>, vector<1x1x128xf32>
    %400 = vector.shape_cast %399 : vector<1x1x128xf32> to vector<1x128xf32>
    %c2_207 = arith.constant 2 : index
    %c0_208 = arith.constant 0 : index
    %c0_209 = arith.constant 0 : index
    %401 = vector.load %arg4[%c2_207, %c0_208, %c0_209] : memref<4x8x128xf32, #tpu.memory_space<vmem>>, vector<1x8x128xf32>
    %402 = vector.shape_cast %401 : vector<1x8x128xf32> to vector<8x128xf32>
    %c2_210 = arith.constant 2 : index
    %c0_211 = arith.constant 0 : index
    %c0_212 = arith.constant 0 : index
    %403 = vector.load %arg5[%c2_210, %c0_211, %c0_212] : memref<4x8x128xf32, #tpu.memory_space<vmem>>, vector<1x8x128xf32>
    %404 = vector.shape_cast %403 : vector<1x8x128xf32> to vector<8x128xf32>
    %405 = arith.truncf %402 : vector<8x128xf32> to vector<8x128xbf16>
    %c0_213 = arith.constant 0 : index
    %c0_214 = arith.constant 0 : index
    %406 = vector.load %arg11[%c0_213, %c0_214] : memref<64x128xf32, #tpu.memory_space<vmem>>, vector<8x128xf32>
    %cst_215 = arith.constant dense<0.000000e+00> : vector<8x128xf32>
    %407 = tpu.matmul %405, %396, %cst_215 {dimension_numbers = #tpu.dot_dimension_numbers<[1], [0], [0], [1], [0, 0, 1, 1], [], []>} : vector<8x128xbf16>, vector<128x128xbf16>, vector<8x128xf32> -> vector<8x128xf32>
    %408 = arith.addf %406, %407 : vector<8x128xf32>
    %409 = arith.negf %408 : vector<8x128xf32>
    %410 = math.exp %409 : vector<8x128xf32>
    %cst_216 = arith.constant 1.000000e+00 : f32
    %411 = vector.broadcast %cst_216 : f32 to vector<8x128xf32>
    %412 = arith.addf %411, %410 : vector<8x128xf32>
    %413 = arith.divf %411, %412 : vector<8x128xf32>
    %414 = math.tanh %408 : vector<8x128xf32>
    %c16_i32_217 = arith.constant 16 : i32
    %415 = tpu.dynamic_rotate %413 by %c16_i32_217 dim 1 : vector<8x128xf32>, i32 -> vector<8x128xf32>
    %c32_i32_218 = arith.constant 32 : i32
    %416 = tpu.dynamic_rotate %414 by %c32_i32_218 dim 1 : vector<8x128xf32>, i32 -> vector<8x128xf32>
    %c48_i32_219 = arith.constant 48 : i32
    %417 = tpu.dynamic_rotate %413 by %c48_i32_219 dim 1 : vector<8x128xf32>, i32 -> vector<8x128xf32>
    %418 = arith.mulf %415, %404 : vector<8x128xf32>
    %419 = arith.mulf %413, %416 : vector<8x128xf32>
    %420 = arith.addf %418, %419 : vector<8x128xf32>
    %421 = math.tanh %420 : vector<8x128xf32>
    %422 = arith.mulf %417, %421 : vector<8x128xf32>
    %423 = arith.truncf %422 : vector<8x128xf32> to vector<8x128xbf16>
    %cst_220 = arith.constant dense<0.000000e+00> : vector<8x128xf32>
    %424 = tpu.matmul %423, %398, %cst_220 {dimension_numbers = #tpu.dot_dimension_numbers<[1], [0], [0], [1], [0, 0, 1, 1], [], []>} : vector<8x128xbf16>, vector<128x128xbf16>, vector<8x128xf32> -> vector<8x128xf32>
    %425 = vector.broadcast %400 : vector<1x128xf32> to vector<8x128xf32>
    %426 = arith.addf %424, %425 : vector<8x128xf32>
    %c0_221 = arith.constant 0 : index
    %c0_222 = arith.constant 0 : index
    %427 = vector.load %arg12[%c0_221, %c0_222] : memref<64x128xf32, #tpu.memory_space<vmem>>, vector<8x128xf32>
    tpu.vector_store %arg12[%c0_221, %c0_222], %426 {strides = array<i32>} : memref<64x128xf32, #tpu.memory_space<vmem>>, vector<8x128xf32>,
    %c8_223 = arith.constant 8 : index
    %c0_224 = arith.constant 0 : index
    %428 = vector.load %arg11[%c8_223, %c0_224] : memref<64x128xf32, #tpu.memory_space<vmem>>, vector<8x128xf32>
    %cst_225 = arith.constant dense<0.000000e+00> : vector<8x128xf32>
    %429 = tpu.matmul %423, %396, %cst_225 {dimension_numbers = #tpu.dot_dimension_numbers<[1], [0], [0], [1], [0, 0, 1, 1], [], []>} : vector<8x128xbf16>, vector<128x128xbf16>, vector<8x128xf32> -> vector<8x128xf32>
    %430 = arith.addf %428, %429 : vector<8x128xf32>
    %431 = arith.negf %430 : vector<8x128xf32>
    %432 = math.exp %431 : vector<8x128xf32>
    %cst_226 = arith.constant 1.000000e+00 : f32
    %433 = vector.broadcast %cst_226 : f32 to vector<8x128xf32>
    %434 = arith.addf %433, %432 : vector<8x128xf32>
    %435 = arith.divf %433, %434 : vector<8x128xf32>
    %436 = math.tanh %430 : vector<8x128xf32>
    %c16_i32_227 = arith.constant 16 : i32
    %437 = tpu.dynamic_rotate %435 by %c16_i32_227 dim 1 : vector<8x128xf32>, i32 -> vector<8x128xf32>
    %c32_i32_228 = arith.constant 32 : i32
    %438 = tpu.dynamic_rotate %436 by %c32_i32_228 dim 1 : vector<8x128xf32>, i32 -> vector<8x128xf32>
    %c48_i32_229 = arith.constant 48 : i32
    %439 = tpu.dynamic_rotate %435 by %c48_i32_229 dim 1 : vector<8x128xf32>, i32 -> vector<8x128xf32>
    %440 = arith.mulf %437, %420 : vector<8x128xf32>
    %441 = arith.mulf %435, %438 : vector<8x128xf32>
    %442 = arith.addf %440, %441 : vector<8x128xf32>
    %443 = math.tanh %442 : vector<8x128xf32>
    %444 = arith.mulf %439, %443 : vector<8x128xf32>
    %445 = arith.truncf %444 : vector<8x128xf32> to vector<8x128xbf16>
    %cst_230 = arith.constant dense<0.000000e+00> : vector<8x128xf32>
    %446 = tpu.matmul %445, %398, %cst_230 {dimension_numbers = #tpu.dot_dimension_numbers<[1], [0], [0], [1], [0, 0, 1, 1], [], []>} : vector<8x128xbf16>, vector<128x128xbf16>, vector<8x128xf32> -> vector<8x128xf32>
    %447 = vector.broadcast %400 : vector<1x128xf32> to vector<8x128xf32>
    %448 = arith.addf %446, %447 : vector<8x128xf32>
    %c8_231 = arith.constant 8 : index
    %c0_232 = arith.constant 0 : index
    %449 = vector.load %arg12[%c8_231, %c0_232] : memref<64x128xf32, #tpu.memory_space<vmem>>, vector<8x128xf32>
    tpu.vector_store %arg12[%c8_231, %c0_232], %448 {strides = array<i32>} : memref<64x128xf32, #tpu.memory_space<vmem>>, vector<8x128xf32>,
    %c16_233 = arith.constant 16 : index
    %c0_234 = arith.constant 0 : index
    %450 = vector.load %arg11[%c16_233, %c0_234] : memref<64x128xf32, #tpu.memory_space<vmem>>, vector<8x128xf32>
    %cst_235 = arith.constant dense<0.000000e+00> : vector<8x128xf32>
    %451 = tpu.matmul %445, %396, %cst_235 {dimension_numbers = #tpu.dot_dimension_numbers<[1], [0], [0], [1], [0, 0, 1, 1], [], []>} : vector<8x128xbf16>, vector<128x128xbf16>, vector<8x128xf32> -> vector<8x128xf32>
    %452 = arith.addf %450, %451 : vector<8x128xf32>
    %453 = arith.negf %452 : vector<8x128xf32>
    %454 = math.exp %453 : vector<8x128xf32>
    %cst_236 = arith.constant 1.000000e+00 : f32
    %455 = vector.broadcast %cst_236 : f32 to vector<8x128xf32>
    %456 = arith.addf %455, %454 : vector<8x128xf32>
    %457 = arith.divf %455, %456 : vector<8x128xf32>
    %458 = math.tanh %452 : vector<8x128xf32>
    %c16_i32_237 = arith.constant 16 : i32
    %459 = tpu.dynamic_rotate %457 by %c16_i32_237 dim 1 : vector<8x128xf32>, i32 -> vector<8x128xf32>
    %c32_i32_238 = arith.constant 32 : i32
    %460 = tpu.dynamic_rotate %458 by %c32_i32_238 dim 1 : vector<8x128xf32>, i32 -> vector<8x128xf32>
    %c48_i32_239 = arith.constant 48 : i32
    %461 = tpu.dynamic_rotate %457 by %c48_i32_239 dim 1 : vector<8x128xf32>, i32 -> vector<8x128xf32>
    %462 = arith.mulf %459, %442 : vector<8x128xf32>
    %463 = arith.mulf %457, %460 : vector<8x128xf32>
    %464 = arith.addf %462, %463 : vector<8x128xf32>
    %465 = math.tanh %464 : vector<8x128xf32>
    %466 = arith.mulf %461, %465 : vector<8x128xf32>
    %467 = arith.truncf %466 : vector<8x128xf32> to vector<8x128xbf16>
    %cst_240 = arith.constant dense<0.000000e+00> : vector<8x128xf32>
    %468 = tpu.matmul %467, %398, %cst_240 {dimension_numbers = #tpu.dot_dimension_numbers<[1], [0], [0], [1], [0, 0, 1, 1], [], []>} : vector<8x128xbf16>, vector<128x128xbf16>, vector<8x128xf32> -> vector<8x128xf32>
    %469 = vector.broadcast %400 : vector<1x128xf32> to vector<8x128xf32>
    %470 = arith.addf %468, %469 : vector<8x128xf32>
    %c16_241 = arith.constant 16 : index
    %c0_242 = arith.constant 0 : index
    %471 = vector.load %arg12[%c16_241, %c0_242] : memref<64x128xf32, #tpu.memory_space<vmem>>, vector<8x128xf32>
    tpu.vector_store %arg12[%c16_241, %c0_242], %470 {strides = array<i32>} : memref<64x128xf32, #tpu.memory_space<vmem>>, vector<8x128xf32>,
    %c24_243 = arith.constant 24 : index
    %c0_244 = arith.constant 0 : index
    %472 = vector.load %arg11[%c24_243, %c0_244] : memref<64x128xf32, #tpu.memory_space<vmem>>, vector<8x128xf32>
    %cst_245 = arith.constant dense<0.000000e+00> : vector<8x128xf32>
    %473 = tpu.matmul %467, %396, %cst_245 {dimension_numbers = #tpu.dot_dimension_numbers<[1], [0], [0], [1], [0, 0, 1, 1], [], []>} : vector<8x128xbf16>, vector<128x128xbf16>, vector<8x128xf32> -> vector<8x128xf32>
    %474 = arith.addf %472, %473 : vector<8x128xf32>
    %475 = arith.negf %474 : vector<8x128xf32>
    %476 = math.exp %475 : vector<8x128xf32>
    %cst_246 = arith.constant 1.000000e+00 : f32
    %477 = vector.broadcast %cst_246 : f32 to vector<8x128xf32>
    %478 = arith.addf %477, %476 : vector<8x128xf32>
    %479 = arith.divf %477, %478 : vector<8x128xf32>
    %480 = math.tanh %474 : vector<8x128xf32>
    %c16_i32_247 = arith.constant 16 : i32
    %481 = tpu.dynamic_rotate %479 by %c16_i32_247 dim 1 : vector<8x128xf32>, i32 -> vector<8x128xf32>
    %c32_i32_248 = arith.constant 32 : i32
    %482 = tpu.dynamic_rotate %480 by %c32_i32_248 dim 1 : vector<8x128xf32>, i32 -> vector<8x128xf32>
    %c48_i32_249 = arith.constant 48 : i32
    %483 = tpu.dynamic_rotate %479 by %c48_i32_249 dim 1 : vector<8x128xf32>, i32 -> vector<8x128xf32>
    %484 = arith.mulf %481, %464 : vector<8x128xf32>
    %485 = arith.mulf %479, %482 : vector<8x128xf32>
    %486 = arith.addf %484, %485 : vector<8x128xf32>
    %487 = math.tanh %486 : vector<8x128xf32>
    %488 = arith.mulf %483, %487 : vector<8x128xf32>
    %489 = arith.truncf %488 : vector<8x128xf32> to vector<8x128xbf16>
    %cst_250 = arith.constant dense<0.000000e+00> : vector<8x128xf32>
    %490 = tpu.matmul %489, %398, %cst_250 {dimension_numbers = #tpu.dot_dimension_numbers<[1], [0], [0], [1], [0, 0, 1, 1], [], []>} : vector<8x128xbf16>, vector<128x128xbf16>, vector<8x128xf32> -> vector<8x128xf32>
    %491 = vector.broadcast %400 : vector<1x128xf32> to vector<8x128xf32>
    %492 = arith.addf %490, %491 : vector<8x128xf32>
    %c24_251 = arith.constant 24 : index
    %c0_252 = arith.constant 0 : index
    %493 = vector.load %arg12[%c24_251, %c0_252] : memref<64x128xf32, #tpu.memory_space<vmem>>, vector<8x128xf32>
    tpu.vector_store %arg12[%c24_251, %c0_252], %492 {strides = array<i32>} : memref<64x128xf32, #tpu.memory_space<vmem>>, vector<8x128xf32>,
    %c32_253 = arith.constant 32 : index
    %c0_254 = arith.constant 0 : index
    %494 = vector.load %arg11[%c32_253, %c0_254] : memref<64x128xf32, #tpu.memory_space<vmem>>, vector<8x128xf32>
    %cst_255 = arith.constant dense<0.000000e+00> : vector<8x128xf32>
    %495 = tpu.matmul %489, %396, %cst_255 {dimension_numbers = #tpu.dot_dimension_numbers<[1], [0], [0], [1], [0, 0, 1, 1], [], []>} : vector<8x128xbf16>, vector<128x128xbf16>, vector<8x128xf32> -> vector<8x128xf32>
    %496 = arith.addf %494, %495 : vector<8x128xf32>
    %497 = arith.negf %496 : vector<8x128xf32>
    %498 = math.exp %497 : vector<8x128xf32>
    %cst_256 = arith.constant 1.000000e+00 : f32
    %499 = vector.broadcast %cst_256 : f32 to vector<8x128xf32>
    %500 = arith.addf %499, %498 : vector<8x128xf32>
    %501 = arith.divf %499, %500 : vector<8x128xf32>
    %502 = math.tanh %496 : vector<8x128xf32>
    %c16_i32_257 = arith.constant 16 : i32
    %503 = tpu.dynamic_rotate %501 by %c16_i32_257 dim 1 : vector<8x128xf32>, i32 -> vector<8x128xf32>
    %c32_i32_258 = arith.constant 32 : i32
    %504 = tpu.dynamic_rotate %502 by %c32_i32_258 dim 1 : vector<8x128xf32>, i32 -> vector<8x128xf32>
    %c48_i32_259 = arith.constant 48 : i32
    %505 = tpu.dynamic_rotate %501 by %c48_i32_259 dim 1 : vector<8x128xf32>, i32 -> vector<8x128xf32>
    %506 = arith.mulf %503, %486 : vector<8x128xf32>
    %507 = arith.mulf %501, %504 : vector<8x128xf32>
    %508 = arith.addf %506, %507 : vector<8x128xf32>
    %509 = math.tanh %508 : vector<8x128xf32>
    %510 = arith.mulf %505, %509 : vector<8x128xf32>
    %511 = arith.truncf %510 : vector<8x128xf32> to vector<8x128xbf16>
    %cst_260 = arith.constant dense<0.000000e+00> : vector<8x128xf32>
    %512 = tpu.matmul %511, %398, %cst_260 {dimension_numbers = #tpu.dot_dimension_numbers<[1], [0], [0], [1], [0, 0, 1, 1], [], []>} : vector<8x128xbf16>, vector<128x128xbf16>, vector<8x128xf32> -> vector<8x128xf32>
    %513 = vector.broadcast %400 : vector<1x128xf32> to vector<8x128xf32>
    %514 = arith.addf %512, %513 : vector<8x128xf32>
    %c32_261 = arith.constant 32 : index
    %c0_262 = arith.constant 0 : index
    %515 = vector.load %arg12[%c32_261, %c0_262] : memref<64x128xf32, #tpu.memory_space<vmem>>, vector<8x128xf32>
    tpu.vector_store %arg12[%c32_261, %c0_262], %514 {strides = array<i32>} : memref<64x128xf32, #tpu.memory_space<vmem>>, vector<8x128xf32>,
    %c40_263 = arith.constant 40 : index
    %c0_264 = arith.constant 0 : index
    %516 = vector.load %arg11[%c40_263, %c0_264] : memref<64x128xf32, #tpu.memory_space<vmem>>, vector<8x128xf32>
    %cst_265 = arith.constant dense<0.000000e+00> : vector<8x128xf32>
    %517 = tpu.matmul %511, %396, %cst_265 {dimension_numbers = #tpu.dot_dimension_numbers<[1], [0], [0], [1], [0, 0, 1, 1], [], []>} : vector<8x128xbf16>, vector<128x128xbf16>, vector<8x128xf32> -> vector<8x128xf32>
    %518 = arith.addf %516, %517 : vector<8x128xf32>
    %519 = arith.negf %518 : vector<8x128xf32>
    %520 = math.exp %519 : vector<8x128xf32>
    %cst_266 = arith.constant 1.000000e+00 : f32
    %521 = vector.broadcast %cst_266 : f32 to vector<8x128xf32>
    %522 = arith.addf %521, %520 : vector<8x128xf32>
    %523 = arith.divf %521, %522 : vector<8x128xf32>
    %524 = math.tanh %518 : vector<8x128xf32>
    %c16_i32_267 = arith.constant 16 : i32
    %525 = tpu.dynamic_rotate %523 by %c16_i32_267 dim 1 : vector<8x128xf32>, i32 -> vector<8x128xf32>
    %c32_i32_268 = arith.constant 32 : i32
    %526 = tpu.dynamic_rotate %524 by %c32_i32_268 dim 1 : vector<8x128xf32>, i32 -> vector<8x128xf32>
    %c48_i32_269 = arith.constant 48 : i32
    %527 = tpu.dynamic_rotate %523 by %c48_i32_269 dim 1 : vector<8x128xf32>, i32 -> vector<8x128xf32>
    %528 = arith.mulf %525, %508 : vector<8x128xf32>
    %529 = arith.mulf %523, %526 : vector<8x128xf32>
    %530 = arith.addf %528, %529 : vector<8x128xf32>
    %531 = math.tanh %530 : vector<8x128xf32>
    %532 = arith.mulf %527, %531 : vector<8x128xf32>
    %533 = arith.truncf %532 : vector<8x128xf32> to vector<8x128xbf16>
    %cst_270 = arith.constant dense<0.000000e+00> : vector<8x128xf32>
    %534 = tpu.matmul %533, %398, %cst_270 {dimension_numbers = #tpu.dot_dimension_numbers<[1], [0], [0], [1], [0, 0, 1, 1], [], []>} : vector<8x128xbf16>, vector<128x128xbf16>, vector<8x128xf32> -> vector<8x128xf32>
    %535 = vector.broadcast %400 : vector<1x128xf32> to vector<8x128xf32>
    %536 = arith.addf %534, %535 : vector<8x128xf32>
    %c40_271 = arith.constant 40 : index
    %c0_272 = arith.constant 0 : index
    %537 = vector.load %arg12[%c40_271, %c0_272] : memref<64x128xf32, #tpu.memory_space<vmem>>, vector<8x128xf32>
    tpu.vector_store %arg12[%c40_271, %c0_272], %536 {strides = array<i32>} : memref<64x128xf32, #tpu.memory_space<vmem>>, vector<8x128xf32>,
    %c48_273 = arith.constant 48 : index
    %c0_274 = arith.constant 0 : index
    %538 = vector.load %arg11[%c48_273, %c0_274] : memref<64x128xf32, #tpu.memory_space<vmem>>, vector<8x128xf32>
    %cst_275 = arith.constant dense<0.000000e+00> : vector<8x128xf32>
    %539 = tpu.matmul %533, %396, %cst_275 {dimension_numbers = #tpu.dot_dimension_numbers<[1], [0], [0], [1], [0, 0, 1, 1], [], []>} : vector<8x128xbf16>, vector<128x128xbf16>, vector<8x128xf32> -> vector<8x128xf32>
    %540 = arith.addf %538, %539 : vector<8x128xf32>
    %541 = arith.negf %540 : vector<8x128xf32>
    %542 = math.exp %541 : vector<8x128xf32>
    %cst_276 = arith.constant 1.000000e+00 : f32
    %543 = vector.broadcast %cst_276 : f32 to vector<8x128xf32>
    %544 = arith.addf %543, %542 : vector<8x128xf32>
    %545 = arith.divf %543, %544 : vector<8x128xf32>
    %546 = math.tanh %540 : vector<8x128xf32>
    %c16_i32_277 = arith.constant 16 : i32
    %547 = tpu.dynamic_rotate %545 by %c16_i32_277 dim 1 : vector<8x128xf32>, i32 -> vector<8x128xf32>
    %c32_i32_278 = arith.constant 32 : i32
    %548 = tpu.dynamic_rotate %546 by %c32_i32_278 dim 1 : vector<8x128xf32>, i32 -> vector<8x128xf32>
    %c48_i32_279 = arith.constant 48 : i32
    %549 = tpu.dynamic_rotate %545 by %c48_i32_279 dim 1 : vector<8x128xf32>, i32 -> vector<8x128xf32>
    %550 = arith.mulf %547, %530 : vector<8x128xf32>
    %551 = arith.mulf %545, %548 : vector<8x128xf32>
    %552 = arith.addf %550, %551 : vector<8x128xf32>
    %553 = math.tanh %552 : vector<8x128xf32>
    %554 = arith.mulf %549, %553 : vector<8x128xf32>
    %555 = arith.truncf %554 : vector<8x128xf32> to vector<8x128xbf16>
    %cst_280 = arith.constant dense<0.000000e+00> : vector<8x128xf32>
    %556 = tpu.matmul %555, %398, %cst_280 {dimension_numbers = #tpu.dot_dimension_numbers<[1], [0], [0], [1], [0, 0, 1, 1], [], []>} : vector<8x128xbf16>, vector<128x128xbf16>, vector<8x128xf32> -> vector<8x128xf32>
    %557 = vector.broadcast %400 : vector<1x128xf32> to vector<8x128xf32>
    %558 = arith.addf %556, %557 : vector<8x128xf32>
    %c48_281 = arith.constant 48 : index
    %c0_282 = arith.constant 0 : index
    %559 = vector.load %arg12[%c48_281, %c0_282] : memref<64x128xf32, #tpu.memory_space<vmem>>, vector<8x128xf32>
    tpu.vector_store %arg12[%c48_281, %c0_282], %558 {strides = array<i32>} : memref<64x128xf32, #tpu.memory_space<vmem>>, vector<8x128xf32>,
    %c56_283 = arith.constant 56 : index
    %c0_284 = arith.constant 0 : index
    %560 = vector.load %arg11[%c56_283, %c0_284] : memref<64x128xf32, #tpu.memory_space<vmem>>, vector<8x128xf32>
    %cst_285 = arith.constant dense<0.000000e+00> : vector<8x128xf32>
    %561 = tpu.matmul %555, %396, %cst_285 {dimension_numbers = #tpu.dot_dimension_numbers<[1], [0], [0], [1], [0, 0, 1, 1], [], []>} : vector<8x128xbf16>, vector<128x128xbf16>, vector<8x128xf32> -> vector<8x128xf32>
    %562 = arith.addf %560, %561 : vector<8x128xf32>
    %563 = arith.negf %562 : vector<8x128xf32>
    %564 = math.exp %563 : vector<8x128xf32>
    %cst_286 = arith.constant 1.000000e+00 : f32
    %565 = vector.broadcast %cst_286 : f32 to vector<8x128xf32>
    %566 = arith.addf %565, %564 : vector<8x128xf32>
    %567 = arith.divf %565, %566 : vector<8x128xf32>
    %568 = math.tanh %562 : vector<8x128xf32>
    %c16_i32_287 = arith.constant 16 : i32
    %569 = tpu.dynamic_rotate %567 by %c16_i32_287 dim 1 : vector<8x128xf32>, i32 -> vector<8x128xf32>
    %c32_i32_288 = arith.constant 32 : i32
    %570 = tpu.dynamic_rotate %568 by %c32_i32_288 dim 1 : vector<8x128xf32>, i32 -> vector<8x128xf32>
    %c48_i32_289 = arith.constant 48 : i32
    %571 = tpu.dynamic_rotate %567 by %c48_i32_289 dim 1 : vector<8x128xf32>, i32 -> vector<8x128xf32>
    %572 = arith.mulf %569, %552 : vector<8x128xf32>
    %573 = arith.mulf %567, %570 : vector<8x128xf32>
    %574 = arith.addf %572, %573 : vector<8x128xf32>
    %575 = math.tanh %574 : vector<8x128xf32>
    %576 = arith.mulf %571, %575 : vector<8x128xf32>
    %577 = arith.truncf %576 : vector<8x128xf32> to vector<8x128xbf16>
    %cst_290 = arith.constant dense<0.000000e+00> : vector<8x128xf32>
    %578 = tpu.matmul %577, %398, %cst_290 {dimension_numbers = #tpu.dot_dimension_numbers<[1], [0], [0], [1], [0, 0, 1, 1], [], []>} : vector<8x128xbf16>, vector<128x128xbf16>, vector<8x128xf32> -> vector<8x128xf32>
    %579 = vector.broadcast %400 : vector<1x128xf32> to vector<8x128xf32>
    %580 = arith.addf %578, %579 : vector<8x128xf32>
    %c56_291 = arith.constant 56 : index
    %c0_292 = arith.constant 0 : index
    %581 = vector.load %arg12[%c56_291, %c0_292] : memref<64x128xf32, #tpu.memory_space<vmem>>, vector<8x128xf32>
    tpu.vector_store %arg12[%c56_291, %c0_292], %580 {strides = array<i32>} : memref<64x128xf32, #tpu.memory_space<vmem>>, vector<8x128xf32>,
    %c2_293 = arith.constant 2 : index
    %c0_294 = arith.constant 0 : index
    %c0_295 = arith.constant 0 : index
    %582 = vector.load %arg9[%c2_293, %c0_294, %c0_295] : memref<4x8x128xf32, #tpu.memory_space<vmem>>, vector<1x8x128xf32>
    %583 = vector.shape_cast %582 : vector<1x8x128xf32> to vector<8x128xf32>
    %584 = vector.shape_cast %576 : vector<8x128xf32> to vector<1x8x128xf32>
    tpu.vector_store %arg9[%c2_293, %c0_294, %c0_295], %584 {strides = array<i32>} : memref<4x8x128xf32, #tpu.memory_space<vmem>>, vector<1x8x128xf32>,
    %c2_296 = arith.constant 2 : index
    %c0_297 = arith.constant 0 : index
    %c0_298 = arith.constant 0 : index
    %585 = vector.load %arg10[%c2_296, %c0_297, %c0_298] : memref<4x8x128xf32, #tpu.memory_space<vmem>>, vector<1x8x128xf32>
    %586 = vector.shape_cast %585 : vector<1x8x128xf32> to vector<8x128xf32>
    %587 = vector.shape_cast %574 : vector<8x128xf32> to vector<1x8x128xf32>
    tpu.vector_store %arg10[%c2_296, %c0_297, %c0_298], %587 {strides = array<i32>} : memref<4x8x128xf32, #tpu.memory_space<vmem>>, vector<1x8x128xf32>,
    %c3_299 = arith.constant 3 : index
    %c0_300 = arith.constant 0 : index
    %c0_301 = arith.constant 0 : index
    %588 = vector.load %arg2[%c3_299, %c0_300, %c0_301] : memref<4x128x128xbf16, #tpu.memory_space<vmem>>, vector<1x128x128xbf16>
    %589 = vector.shape_cast %588 : vector<1x128x128xbf16> to vector<128x128xbf16>
    %c3_302 = arith.constant 3 : index
    %c0_303 = arith.constant 0 : index
    %c0_304 = arith.constant 0 : index
    %590 = vector.load %arg4[%c3_302, %c0_303, %c0_304] : memref<4x8x128xf32, #tpu.memory_space<vmem>>, vector<1x8x128xf32>
    %591 = vector.shape_cast %590 : vector<1x8x128xf32> to vector<8x128xf32>
    %c3_305 = arith.constant 3 : index
    %c0_306 = arith.constant 0 : index
    %c0_307 = arith.constant 0 : index
    %592 = vector.load %arg5[%c3_305, %c0_306, %c0_307] : memref<4x8x128xf32, #tpu.memory_space<vmem>>, vector<1x8x128xf32>
    %593 = vector.shape_cast %592 : vector<1x8x128xf32> to vector<8x128xf32>
    %594 = arith.truncf %591 : vector<8x128xf32> to vector<8x128xbf16>
    %c0_308 = arith.constant 0 : index
    %c0_309 = arith.constant 0 : index
    %595 = vector.load %arg12[%c0_308, %c0_309] : memref<64x128xf32, #tpu.memory_space<vmem>>, vector<8x128xf32>
    %cst_310 = arith.constant dense<0.000000e+00> : vector<8x128xf32>
    %596 = tpu.matmul %594, %589, %cst_310 {dimension_numbers = #tpu.dot_dimension_numbers<[1], [0], [0], [1], [0, 0, 1, 1], [], []>} : vector<8x128xbf16>, vector<128x128xbf16>, vector<8x128xf32> -> vector<8x128xf32>
    %597 = arith.addf %595, %596 : vector<8x128xf32>
    %598 = arith.negf %597 : vector<8x128xf32>
    %599 = math.exp %598 : vector<8x128xf32>
    %cst_311 = arith.constant 1.000000e+00 : f32
    %600 = vector.broadcast %cst_311 : f32 to vector<8x128xf32>
    %601 = arith.addf %600, %599 : vector<8x128xf32>
    %602 = arith.divf %600, %601 : vector<8x128xf32>
    %603 = math.tanh %597 : vector<8x128xf32>
    %c16_i32_312 = arith.constant 16 : i32
    %604 = tpu.dynamic_rotate %602 by %c16_i32_312 dim 1 : vector<8x128xf32>, i32 -> vector<8x128xf32>
    %c32_i32_313 = arith.constant 32 : i32
    %605 = tpu.dynamic_rotate %603 by %c32_i32_313 dim 1 : vector<8x128xf32>, i32 -> vector<8x128xf32>
    %c48_i32_314 = arith.constant 48 : i32
    %606 = tpu.dynamic_rotate %602 by %c48_i32_314 dim 1 : vector<8x128xf32>, i32 -> vector<8x128xf32>
    %607 = arith.mulf %604, %593 : vector<8x128xf32>
    %608 = arith.mulf %602, %605 : vector<8x128xf32>
    %609 = arith.addf %607, %608 : vector<8x128xf32>
    %610 = math.tanh %609 : vector<8x128xf32>
    %611 = arith.mulf %606, %610 : vector<8x128xf32>
    %612 = arith.truncf %611 : vector<8x128xf32> to vector<8x128xbf16>
    %c8_315 = arith.constant 8 : index
    %c0_316 = arith.constant 0 : index
    %613 = vector.load %arg12[%c8_315, %c0_316] : memref<64x128xf32, #tpu.memory_space<vmem>>, vector<8x128xf32>
    %cst_317 = arith.constant dense<0.000000e+00> : vector<8x128xf32>
    %614 = tpu.matmul %612, %589, %cst_317 {dimension_numbers = #tpu.dot_dimension_numbers<[1], [0], [0], [1], [0, 0, 1, 1], [], []>} : vector<8x128xbf16>, vector<128x128xbf16>, vector<8x128xf32> -> vector<8x128xf32>
    %615 = arith.addf %613, %614 : vector<8x128xf32>
    %616 = arith.negf %615 : vector<8x128xf32>
    %617 = math.exp %616 : vector<8x128xf32>
    %cst_318 = arith.constant 1.000000e+00 : f32
    %618 = vector.broadcast %cst_318 : f32 to vector<8x128xf32>
    %619 = arith.addf %618, %617 : vector<8x128xf32>
    %620 = arith.divf %618, %619 : vector<8x128xf32>
    %621 = math.tanh %615 : vector<8x128xf32>
    %c16_i32_319 = arith.constant 16 : i32
    %622 = tpu.dynamic_rotate %620 by %c16_i32_319 dim 1 : vector<8x128xf32>, i32 -> vector<8x128xf32>
    %c32_i32_320 = arith.constant 32 : i32
    %623 = tpu.dynamic_rotate %621 by %c32_i32_320 dim 1 : vector<8x128xf32>, i32 -> vector<8x128xf32>
    %c48_i32_321 = arith.constant 48 : i32
    %624 = tpu.dynamic_rotate %620 by %c48_i32_321 dim 1 : vector<8x128xf32>, i32 -> vector<8x128xf32>
    %625 = arith.mulf %622, %609 : vector<8x128xf32>
    %626 = arith.mulf %620, %623 : vector<8x128xf32>
    %627 = arith.addf %625, %626 : vector<8x128xf32>
    %628 = math.tanh %627 : vector<8x128xf32>
    %629 = arith.mulf %624, %628 : vector<8x128xf32>
    %630 = arith.truncf %629 : vector<8x128xf32> to vector<8x128xbf16>
    %c16_322 = arith.constant 16 : index
    %c0_323 = arith.constant 0 : index
    %631 = vector.load %arg12[%c16_322, %c0_323] : memref<64x128xf32, #tpu.memory_space<vmem>>, vector<8x128xf32>
    %cst_324 = arith.constant dense<0.000000e+00> : vector<8x128xf32>
    %632 = tpu.matmul %630, %589, %cst_324 {dimension_numbers = #tpu.dot_dimension_numbers<[1], [0], [0], [1], [0, 0, 1, 1], [], []>} : vector<8x128xbf16>, vector<128x128xbf16>, vector<8x128xf32> -> vector<8x128xf32>
    %633 = arith.addf %631, %632 : vector<8x128xf32>
    %634 = arith.negf %633 : vector<8x128xf32>
    %635 = math.exp %634 : vector<8x128xf32>
    %cst_325 = arith.constant 1.000000e+00 : f32
    %636 = vector.broadcast %cst_325 : f32 to vector<8x128xf32>
    %637 = arith.addf %636, %635 : vector<8x128xf32>
    %638 = arith.divf %636, %637 : vector<8x128xf32>
    %639 = math.tanh %633 : vector<8x128xf32>
    %c16_i32_326 = arith.constant 16 : i32
    %640 = tpu.dynamic_rotate %638 by %c16_i32_326 dim 1 : vector<8x128xf32>, i32 -> vector<8x128xf32>
    %c32_i32_327 = arith.constant 32 : i32
    %641 = tpu.dynamic_rotate %639 by %c32_i32_327 dim 1 : vector<8x128xf32>, i32 -> vector<8x128xf32>
    %c48_i32_328 = arith.constant 48 : i32
    %642 = tpu.dynamic_rotate %638 by %c48_i32_328 dim 1 : vector<8x128xf32>, i32 -> vector<8x128xf32>
    %643 = arith.mulf %640, %627 : vector<8x128xf32>
    %644 = arith.mulf %638, %641 : vector<8x128xf32>
    %645 = arith.addf %643, %644 : vector<8x128xf32>
    %646 = math.tanh %645 : vector<8x128xf32>
    %647 = arith.mulf %642, %646 : vector<8x128xf32>
    %648 = arith.truncf %647 : vector<8x128xf32> to vector<8x128xbf16>
    %c24_329 = arith.constant 24 : index
    %c0_330 = arith.constant 0 : index
    %649 = vector.load %arg12[%c24_329, %c0_330] : memref<64x128xf32, #tpu.memory_space<vmem>>, vector<8x128xf32>
    %cst_331 = arith.constant dense<0.000000e+00> : vector<8x128xf32>
    %650 = tpu.matmul %648, %589, %cst_331 {dimension_numbers = #tpu.dot_dimension_numbers<[1], [0], [0], [1], [0, 0, 1, 1], [], []>} : vector<8x128xbf16>, vector<128x128xbf16>, vector<8x128xf32> -> vector<8x128xf32>
    %651 = arith.addf %649, %650 : vector<8x128xf32>
    %652 = arith.negf %651 : vector<8x128xf32>
    %653 = math.exp %652 : vector<8x128xf32>
    %cst_332 = arith.constant 1.000000e+00 : f32
    %654 = vector.broadcast %cst_332 : f32 to vector<8x128xf32>
    %655 = arith.addf %654, %653 : vector<8x128xf32>
    %656 = arith.divf %654, %655 : vector<8x128xf32>
    %657 = math.tanh %651 : vector<8x128xf32>
    %c16_i32_333 = arith.constant 16 : i32
    %658 = tpu.dynamic_rotate %656 by %c16_i32_333 dim 1 : vector<8x128xf32>, i32 -> vector<8x128xf32>
    %c32_i32_334 = arith.constant 32 : i32
    %659 = tpu.dynamic_rotate %657 by %c32_i32_334 dim 1 : vector<8x128xf32>, i32 -> vector<8x128xf32>
    %c48_i32_335 = arith.constant 48 : i32
    %660 = tpu.dynamic_rotate %656 by %c48_i32_335 dim 1 : vector<8x128xf32>, i32 -> vector<8x128xf32>
    %661 = arith.mulf %658, %645 : vector<8x128xf32>
    %662 = arith.mulf %656, %659 : vector<8x128xf32>
    %663 = arith.addf %661, %662 : vector<8x128xf32>
    %664 = math.tanh %663 : vector<8x128xf32>
    %665 = arith.mulf %660, %664 : vector<8x128xf32>
    %666 = arith.truncf %665 : vector<8x128xf32> to vector<8x128xbf16>
    %c32_336 = arith.constant 32 : index
    %c0_337 = arith.constant 0 : index
    %667 = vector.load %arg12[%c32_336, %c0_337] : memref<64x128xf32, #tpu.memory_space<vmem>>, vector<8x128xf32>
    %cst_338 = arith.constant dense<0.000000e+00> : vector<8x128xf32>
    %668 = tpu.matmul %666, %589, %cst_338 {dimension_numbers = #tpu.dot_dimension_numbers<[1], [0], [0], [1], [0, 0, 1, 1], [], []>} : vector<8x128xbf16>, vector<128x128xbf16>, vector<8x128xf32> -> vector<8x128xf32>
    %669 = arith.addf %667, %668 : vector<8x128xf32>
    %670 = arith.negf %669 : vector<8x128xf32>
    %671 = math.exp %670 : vector<8x128xf32>
    %cst_339 = arith.constant 1.000000e+00 : f32
    %672 = vector.broadcast %cst_339 : f32 to vector<8x128xf32>
    %673 = arith.addf %672, %671 : vector<8x128xf32>
    %674 = arith.divf %672, %673 : vector<8x128xf32>
    %675 = math.tanh %669 : vector<8x128xf32>
    %c16_i32_340 = arith.constant 16 : i32
    %676 = tpu.dynamic_rotate %674 by %c16_i32_340 dim 1 : vector<8x128xf32>, i32 -> vector<8x128xf32>
    %c32_i32_341 = arith.constant 32 : i32
    %677 = tpu.dynamic_rotate %675 by %c32_i32_341 dim 1 : vector<8x128xf32>, i32 -> vector<8x128xf32>
    %c48_i32_342 = arith.constant 48 : i32
    %678 = tpu.dynamic_rotate %674 by %c48_i32_342 dim 1 : vector<8x128xf32>, i32 -> vector<8x128xf32>
    %679 = arith.mulf %676, %663 : vector<8x128xf32>
    %680 = arith.mulf %674, %677 : vector<8x128xf32>
    %681 = arith.addf %679, %680 : vector<8x128xf32>
    %682 = math.tanh %681 : vector<8x128xf32>
    %683 = arith.mulf %678, %682 : vector<8x128xf32>
    %684 = arith.truncf %683 : vector<8x128xf32> to vector<8x128xbf16>
    %c40_343 = arith.constant 40 : index
    %c0_344 = arith.constant 0 : index
    %685 = vector.load %arg12[%c40_343, %c0_344] : memref<64x128xf32, #tpu.memory_space<vmem>>, vector<8x128xf32>
    %cst_345 = arith.constant dense<0.000000e+00> : vector<8x128xf32>
    %686 = tpu.matmul %684, %589, %cst_345 {dimension_numbers = #tpu.dot_dimension_numbers<[1], [0], [0], [1], [0, 0, 1, 1], [], []>} : vector<8x128xbf16>, vector<128x128xbf16>, vector<8x128xf32> -> vector<8x128xf32>
    %687 = arith.addf %685, %686 : vector<8x128xf32>
    %688 = arith.negf %687 : vector<8x128xf32>
    %689 = math.exp %688 : vector<8x128xf32>
    %cst_346 = arith.constant 1.000000e+00 : f32
    %690 = vector.broadcast %cst_346 : f32 to vector<8x128xf32>
    %691 = arith.addf %690, %689 : vector<8x128xf32>
    %692 = arith.divf %690, %691 : vector<8x128xf32>
    %693 = math.tanh %687 : vector<8x128xf32>
    %c16_i32_347 = arith.constant 16 : i32
    %694 = tpu.dynamic_rotate %692 by %c16_i32_347 dim 1 : vector<8x128xf32>, i32 -> vector<8x128xf32>
    %c32_i32_348 = arith.constant 32 : i32
    %695 = tpu.dynamic_rotate %693 by %c32_i32_348 dim 1 : vector<8x128xf32>, i32 -> vector<8x128xf32>
    %c48_i32_349 = arith.constant 48 : i32
    %696 = tpu.dynamic_rotate %692 by %c48_i32_349 dim 1 : vector<8x128xf32>, i32 -> vector<8x128xf32>
    %697 = arith.mulf %694, %681 : vector<8x128xf32>
    %698 = arith.mulf %692, %695 : vector<8x128xf32>
    %699 = arith.addf %697, %698 : vector<8x128xf32>
    %700 = math.tanh %699 : vector<8x128xf32>
    %701 = arith.mulf %696, %700 : vector<8x128xf32>
    %702 = arith.truncf %701 : vector<8x128xf32> to vector<8x128xbf16>
    %c48_350 = arith.constant 48 : index
    %c0_351 = arith.constant 0 : index
    %703 = vector.load %arg12[%c48_350, %c0_351] : memref<64x128xf32, #tpu.memory_space<vmem>>, vector<8x128xf32>
    %cst_352 = arith.constant dense<0.000000e+00> : vector<8x128xf32>
    %704 = tpu.matmul %702, %589, %cst_352 {dimension_numbers = #tpu.dot_dimension_numbers<[1], [0], [0], [1], [0, 0, 1, 1], [], []>} : vector<8x128xbf16>, vector<128x128xbf16>, vector<8x128xf32> -> vector<8x128xf32>
    %705 = arith.addf %703, %704 : vector<8x128xf32>
    %706 = arith.negf %705 : vector<8x128xf32>
    %707 = math.exp %706 : vector<8x128xf32>
    %cst_353 = arith.constant 1.000000e+00 : f32
    %708 = vector.broadcast %cst_353 : f32 to vector<8x128xf32>
    %709 = arith.addf %708, %707 : vector<8x128xf32>
    %710 = arith.divf %708, %709 : vector<8x128xf32>
    %711 = math.tanh %705 : vector<8x128xf32>
    %c16_i32_354 = arith.constant 16 : i32
    %712 = tpu.dynamic_rotate %710 by %c16_i32_354 dim 1 : vector<8x128xf32>, i32 -> vector<8x128xf32>
    %c32_i32_355 = arith.constant 32 : i32
    %713 = tpu.dynamic_rotate %711 by %c32_i32_355 dim 1 : vector<8x128xf32>, i32 -> vector<8x128xf32>
    %c48_i32_356 = arith.constant 48 : i32
    %714 = tpu.dynamic_rotate %710 by %c48_i32_356 dim 1 : vector<8x128xf32>, i32 -> vector<8x128xf32>
    %715 = arith.mulf %712, %699 : vector<8x128xf32>
    %716 = arith.mulf %710, %713 : vector<8x128xf32>
    %717 = arith.addf %715, %716 : vector<8x128xf32>
    %718 = math.tanh %717 : vector<8x128xf32>
    %719 = arith.mulf %714, %718 : vector<8x128xf32>
    %720 = arith.truncf %719 : vector<8x128xf32> to vector<8x128xbf16>
    %c56_357 = arith.constant 56 : index
    %c0_358 = arith.constant 0 : index
    %721 = vector.load %arg12[%c56_357, %c0_358] : memref<64x128xf32, #tpu.memory_space<vmem>>, vector<8x128xf32>
    %cst_359 = arith.constant dense<0.000000e+00> : vector<8x128xf32>
    %722 = tpu.matmul %720, %589, %cst_359 {dimension_numbers = #tpu.dot_dimension_numbers<[1], [0], [0], [1], [0, 0, 1, 1], [], []>} : vector<8x128xbf16>, vector<128x128xbf16>, vector<8x128xf32> -> vector<8x128xf32>
    %723 = arith.addf %721, %722 : vector<8x128xf32>
    %724 = arith.negf %723 : vector<8x128xf32>
    %725 = math.exp %724 : vector<8x128xf32>
    %cst_360 = arith.constant 1.000000e+00 : f32
    %726 = vector.broadcast %cst_360 : f32 to vector<8x128xf32>
    %727 = arith.addf %726, %725 : vector<8x128xf32>
    %728 = arith.divf %726, %727 : vector<8x128xf32>
    %729 = math.tanh %723 : vector<8x128xf32>
    %c16_i32_361 = arith.constant 16 : i32
    %730 = tpu.dynamic_rotate %728 by %c16_i32_361 dim 1 : vector<8x128xf32>, i32 -> vector<8x128xf32>
    %c32_i32_362 = arith.constant 32 : i32
    %731 = tpu.dynamic_rotate %729 by %c32_i32_362 dim 1 : vector<8x128xf32>, i32 -> vector<8x128xf32>
    %c48_i32_363 = arith.constant 48 : i32
    %732 = tpu.dynamic_rotate %728 by %c48_i32_363 dim 1 : vector<8x128xf32>, i32 -> vector<8x128xf32>
    %733 = arith.mulf %730, %717 : vector<8x128xf32>
    %734 = arith.mulf %728, %731 : vector<8x128xf32>
    %735 = arith.addf %733, %734 : vector<8x128xf32>
    %736 = math.tanh %735 : vector<8x128xf32>
    %737 = arith.mulf %732, %736 : vector<8x128xf32>
    %738 = arith.truncf %737 : vector<8x128xf32> to vector<8x128xbf16>
    %c3_364 = arith.constant 3 : index
    %c0_365 = arith.constant 0 : index
    %c0_366 = arith.constant 0 : index
    %739 = vector.load %arg9[%c3_364, %c0_365, %c0_366] : memref<4x8x128xf32, #tpu.memory_space<vmem>>, vector<1x8x128xf32>
    %740 = vector.shape_cast %739 : vector<1x8x128xf32> to vector<8x128xf32>
    %741 = vector.shape_cast %737 : vector<8x128xf32> to vector<1x8x128xf32>
    tpu.vector_store %arg9[%c3_364, %c0_365, %c0_366], %741 {strides = array<i32>} : memref<4x8x128xf32, #tpu.memory_space<vmem>>, vector<1x8x128xf32>,
    %c3_367 = arith.constant 3 : index
    %c0_368 = arith.constant 0 : index
    %c0_369 = arith.constant 0 : index
    %742 = vector.load %arg10[%c3_367, %c0_368, %c0_369] : memref<4x8x128xf32, #tpu.memory_space<vmem>>, vector<1x8x128xf32>
    %743 = vector.shape_cast %742 : vector<1x8x128xf32> to vector<8x128xf32>
    %744 = vector.shape_cast %735 : vector<8x128xf32> to vector<1x8x128xf32>
    tpu.vector_store %arg10[%c3_367, %c0_368, %c0_369], %744 {strides = array<i32>} : memref<4x8x128xf32, #tpu.memory_space<vmem>>, vector<1x8x128xf32>,
    %c0_370 = arith.constant 0 : index
    %c0_371 = arith.constant 0 : index
    %745 = vector.load %arg6[%c0_370, %c0_371] : memref<128x128xbf16, #tpu.memory_space<vmem>>, vector<128x128xbf16>
    %cst_372 = arith.constant dense<0.000000e+00> : vector<8x128xf32>
    %746 = tpu.matmul %738, %745, %cst_372 {dimension_numbers = #tpu.dot_dimension_numbers<[1], [0], [0], [1], [0, 0, 1, 1], [], []>} : vector<8x128xbf16>, vector<128x128xbf16>, vector<8x128xf32> -> vector<8x128xf32>
    %c0_373 = arith.constant 0 : index
    %c0_374 = arith.constant 0 : index
    %747 = vector.load %arg7[%c0_373, %c0_374] : memref<1x128xf32, #tpu.memory_space<vmem>>, vector<1x128xf32>
    %748 = vector.broadcast %747 : vector<1x128xf32> to vector<8x128xf32>
    %749 = arith.addf %746, %748 : vector<8x128xf32>
    %750 = arith.negf %749 : vector<8x128xf32>
    %751 = math.exp %750 : vector<8x128xf32>
    %cst_375 = arith.constant 1.000000e+00 : f32
    %752 = vector.broadcast %cst_375 : f32 to vector<8x128xf32>
    %753 = arith.addf %752, %751 : vector<8x128xf32>
    %754 = arith.divf %752, %753 : vector<8x128xf32>
    %c0_376 = arith.constant 0 : index
    %c0_377 = arith.constant 0 : index
    %755 = vector.load %arg8[%c0_376, %c0_377] : memref<8x128xf32, #tpu.memory_space<vmem>>, vector<8x128xf32>
    tpu.vector_store %arg8[%c0_376, %c0_377], %754 {strides = array<i32>} : memref<8x128xf32, #tpu.memory_space<vmem>>, vector<8x128xf32>,
    return
  }
}

</mosaic_0001>

<bundles_post_ra>
// kernel: ltlnet_forward.1
= control target key start
LH: loop header
LB: loop body
LE: loop exit
PB: predicated region body
PF: predicated region fallthrough
CT: control target
= control target key end

     0   :  { %16 = vsyncpa [#allocation5], 0  ;;  %s7629_s0 = inlined_call_operand.vmem [shape: bf16[64,128], index: 0, kind: input, shape index: {}]   ;;  %s7630_s1 = inlined_call_operand.hbm [shape: bf16[4,128,128], index: 1, kind: input, shape index: {}]   ;;  %s7631_s2 = inlined_call_operand.hbm [shape: bf16[4,128,128], index: 2, kind: input, shape index: {}]   ;;  %s7632_s3 = inlined_call_operand.vmem [shape: f32[4,1,128], index: 3, kind: input, shape index: {}]   ;;  %s7633_s4 = inlined_call_operand.vmem [shape: f32[4,8,128], index: 4, kind: input, shape index: {}]   ;;  %s7634_s5 = inlined_call_operand.vmem [shape: f32[4,8,128], index: 5, kind: input, shape index: {}]   ;;  %s7635_s6 = inlined_call_operand.vmem [shape: bf16[128,128], index: 6, kind: input, shape index: {}]   ;;  %s7636_s7 = inlined_call_operand.vmem [shape: f32[1,128], index: 7, kind: input, shape index: {}]   ;;  %s7637_s8 = inlined_call_operand.vmem [shape: f32[8,128], index: 8, kind: output, shape index: {0}]   ;;  %s7638_s9 = inlined_call_operand.vmem [shape: f32[4,8,128], index: 9, kind: output, shape index: {1}]   ;;  %s7639_s10 = inlined_call_operand.vmem [shape: f32[4,8,128], index: 10, kind: output, shape index: {2}]  }
   0x1   :  { %17 = vsyncpa [#allocation7], 0  ;;  %s6139_s13 = smov [#allocation4]   ;;  %s6091_s17 = scalar_lea.hbm %s7630_s1, 4096 }
   0x2   :  { %s25_s14 = sshll.u32 %s6139_s13, 4  ;;  %p6092_p0 = scmp.ne.s32.totalorder %s7630_s1, %s6091_s17  ;;  %s26_s14 = int_to_ptr.vmem [resolvable:$true] %s25_s14 }
   0x3   :  { %p6095_p1 = scmp.lt.u32.totalorder %s6091_s17, %s7630_s1 }
   0x5   :  { %p6097_p2 = pnand %p6095_p1, %p6092_p0 }
   0x7   :  { %6100 = shalt.err (!%p6097_p2)
}
   0x8   :  { %s6101_s22 = scalar_lea.vmem %s26_s14, 4096  ;;  %p6106_p4 = scmp.lt.s32.totalorder %s26_s14, %s26_s14 }
   0x9   :  { %p6102_p3 = scmp.ne.s32.totalorder %s26_s14, %s6101_s22  ;;  %p6107_p5 = scmp.lt.s32.totalorder %s6101_s22, %s6101_s22 }
   0xb   :  { %p6108_p6 = por %p6107_p5, %p6106_p4 }
   0xd   :  { %p6109_p7 = pnand %p6108_p6, %p6102_p3 }
   0xf   :  { %6112 = shalt.err (!%p6109_p7)
}
  0x10   :  { %s6140_s23 = smov 64   ;;  %s6141_s24 = smov 4  }
  0x11   :  { %31 = dma.hbm_to_vmem [thread:$0]  %s7630_s1, 4096, %s26_s14, [#allocation5], %s6140_s23, %s6140_s23, %s6141_s24  }
  0x12   :  { %s6142_s27 = smov [#allocation6]   ;;  %s6113_s11 = scalar_lea.hbm %s7631_s2, 4096 }
  0x13   :  { %s37_s28 = sshll.u32 %s6142_s27, 4  ;;  %p6114_p8 = scmp.ne.s32.totalorder %s7631_s2, %s6113_s11  ;;  %s38_s28 = int_to_ptr.vmem [resolvable:$true] %s37_s28 }
  0x14   :  { %p6117_p9 = scmp.lt.u32.totalorder %s6113_s11, %s7631_s2 }
  0x16   :  { %p6119_p10 = pnand %p6117_p9, %p6114_p8 }
  0x18   :  { %6122 = shalt.err (!%p6119_p10)
}
  0x19   :  { %s6123_s17 = scalar_lea.vmem %s38_s28, 4096  ;;  %p6128_p12 = scmp.lt.s32.totalorder %s38_s28, %s38_s28 }
  0x1a   :  { %p6124_p11 = scmp.ne.s32.totalorder %s38_s28, %s6123_s17  ;;  %p6129_p13 = scmp.lt.s32.totalorder %s6123_s17, %s6123_s17 }
  0x1c   :  { %p6130_p0 = por %p6129_p13, %p6128_p12 }
  0x1e   :  { %p6131_p1 = pnand %p6130_p0, %p6124_p11 }
  0x20   :  { %6134 = shalt.err (!%p6131_p1)
}
  0x21   :  { %43 = dma.hbm_to_vmem [thread:$0]  %s7631_s2, 4096, %s38_s28, [#allocation7], %s6140_s23, %s6140_s23, %s6141_s24  }
  0x22   :  { %6135 = dma.done.wait [#allocation5], 4096  }
  0x23   :  { %6136 = vsyncadd [#allocation5], 4294963200 }
  0x24   :  { %6137 = dma.done.wait [#allocation7], 4096  }
  0x25   :  { %6138 = vsyncadd [#allocation7], 4294963200  ;;  %v6143_v0 = vmov 0.0   ;;  %vm6144_vm0 = vmmov 0   ;;  %v5753_v1 = vld [vmem:[#allocation4] sm:$0xff]   ;;  %v5754_v2 = vld [vmem:[#allocation4 + $0x8] sm:$0xff]  }
  0x26   :  { %4633 = vmatprep.subr.bf16.mxu0 %v6143_v0  ;;  %4649 = vmatprep.mubr.msk.bf16.mxu0 %vm6144_vm0, %v6143_v0  ;;  %v5755_v3 = vld [vmem:[#allocation4 + $0x10] sm:$0xff]   ;;  %v5756_v4 = vld [vmem:[#allocation4 + $0x18] sm:$0xff]   ;;  %v5761_v5 = vld [vmem:[%s7629_s0] sm:$0xff]   ;;  %s6145_s28 = smov 48   ;;  %s6146_s29 = smov 16  }
  0x27   :  { %4469 = vmatprep.subr.bf16.mxu1 %v5753_v1  ;;  %4485 = vmatprep.mubr.bf16.mxu1 %v5761_v5  ;;  %v5757_v6 = vld [vmem:[#allocation4 + $0x20] sm:$0xff]   ;;  %v5758_v7 = vld [vmem:[#allocation4 + $0x28] sm:$0xff]   ;;  %v5759_v8 = vld [vmem:[#allocation4 + $0x30] sm:$0xff]   ;;  %s6147_s30 = smov 32  }
  0x28   :  { %4470 = vmatpush3.bf16.msra.mxu1 %v5753_v1  ;;  %v5760_v9 = vld [vmem:[#allocation4 + $0x38] sm:$0xff]   ;;  %v5762_v10 = vld [vmem:[%s7629_s0 + $0x8] sm:$0xff]   ;;  %v6236_v11 = vld [vmem:[#allocation6] sm:$0xff]  }
  0x29   :  { %4471 = vmatprep.subr.bf16.mxu1 %v5754_v2  ;;  %v5768_v12 = vld [vmem:[%s7629_s0 + $0x10] sm:$0xff]   ;;  %v6242_v13 = vld [vmem:[#allocation6 + $0x8] sm:$0xff]   ;;  %v5769_v14 = vld [vmem:[%s7629_s0 + $0x18] sm:$0xff]  }
  0x2a   :  { %v6249_v15 = vld [vmem:[#allocation6 + $0x10] sm:$0xff]   ;;  %v6253_v16 = vld [vmem:[#allocation6 + $0x18] sm:$0xff]   ;;  %v6259_v17 = vld [vmem:[#allocation6 + $0x20] sm:$0xff]  }
  0x2b   :  { %v6263_v18 = vld [vmem:[#allocation6 + $0x28] sm:$0xff]   ;;  %v6267_v19 = vld [vmem:[#allocation6 + $0x30] sm:$0xff]   ;;  %v6272_v20 = vld [vmem:[#allocation6 + $0x38] sm:$0xff]  }
  0x2c   :  { %4472 = vmatpush3.bf16.msra.mxu1 %v5754_v2  ;;  %v272_v21 = vld [vmem:[%s7633_s4] sm:$0xff]  ;;  %v6285_v24 = vld [vmem:[#allocation4 + $0x48] sm:$0xff]   ;;  %v6291_v25 = vld [vmem:[#allocation4 + $0x50] sm:$0xff]  }
  0x2d   :  { %4473 = vmatprep.subr.bf16.mxu1 %v5755_v3  ;;  %v274_v22 = vpack.c.bf16 %v272_v21, %v272_v21  ;;  %v6282_v23 = vld [vmem:[#allocation4 + $0x40] sm:$0xff]   ;;  %v6317_v51 = vld [vmem:[#allocation4 + $0x58] sm:$0xff]   ;;  %v6328_v53 = vld [vmem:[#allocation4 + $0x68] sm:$0xff]  }
  0x2e   :  { %4634 = vmatpush3.bf16.msra.mxu0 %v6282_v23  ;;  %v3815_v26 = vld [vmem:[%s7632_s3] ss:$0 sm:$0xff]  ;;  %v6332_v54 = vld [vmem:[#allocation4 + $0x70] sm:$0xff]   ;;  %v6340_v56 = vld [vmem:[#allocation4 + $0x78] sm:$0xff]  }
  0x2f   :  { %4635 = vmatprep.subr.bf16.mxu0 %v6143_v0  ;;  %v6323_v52 = vld [vmem:[#allocation4 + $0x60] sm:$0xff]  }
  0x30   :  { %4474 = vmatpush3.bf16.msra.mxu1 %v5755_v3  ;;  %v273_v59 = vld [vmem:[%s7634_s5] sm:$0xff] }
  0x31   :  { %4475 = vmatprep.subr.bf16.mxu1 %v5756_v4 }
  0x32   :  { %4636 = vmatpush3.bf16.msra.mxu0 %v6285_v24 }
  0x33   :  { %4637 = vmatprep.subr.bf16.mxu0 %v6143_v0 }
  0x34   :  { %4476 = vmatpush3.bf16.msra.mxu1 %v5756_v4 }
  0x35   :  { %4477 = vmatprep.subr.bf16.mxu1 %v5757_v6 }
  0x36   :  { %4638 = vmatpush3.bf16.msra.mxu0 %v6291_v25 }
  0x37   :  { %4639 = vmatprep.subr.bf16.mxu0 %v6143_v0 }
  0x38   :  { %4478 = vmatpush3.bf16.msra.mxu1 %v5757_v6 }
  0x39   :  { %4479 = vmatprep.subr.bf16.mxu1 %v5758_v7 }
  0x3a   :  { %4640 = vmatpush3.bf16.msra.mxu0 %v6317_v51 }
  0x3b   :  { %4641 = vmatprep.subr.bf16.mxu0 %v6143_v0 }
  0x3c   :  { %4480 = vmatpush3.bf16.msra.mxu1 %v5758_v7 }
  0x3d   :  { %4481 = vmatprep.subr.bf16.mxu1 %v5759_v8 }
  0x3e   :  { %4642 = vmatpush3.bf16.msra.mxu0 %v6323_v52 }
  0x3f   :  { %4643 = vmatprep.subr.bf16.mxu0 %v6143_v0 }
  0x40   :  { %4482 = vmatpush3.bf16.msra.mxu1 %v5759_v8 }
  0x41   :  { %4483 = vmatprep.subr.bf16.mxu1 %v5760_v9 }
  0x42   :  { %4644 = vmatpush3.bf16.msra.mxu0 %v6328_v53 }
  0x43   :  { %4645 = vmatprep.subr.bf16.mxu0 %v6143_v0 }
  0x44   :  { %4484 = vmatpush3.bf16.msra.mxu1 %v5760_v9 }
  0x45   :  { %4493 = vmatprep.subr.bf16.mxu1 %v6143_v0 }
  0x46   :  { %4646 = vmatpush3.bf16.msra.mxu0 %v6332_v54 }
  0x47   :  { %4486 = vmatmul.mubr.bf16.vlgmr.msra.gmra.mrb[0].mxu1 %v5762_v10  ;;  %4647 = vmatprep.subr.bf16.mxu0 %v6143_v0 }
  0x48   :  { %4494 = vmatpush3.bf16.msra.mxu1 %v6236_v11  ;;  %4489 = vmatprep.mubr.bf16.mxu1 %v5768_v12 }
  0x49   :  { %4495 = vmatprep.subr.bf16.mxu1 %v6143_v0 }
  0x4a   :  { %4648 = vmatpush3.bf16.msra.mxu0 %v6340_v56 }
  0x4b   :  { %4673 = vmatprep.subr.bf16.mxu0 %v6143_v0 }
  0x4c   :  { %4496 = vmatpush3.bf16.msra.mxu1 %v6242_v13 }
  0x4d   :  { %4497 = vmatprep.subr.bf16.mxu1 %v6143_v0 }
  0x4f   :  { %4490 = vmatmul.mubr.bf16.gmra.mrb[4].mxu1 %v5769_v14 }
  0x50   :  { %4498 = vmatpush3.bf16.msra.mxu1 %v6249_v15  ;;  %4509 = vmatprep.mubr.msk.bf16.mxu1 %vm6144_vm0, %v6143_v0 }
  0x51   :  { %4499 = vmatprep.subr.bf16.mxu1 %v6143_v0 }
  0x54   :  { %4500 = vmatpush3.bf16.msra.mxu1 %v6253_v16 }
  0x55   :  { %4501 = vmatprep.subr.bf16.mxu1 %v6143_v0 }
  0x58   :  { %4502 = vmatpush3.bf16.msra.mxu1 %v6259_v17 }
  0x59   :  { %4503 = vmatprep.subr.bf16.mxu1 %v6143_v0 }
  0x5c   :  { %4504 = vmatpush3.bf16.msra.mxu1 %v6263_v18 }
  0x5d   :  { %4505 = vmatprep.subr.bf16.mxu1 %v6143_v0 }
  0x60   :  { %4506 = vmatpush3.bf16.msra.mxu1 %v6267_v19 }
  0x61   :  { %4507 = vmatprep.subr.bf16.mxu1 %v6143_v0 }
  0x64   :  { %4508 = vmatpush3.bf16.msra.mxu1 %v6272_v20 }
  0x65   :  { %4513 = vmatprep.subr.bf16.mxu1 %v6143_v0 }
  0x67   :  { %4510 = vmatmul.mubr.bf16.vlgmr.msra.gmra.mrb[8].mxu1 %v274_v22 }
  0x68   :  { %4529 = vmatprep.mubr.msk.bf16.mxu1 %vm6144_vm0, %v6143_v0  ;;  %4514 = vmatpush3.bf16.msra.mxu1 %v6282_v23 }
  0x69   :  { %4515 = vmatprep.subr.bf16.mxu1 %v6143_v0 }
  0x6c   :  { %4516 = vmatpush3.bf16.msra.mxu1 %v6285_v24 }
  0x6d   :  { %4517 = vmatprep.subr.bf16.mxu1 %v6143_v0 }
  0x70   :  { %4518 = vmatpush3.bf16.msra.mxu1 %v6291_v25 }
  0x71   :  { %4519 = vmatprep.subr.bf16.mxu1 %v6143_v0 }
  0x74   :  { %4520 = vmatpush3.bf16.msra.mxu1 %v6317_v51 }
  0x75   :  { %4521 = vmatprep.subr.bf16.mxu1 %v6143_v0 }
  0x78   :  { %4522 = vmatpush3.bf16.msra.mxu1 %v6323_v52 }
  0x79   :  { %4523 = vmatprep.subr.bf16.mxu1 %v6143_v0 }
  0x7c   :  { %4524 = vmatpush3.bf16.msra.mxu1 %v6328_v53 }
  0x7d   :  { %4525 = vmatprep.subr.bf16.mxu1 %v6143_v0 }
  0x80   :  { %4526 = vmatpush3.bf16.msra.mxu1 %v6332_v54 }
  0x81   :  { %4527 = vmatprep.subr.bf16.mxu1 %v6143_v0 }
  0x84   :  { %4528 = vmatpush3.bf16.msra.mxu1 %v6340_v56 }
  0x85   :  { %4533 = vmatprep.subr.bf16.mxu1 %v6143_v0 }
 0x11a   :  { %v4487_v27 = vpop.f32.mrb[0].mxu1 }
 0x11b   :  { %v6303_v28 = vadd.f32 %v4487_v27, %v3815_v26  ;;  %v198_v29 = vpop.f32.mrb[1].mxu1 }
 0x11c   :  { %v4488_v30 = vpop.f32.mrb[2].mxu1  ;;  %v199_v42 = vadd.f32 %v3815_v26, %v198_v29 }
 0x11d   :  { %v6305_v31 = vadd.f32 %v4488_v30, %v3815_v26  ;;  %v201_v32 = vpop.f32.mrb[3].mxu1 }
 0x11e   :  { %v6307_v33 = vadd.f32 %v3815_v26, %v201_v32 }
 0x122   :  { %v4491_v34 = vpop.f32.mrb[4].mxu1 }
 0x123   :  { %v6309_v35 = vadd.f32 %v4491_v34, %v3815_v26  ;;  %v214_v36 = vpop.f32.mrb[5].mxu1 }
 0x124   :  { %v6311_v37 = vadd.f32 %v3815_v26, %v214_v36  ;;  %v4492_v38 = vpop.f32.mrb[6].mxu1 }
 0x125   :  { %v6313_v39 = vadd.f32 %v4492_v38, %v3815_v26  ;;  %v217_v40 = vpop.f32.mrb[7].mxu1 }
 0x126   :  { %v6315_v41 = vadd.f32 %v3815_v26, %v217_v40 }
 0x13a   :  { %v358_v43 = vpop.f32.mrb[8].mxu1 }
 0x13b   :  { %v364_v44 = vadd.f32 %v358_v43, %v199_v42  ;;  %v4511_v45 = vpop.f32.mrb[9].mxu1 }
 0x13c   :  { %v361_v46 = vpop.f32.mrb[10].mxu1 }
 0x13d   :  { %v3837_v47 = vmul.f32 -1.442695, %v364_v44  ;;  %v4512_v48 = vpop.f32.mrb[11].mxu1 }
 0x13f   :  { %5829 = vpow2.f32 %v3837_v47 }
 0x149   :  { %v5830_v49 = vpop.eup %5829 }
 0x14a   :  { %v368_v50 = vadd.f32 1.0, %v5830_v49 }
 0x14c   :  { %5831 = vrcp.f32 %v368_v50 }
 0x14d   :  { %5833 = vtanh.f32 %v364_v44 }
 0x156   :  { %v5832_v55 = vpop.eup %5831 }
 0x157   :  { %376 = vrot.lane.b32.xlu1 %v5832_v55, %s6145_s28  ;;  %372 = vrot.lane.b32.xlu0 %v5832_v55, %s6146_s29  ;;  %v5834_v57 = vpop.eup %5833 }
 0x15b   :  { %374 = vrot.lane.b32.xlu0 %v5834_v57, %s6147_s30 }
 0x1c9   :  { %v373_v58 = vpop.permute.xlu0 %372  ;;  %v377_v2 = vpop.permute.xlu1 %376 }
 0x1ca   :  { %v378_v61 = vmul.f32 %v373_v58, %v273_v59 }
 0x1cd   :  { %v375_v60 = vpop.permute.xlu0 %374 }
 0x1ce   :  { %v379_v62 = vmul.f32 %v5832_v55, %v375_v60 }
 0x1d0   :  { %v6353_v63 = vadd.f32 %v379_v62, %v378_v61 }
 0x1d2   :  { %5835 = vtanh.f32 %v6353_v63 }
 0x1dc   :  { %v5836_v1 = vpop.eup %5835 }
 0x1dd   :  { %v382_v3 = vmul.f32 %v5836_v1, %v377_v2 }
 0x1df   :  { %v383_v4 = vpack.c.bf16 %v382_v3, %v382_v3 }
 0x1e1   :  { %4530 = vmatmul.mubr.bf16.vlgmr.msra.gmra.mrb[12].mxu1 %v383_v4 }
 0x1e2   :  { %4534 = vmatpush3.bf16.msra.mxu1 %v6236_v11  ;;  %4549 = vmatprep.mubr.msk.bf16.mxu1 %vm6144_vm0, %v6143_v0 }
 0x1e3   :  { %4535 = vmatprep.subr.bf16.mxu1 %v6143_v0 }
 0x1e6   :  { %4536 = vmatpush3.bf16.msra.mxu1 %v6242_v13 }
 0x1e7   :  { %4537 = vmatprep.subr.bf16.mxu1 %v6143_v0 }
 0x1ea   :  { %4538 = vmatpush3.bf16.msra.mxu1 %v6249_v15 }
 0x1eb   :  { %4539 = vmatprep.subr.bf16.mxu1 %v6143_v0 }
 0x1ee   :  { %4540 = vmatpush3.bf16.msra.mxu1 %v6253_v16 }
 0x1ef   :  { %4541 = vmatprep.subr.bf16.mxu1 %v6143_v0 }
 0x1f2   :  { %4542 = vmatpush3.bf16.msra.mxu1 %v6259_v17 }
 0x1f3   :  { %4543 = vmatprep.subr.bf16.mxu1 %v6143_v0 }
 0x1f6   :  { %4544 = vmatpush3.bf16.msra.mxu1 %v6263_v18 }
 0x1f7   :  { %4545 = vmatprep.subr.bf16.mxu1 %v6143_v0 }
 0x1fa   :  { %4546 = vmatpush3.bf16.msra.mxu1 %v6267_v19 }
 0x1fb   :  { %4547 = vmatprep.subr.bf16.mxu1 %v6143_v0 }
 0x1fe   :  { %4548 = vmatpush3.bf16.msra.mxu1 %v6272_v20 }
 0x1ff   :  { %4553 = vmatprep.subr.bf16.mxu1 %v6143_v0 }
 0x201   :  { %4550 = vmatmul.mubr.bf16.vlgmr.msra.gmra.mrb[16].mxu1 %v383_v4 }
 0x202   :  { %4554 = vmatpush3.bf16.msra.mxu1 %v6282_v23  ;;  %4569 = vmatprep.mubr.msk.bf16.mxu1 %vm6144_vm0, %v6143_v0 }
 0x203   :  { %4555 = vmatprep.subr.bf16.mxu1 %v6143_v0 }
 0x206   :  { %4556 = vmatpush3.bf16.msra.mxu1 %v6285_v24 }
 0x207   :  { %4557 = vmatprep.subr.bf16.mxu1 %v6143_v0 }
 0x20a   :  { %4558 = vmatpush3.bf16.msra.mxu1 %v6291_v25 }
 0x20b   :  { %4559 = vmatprep.subr.bf16.mxu1 %v6143_v0 }
 0x20e   :  { %4560 = vmatpush3.bf16.msra.mxu1 %v6317_v51 }
 0x20f   :  { %4561 = vmatprep.subr.bf16.mxu1 %v6143_v0 }
 0x212   :  { %4562 = vmatpush3.bf16.msra.mxu1 %v6323_v52 }
 0x213   :  { %4563 = vmatprep.subr.bf16.mxu1 %v6143_v0 }
 0x216   :  { %4564 = vmatpush3.bf16.msra.mxu1 %v6328_v53 }
 0x217   :  { %4565 = vmatprep.subr.bf16.mxu1 %v6143_v0 }
 0x21a   :  { %4566 = vmatpush3.bf16.msra.mxu1 %v6332_v54 }
 0x21b   :  { %4567 = vmatprep.subr.bf16.mxu1 %v6143_v0 }
 0x21e   :  { %4568 = vmatpush3.bf16.msra.mxu1 %v6340_v56 }
 0x21f   :  { %4573 = vmatprep.subr.bf16.mxu1 %v6143_v0 }
 0x2b4   :  { %v6392_v5 = vpop.f32.mrb[12].mxu1 }
 0x2b5   :  { %v4531_v6 = vpop.f32.mrb[13].mxu1 }
 0x2b6   :  { %v475_v7 = vpop.f32.mrb[14].mxu1 }
 0x2b7   :  { %v4532_v8 = vpop.f32.mrb[15].mxu1 }
 0x2d4   :  { %v514_v9 = vpop.f32.mrb[16].mxu1 }
 0x2d5   :  { %v520_v10 = vadd.f32 %v514_v9, %v6307_v33  ;;  %v4551_v12 = vpop.f32.mrb[17].mxu1 }
 0x2d6   :  { %v517_v14 = vpop.f32.mrb[18].mxu1 }
 0x2d7   :  { %v3847_v21 = vmul.f32 -1.442695, %v520_v10  ;;  %5837 = vtanh.f32 %v520_v10  ;;  %v4552_v22 = vpop.f32.mrb[19].mxu1 }
 0x2d9   :  { %5839 = vpow2.f32 %v3847_v21 }
 0x2e1   :  { %v5838_v26 = vpop.eup %5837 }
 0x2e2   :  { %530 = vrot.lane.b32.xlu0 %v5838_v26, %s6147_s30 }
 0x2e3   :  { %v5840_v27 = vpop.eup %5839 }
 0x2e4   :  { %v524_v29 = vadd.f32 1.0, %v5840_v27 }
 0x2e6   :  { %5841 = vrcp.f32 %v524_v29 }
 0x2f0   :  { %v5842_v30 = vpop.eup %5841 }
 0x2f1   :  { %528 = vrot.lane.b32.xlu1 %v5842_v30, %s6146_s29 }
 0x2f5   :  { %532 = vrot.lane.b32.xlu1 %v5842_v30, %s6145_s28 }
 0x354   :  { %v531_v32 = vpop.permute.xlu0 %530 }
 0x355   :  { %v535_v33 = vmul.f32 %v5842_v30, %v531_v32 }
 0x363   :  { %v529_v34 = vpop.permute.xlu1 %528 }
 0x364   :  { %v534_v36 = vmul.f32 %v529_v34, %v6353_v63 }
 0x366   :  { %v6399_v38 = vadd.f32 %v535_v33, %v534_v36 }
 0x367   :  { %v533_v42 = vpop.permute.xlu1 %532 }
 0x368   :  { %5843 = vtanh.f32 %v6399_v38 }
 0x372   :  { %v5844_v40 = vpop.eup %5843 }
 0x373   :  { %v538_v43 = vmul.f32 %v5844_v40, %v533_v42 }
 0x375   :  { %v539_v44 = vpack.c.bf16 %v538_v43, %v538_v43 }
 0x377   :  { %4570 = vmatmul.mubr.bf16.vlgmr.msra.gmra.mrb[20].mxu1 %v539_v44 }
 0x378   :  { %4574 = vmatpush3.bf16.msra.mxu1 %v6236_v11  ;;  %4589 = vmatprep.mubr.msk.bf16.mxu1 %vm6144_vm0, %v6143_v0 }
 0x379   :  { %4575 = vmatprep.subr.bf16.mxu1 %v6143_v0 }
 0x37c   :  { %4576 = vmatpush3.bf16.msra.mxu1 %v6242_v13 }
 0x37d   :  { %4577 = vmatprep.subr.bf16.mxu1 %v6143_v0 }
 0x380   :  { %4578 = vmatpush3.bf16.msra.mxu1 %v6249_v15 }
 0x381   :  { %4579 = vmatprep.subr.bf16.mxu1 %v6143_v0 }
 0x384   :  { %4580 = vmatpush3.bf16.msra.mxu1 %v6253_v16 }
 0x385   :  { %4581 = vmatprep.subr.bf16.mxu1 %v6143_v0 }
 0x388   :  { %4582 = vmatpush3.bf16.msra.mxu1 %v6259_v17 }
 0x389   :  { %4583 = vmatprep.subr.bf16.mxu1 %v6143_v0 }
 0x38c   :  { %4584 = vmatpush3.bf16.msra.mxu1 %v6263_v18 }
 0x38d   :  { %4585 = vmatprep.subr.bf16.mxu1 %v6143_v0 }
 0x390   :  { %4586 = vmatpush3.bf16.msra.mxu1 %v6267_v19 }
 0x391   :  { %4587 = vmatprep.subr.bf16.mxu1 %v6143_v0 }
 0x394   :  { %4588 = vmatpush3.bf16.msra.mxu1 %v6272_v20 }
 0x395   :  { %4593 = vmatprep.subr.bf16.mxu1 %v6143_v0 }
 0x397   :  { %4590 = vmatmul.mubr.bf16.vlgmr.msra.gmra.mrb[24].mxu1 %v539_v44 }
 0x398   :  { %4594 = vmatpush3.bf16.msra.mxu1 %v6282_v23  ;;  %4609 = vmatprep.mubr.msk.bf16.mxu1 %vm6144_vm0, %v6143_v0 }
 0x399   :  { %4595 = vmatprep.subr.bf16.mxu1 %v6143_v0 }
 0x39c   :  { %4596 = vmatpush3.bf16.msra.mxu1 %v6285_v24 }
 0x39d   :  { %4597 = vmatprep.subr.bf16.mxu1 %v6143_v0 }
 0x3a0   :  { %4598 = vmatpush3.bf16.msra.mxu1 %v6291_v25 }
 0x3a1   :  { %4599 = vmatprep.subr.bf16.mxu1 %v6143_v0 }
 0x3a4   :  { %4600 = vmatpush3.bf16.msra.mxu1 %v6317_v51 }
 0x3a5   :  { %4601 = vmatprep.subr.bf16.mxu1 %v6143_v0 }
 0x3a8   :  { %4602 = vmatpush3.bf16.msra.mxu1 %v6323_v52 }
 0x3a9   :  { %4603 = vmatprep.subr.bf16.mxu1 %v6143_v0 }
 0x3ac   :  { %4604 = vmatpush3.bf16.msra.mxu1 %v6328_v53 }
 0x3ad   :  { %4605 = vmatprep.subr.bf16.mxu1 %v6143_v0 }
 0x3b0   :  { %4606 = vmatpush3.bf16.msra.mxu1 %v6332_v54 }
 0x3b1   :  { %4607 = vmatprep.subr.bf16.mxu1 %v6143_v0 }
 0x3b4   :  { %4608 = vmatpush3.bf16.msra.mxu1 %v6340_v56 }
 0x3b5   :  { %4613 = vmatprep.subr.bf16.mxu1 %v6143_v0 }
 0x44a   :  { %v6438_v45 = vpop.f32.mrb[20].mxu1 }
 0x44b   :  { %v4571_v46 = vpop.f32.mrb[21].mxu1 }
 0x44c   :  { %v577_v47 = vpop.f32.mrb[22].mxu1 }
 0x44d   :  { %v4572_v48 = vpop.f32.mrb[23].mxu1 }
 0x46a   :  { %v616_v49 = vpop.f32.mrb[24].mxu1 }
 0x46b   :  { %v622_v50 = vadd.f32 %v616_v49, %v6303_v28  ;;  %v4591_v55 = vpop.f32.mrb[25].mxu1 }
 0x46c   :  { %v619_v57 = vpop.f32.mrb[26].mxu1 }
 0x46d   :  { %v3848_v58 = vmul.f32 -1.442695, %v622_v50  ;;  %5845 = vtanh.f32 %v622_v50  ;;  %v4592_v59 = vpop.f32.mrb[27].mxu1 }
 0x46f   :  { %5847 = vpow2.f32 %v3848_v58 }
 0x477   :  { %v5846_v60 = vpop.eup %5845 }
 0x478   :  { %632 = vrot.lane.b32.xlu1 %v5846_v60, %s6147_s30 }
 0x479   :  { %v5848_v61 = vpop.eup %5847 }
 0x47a   :  { %v626_v62 = vadd.f32 1.0, %v5848_v61 }
 0x47c   :  { %5849 = vrcp.f32 %v626_v62 }
 0x486   :  { %v5850_v63 = vpop.eup %5849 }
 0x487   :  { %630 = vrot.lane.b32.xlu0 %v5850_v63, %s6146_s29 }
 0x48b   :  { %634 = vrot.lane.b32.xlu0 %v5850_v63, %s6145_s28 }
 0x4ea   :  { %v633_v1 = vpop.permute.xlu1 %632 }
 0x4eb   :  { %v637_v28 = vmul.f32 %v5850_v63, %v633_v1 }
 0x4f9   :  { %v631_v2 = vpop.permute.xlu0 %630 }
 0x4fa   :  { %v636_v3 = vmul.f32 %v631_v2, %v6399_v38 }
 0x4fc   :  { %v6445_v4 = vadd.f32 %v637_v28, %v636_v3 }
 0x4fd   :  { %v635_v7 = vpop.permute.xlu0 %634 }
 0x4fe   :  { %5851 = vtanh.f32 %v6445_v4 }
 0x508   :  { %v5852_v6 = vpop.eup %5851 }
 0x509   :  { %v640_v8 = vmul.f32 %v5852_v6, %v635_v7 }
 0x50b   :  { %v641_v9 = vpack.c.bf16 %v640_v8, %v640_v8 }
 0x50d   :  { %4610 = vmatmul.mubr.bf16.vlgmr.msra.gmra.mrb[28].mxu1 %v641_v9 }
 0x50e   :  { %4614 = vmatpush3.bf16.msra.mxu1 %v6236_v11  ;;  %4629 = vmatprep.mubr.msk.bf16.mxu1 %vm6144_vm0, %v6143_v0 }
 0x50f   :  { %4615 = vmatprep.subr.bf16.mxu1 %v6143_v0 }
 0x512   :  { %4616 = vmatpush3.bf16.msra.mxu1 %v6242_v13 }
 0x513   :  { %4617 = vmatprep.subr.bf16.mxu1 %v6143_v0 }
 0x516   :  { %4618 = vmatpush3.bf16.msra.mxu1 %v6249_v15 }
 0x517   :  { %4619 = vmatprep.subr.bf16.mxu1 %v6143_v0 }
 0x51a   :  { %4620 = vmatpush3.bf16.msra.mxu1 %v6253_v16 }
 0x51b   :  { %4621 = vmatprep.subr.bf16.mxu1 %v6143_v0 }
 0x51e   :  { %4622 = vmatpush3.bf16.msra.mxu1 %v6259_v17 }
 0x51f   :  { %4623 = vmatprep.subr.bf16.mxu1 %v6143_v0 }
 0x522   :  { %4624 = vmatpush3.bf16.msra.mxu1 %v6263_v18 }
 0x523   :  { %4625 = vmatprep.subr.bf16.mxu1 %v6143_v0 }
 0x526   :  { %4626 = vmatpush3.bf16.msra.mxu1 %v6267_v19 }
 0x527   :  { %4627 = vmatprep.subr.bf16.mxu1 %v6143_v0 }
 0x52a   :  { %4628 = vmatpush3.bf16.msra.mxu1 %v6272_v20 }
 0x52b   :  { %4653 = vmatprep.subr.bf16.mxu1 %v6143_v0 }
 0x52d   :  { %4630 = vmatmul.mubr.bf16.vlgmr.msra.gmra.mrb[32].mxu1 %v641_v9 }
 0x52e   :  { %4654 = vmatpush3.bf16.msra.mxu1 %v6236_v11  ;;  %4669 = vmatprep.mubr.msk.bf16.mxu1 %vm6144_vm0, %v6143_v0 }
 0x52f   :  { %4655 = vmatprep.subr.bf16.mxu1 %v6143_v0 }
 0x532   :  { %4656 = vmatpush3.bf16.msra.mxu1 %v6242_v13 }
 0x533   :  { %4657 = vmatprep.subr.bf16.mxu1 %v6143_v0 }
 0x536   :  { %4658 = vmatpush3.bf16.msra.mxu1 %v6249_v15 }
 0x537   :  { %4659 = vmatprep.subr.bf16.mxu1 %v6143_v0 }
 0x53a   :  { %4660 = vmatpush3.bf16.msra.mxu1 %v6253_v16 }
 0x53b   :  { %4661 = vmatprep.subr.bf16.mxu1 %v6143_v0 }
 0x53e   :  { %4662 = vmatpush3.bf16.msra.mxu1 %v6259_v17 }
 0x53f   :  { %4663 = vmatprep.subr.bf16.mxu1 %v6143_v0 }
 0x542   :  { %4664 = vmatpush3.bf16.msra.mxu1 %v6263_v18 }
 0x543   :  { %4665 = vmatprep.subr.bf16.mxu1 %v6143_v0 }
 0x546   :  { %4666 = vmatpush3.bf16.msra.mxu1 %v6267_v19 }
 0x547   :  { %4667 = vmatprep.subr.bf16.mxu1 %v6143_v0 }
 0x54a   :  { %4668 = vmatpush3.bf16.msra.mxu1 %v6272_v20 }
 0x54b   :  { %4693 = vmatprep.subr.bf16.mxu1 %v6143_v0 }
 0x5e0   :  { %v6484_v10 = vpop.f32.mrb[28].mxu1 }
 0x5e1   :  { %v4611_v12 = vpop.f32.mrb[29].mxu1 }
 0x5e2   :  { %v679_v14 = vpop.f32.mrb[30].mxu1 }
 0x5e3   :  { %v4612_v21 = vpop.f32.mrb[31].mxu1 }
 0x600   :  { %v718_v22 = vpop.f32.mrb[32].mxu1 }
 0x601   :  { %v724_v26 = vadd.f32 %v718_v22, %v6305_v31  ;;  %v4631_v27 = vpop.f32.mrb[33].mxu1 }
 0x602   :  { %v721_v29 = vpop.f32.mrb[34].mxu1 }
 0x603   :  { %v3849_v30 = vmul.f32 -1.442695, %v724_v26  ;;  %5853 = vtanh.f32 %v724_v26  ;;  %v4632_v32 = vpop.f32.mrb[35].mxu1 }
 0x605   :  { %5855 = vpow2.f32 %v3849_v30 }
 0x60d   :  { %v5854_v34 = vpop.eup %5853 }
 0x60e   :  { %734 = vrot.lane.b32.xlu0 %v5854_v34, %s6147_s30 }
 0x60f   :  { %v5856_v33 = vpop.eup %5855 }
 0x610   :  { %v728_v36 = vadd.f32 1.0, %v5856_v33 }
 0x612   :  { %5857 = vrcp.f32 %v728_v36 }
 0x61c   :  { %v5858_v38 = vpop.eup %5857 }
 0x61d   :  { %732 = vrot.lane.b32.xlu1 %v5858_v38, %s6146_s29 }
 0x621   :  { %736 = vrot.lane.b32.xlu1 %v5858_v38, %s6145_s28 }
 0x680   :  { %v735_v40 = vpop.permute.xlu0 %734 }
 0x681   :  { %v739_v31 = vmul.f32 %v5858_v38, %v735_v40 }
 0x68f   :  { %v733_v42 = vpop.permute.xlu1 %732 }
 0x690   :  { %v738_v43 = vmul.f32 %v733_v42, %v6445_v4 }
 0x692   :  { %v740_v44 = vadd.f32 %v739_v31, %v738_v43  ;;  %v6089_v43 = vld [vmem:[#allocation6] sm:$0xff]  }
 0x693   :  { %v737_v47 = vpop.permute.xlu1 %736 }
 0x694   :  { %5859 = vtanh.f32 %v740_v44 }
 0x69e   :  { %v5860_v46 = vpop.eup %5859 }
 0x69f   :  { %v742_v48 = vmul.f32 %v5860_v46, %v737_v47 }
 0x6a1   :  { %v743_v49 = vpack.c.bf16 %v742_v48, %v742_v48 }
 0x6a3   :  { %4650 = vmatmul.mubr.bf16.vlgmr.msra.gmra.mrb[0].mxu0 %v743_v49  ;;  %4670 = vmatmul.mubr.bf16.vlgmr.msra.gmra.mrb[36].mxu1 %v743_v49 }
 0x6a4   :  { %4674 = vmatpush3.bf16.msra.mxu0 %v6282_v23  ;;  %4694 = vmatpush3.bf16.msra.mxu1 %v6236_v11 }
 0x6a5   :  { %4675 = vmatprep.subr.bf16.mxu0 %v6143_v0  ;;  %4695 = vmatprep.subr.bf16.mxu1 %v6143_v0 }
 0x6a6   :  { %4689 = vmatprep.mubr.msk.bf16.mxu0 %vm6144_vm0, %v6143_v0  ;;  %4709 = vmatprep.mubr.msk.bf16.mxu1 %vm6144_vm0, %v6143_v0 }
 0x6a8   :  { %4676 = vmatpush3.bf16.msra.mxu0 %v6285_v24  ;;  %4696 = vmatpush3.bf16.msra.mxu1 %v6242_v13 }
 0x6a9   :  { %4677 = vmatprep.subr.bf16.mxu0 %v6143_v0  ;;  %4697 = vmatprep.subr.bf16.mxu1 %v6143_v0 }
 0x6ac   :  { %4678 = vmatpush3.bf16.msra.mxu0 %v6291_v25  ;;  %4698 = vmatpush3.bf16.msra.mxu1 %v6249_v15 }
 0x6ad   :  { %4679 = vmatprep.subr.bf16.mxu0 %v6143_v0  ;;  %4699 = vmatprep.subr.bf16.mxu1 %v6143_v0 }
 0x6b0   :  { %4680 = vmatpush3.bf16.msra.mxu0 %v6317_v51  ;;  %4700 = vmatpush3.bf16.msra.mxu1 %v6253_v16 }
 0x6b1   :  { %4681 = vmatprep.subr.bf16.mxu0 %v6143_v0  ;;  %4701 = vmatprep.subr.bf16.mxu1 %v6143_v0 }
 0x6b4   :  { %4682 = vmatpush3.bf16.msra.mxu0 %v6323_v52  ;;  %4702 = vmatpush3.bf16.msra.mxu1 %v6259_v17 }
 0x6b5   :  { %4683 = vmatprep.subr.bf16.mxu0 %v6143_v0  ;;  %4703 = vmatprep.subr.bf16.mxu1 %v6143_v0 }
 0x6b8   :  { %4684 = vmatpush3.bf16.msra.mxu0 %v6328_v53  ;;  %4704 = vmatpush3.bf16.msra.mxu1 %v6263_v18 }
 0x6b9   :  { %4685 = vmatprep.subr.bf16.mxu0 %v6143_v0  ;;  %4705 = vmatprep.subr.bf16.mxu1 %v6143_v0 }
 0x6bc   :  { %4686 = vmatpush3.bf16.msra.mxu0 %v6332_v54  ;;  %4706 = vmatpush3.bf16.msra.mxu1 %v6267_v19 }
 0x6bd   :  { %4687 = vmatprep.subr.bf16.mxu0 %v6143_v0  ;;  %4707 = vmatprep.subr.bf16.mxu1 %v6143_v0 }
 0x6c0   :  { %4688 = vmatpush3.bf16.msra.mxu0 %v6340_v56  ;;  %4708 = vmatpush3.bf16.msra.mxu1 %v6272_v20 }
 0x6c1   :  { %4713 = vmatprep.subr.bf16.mxu0 %v6143_v0  ;;  %4733 = vmatprep.subr.bf16.mxu1 %v6143_v0 }
 0x776   :  { %v820_v50 = vpop.f32.mrb[36].mxu1 }
 0x777   :  { %v826_v55 = vadd.f32 %v820_v50, %v6311_v37  ;;  %v4671_v57 = vpop.f32.mrb[37].mxu1 }
 0x778   :  { %v823_v58 = vpop.f32.mrb[38].mxu1 }
 0x779   :  { %v3850_v59 = vmul.f32 -1.442695, %v826_v55  ;;  %5861 = vtanh.f32 %v826_v55  ;;  %v4672_v60 = vpop.f32.mrb[39].mxu1 }
 0x77b   :  { %5863 = vpow2.f32 %v3850_v59 }
 0x783   :  { %v5862_v61 = vpop.eup %5861 }
 0x784   :  { %836 = vrot.lane.b32.xlu1 %v5862_v61, %s6147_s30 }
 0x785   :  { %v5864_v62 = vpop.eup %5863 }
 0x786   :  { %v830_v63 = vadd.f32 1.0, %v5864_v62 }
 0x788   :  { %5865 = vrcp.f32 %v830_v63 }
 0x792   :  { %v5866_v1 = vpop.eup %5865 }
 0x793   :  { %834 = vrot.lane.b32.xlu0 %v5866_v1, %s6146_s29 }
 0x797   :  { %838 = vrot.lane.b32.xlu0 %v5866_v1, %s6145_s28 }
 0x7f6   :  { %v837_v2 = vpop.permute.xlu1 %836 }
 0x7f7   :  { %v841_v37 = vmul.f32 %v5866_v1, %v837_v2 }
 0x805   :  { %v835_v28 = vpop.permute.xlu0 %834 }
 0x806   :  { %v840_v3 = vmul.f32 %v835_v28, %v740_v44  ;;  %v6090_v44 = vld [vmem:[#allocation6 + $0x8] sm:$0xff]  }
 0x808   :  { %v842_v4 = vadd.f32 %v841_v37, %v840_v3 }
 0x809   :  { %v839_v7 = vpop.permute.xlu0 %838 }
 0x80a   :  { %5867 = vtanh.f32 %v842_v4 }
 0x814   :  { %v5868_v6 = vpop.eup %5867 }
 0x815   :  { %v844_v8 = vmul.f32 %v5868_v6, %v839_v7 }
 0x817   :  { %v845_v9 = vpack.c.bf16 %v844_v8, %v844_v8  ;;  %v6640_v8 = vld [vmem:[#allocation6 + $0x40] sm:$0xff]  }
 0x819   :  { %4690 = vmatmul.mubr.bf16.vlgmr.msra.gmra.mrb[4].mxu0 %v845_v9  ;;  %4710 = vmatmul.mubr.bf16.vlgmr.msra.gmra.mrb[40].mxu1 %v845_v9 }
 0x81a   :  { %4714 = vmatpush3.bf16.msra.mxu0 %v6282_v23  ;;  %4734 = vmatpush3.bf16.msra.mxu1 %v6236_v11 }
 0x81b   :  { %4715 = vmatprep.subr.bf16.mxu0 %v6143_v0  ;;  %4735 = vmatprep.subr.bf16.mxu1 %v6143_v0 }
 0x81c   :  { %4729 = vmatprep.mubr.msk.bf16.mxu0 %vm6144_vm0, %v6143_v0  ;;  %4749 = vmatprep.mubr.msk.bf16.mxu1 %vm6144_vm0, %v6143_v0 }
 0x81e   :  { %4716 = vmatpush3.bf16.msra.mxu0 %v6285_v24  ;;  %4736 = vmatpush3.bf16.msra.mxu1 %v6242_v13 }
 0x81f   :  { %4717 = vmatprep.subr.bf16.mxu0 %v6143_v0  ;;  %4737 = vmatprep.subr.bf16.mxu1 %v6143_v0 }
 0x822   :  { %4718 = vmatpush3.bf16.msra.mxu0 %v6291_v25  ;;  %4738 = vmatpush3.bf16.msra.mxu1 %v6249_v15 }
 0x823   :  { %4719 = vmatprep.subr.bf16.mxu0 %v6143_v0  ;;  %4739 = vmatprep.subr.bf16.mxu1 %v6143_v0 }
 0x826   :  { %4720 = vmatpush3.bf16.msra.mxu0 %v6317_v51  ;;  %4740 = vmatpush3.bf16.msra.mxu1 %v6253_v16 }
 0x827   :  { %4721 = vmatprep.subr.bf16.mxu0 %v6143_v0  ;;  %4741 = vmatprep.subr.bf16.mxu1 %v6143_v0 }
 0x82a   :  { %4722 = vmatpush3.bf16.msra.mxu0 %v6323_v52  ;;  %4742 = vmatpush3.bf16.msra.mxu1 %v6259_v17 }
 0x82b   :  { %4723 = vmatprep.subr.bf16.mxu0 %v6143_v0  ;;  %4743 = vmatprep.subr.bf16.mxu1 %v6143_v0 }
 0x82e   :  { %4724 = vmatpush3.bf16.msra.mxu0 %v6328_v53  ;;  %4744 = vmatpush3.bf16.msra.mxu1 %v6263_v18 }
 0x82f   :  { %4725 = vmatprep.subr.bf16.mxu0 %v6143_v0  ;;  %4745 = vmatprep.subr.bf16.mxu1 %v6143_v0 }
 0x832   :  { %4726 = vmatpush3.bf16.msra.mxu0 %v6332_v54  ;;  %4746 = vmatpush3.bf16.msra.mxu1 %v6267_v19 }
 0x833   :  { %4727 = vmatprep.subr.bf16.mxu0 %v6143_v0  ;;  %4747 = vmatprep.subr.bf16.mxu1 %v6143_v0 }
 0x836   :  { %4728 = vmatpush3.bf16.msra.mxu0 %v6340_v56  ;;  %4748 = vmatpush3.bf16.msra.mxu1 %v6272_v20 }
 0x837   :  { %4753 = vmatprep.subr.bf16.mxu0 %v6143_v0  ;;  %4773 = vmatprep.subr.bf16.mxu1 %v6143_v0 }
 0x8ec   :  { %v922_v11 = vpop.f32.mrb[40].mxu1 }
 0x8ed   :  { %v928_v13 = vadd.f32 %v922_v11, %v6315_v41  ;;  %v4711_v12 = vpop.f32.mrb[41].mxu1  ;;  %v6646_v11 = vld [vmem:[#allocation6 + $0x48] sm:$0xff]  }
 0x8ee   :  { %v925_v14 = vpop.f32.mrb[42].mxu1  ;;  %v6656_v12 = vld [vmem:[#allocation6 + $0x58] sm:$0xff]  }
 0x8ef   :  { %v3851_v21 = vmul.f32 -1.442695, %v928_v13  ;;  %5869 = vtanh.f32 %v928_v13  ;;  %v4712_v22 = vpop.f32.mrb[43].mxu1  ;;  %v6652_v13 = vld [vmem:[#allocation6 + $0x50] sm:$0xff]   ;;  %v6660_v14 = vld [vmem:[#allocation6 + $0x60] sm:$0xff]  }
 0x8f0   :  { %v6668_v22 = vld [vmem:[#allocation6 + $0x70] sm:$0xff]  }
 0x8f1   :  { %5871 = vpow2.f32 %v3851_v21  ;;  %v6664_v21 = vld [vmem:[#allocation6 + $0x68] sm:$0xff]  }
 0x8f9   :  { %v5870_v26 = vpop.eup %5869 }
 0x8fa   :  { %938 = vrot.lane.b32.xlu0 %v5870_v26, %s6147_s30  ;;  %v6672_v26 = vld [vmem:[#allocation6 + $0x78] sm:$0xff]  }
 0x8fb   :  { %v5872_v27 = vpop.eup %5871 }
 0x8fc   :  { %v932_v29 = vadd.f32 1.0, %v5872_v27  ;;  %v3855_v27 = vld [vmem:[%s7633_s4 + $0x8] sm:$0xff] }
 0x8fe   :  { %5873 = vrcp.f32 %v932_v29  ;;  %v1235_v29 = vpack.c.bf16 %v3855_v27, %v3855_v27 }
 0x908   :  { %v5874_v30 = vpop.eup %5873 }
 0x909   :  { %936 = vrot.lane.b32.xlu1 %v5874_v30, %s6146_s29 }
 0x90d   :  { %940 = vrot.lane.b32.xlu1 %v5874_v30, %s6145_s28 }
 0x96c   :  { %v939_v32 = vpop.permute.xlu0 %938 }
 0x96d   :  { %v943_v41 = vmul.f32 %v5874_v30, %v939_v32  ;;  %v6701_v30 = vld [vmem:[%s7632_s3 + $0x1] ss:$0 sm:$0xff] }
 0x96e   :  { %v473_v32 = vadd.f32 %v6701_v30, %v6392_v5 }
 0x97b   :  { %v937_v34 = vpop.permute.xlu1 %936 }
 0x97c   :  { %v942_v33 = vmul.f32 %v937_v34, %v842_v4 }
 0x97e   :  { %v6571_v36 = vadd.f32 %v943_v41, %v942_v33 }
 0x97f   :  { %v941_v40 = vpop.permute.xlu1 %940 }
 0x980   :  { %5875 = vtanh.f32 %v6571_v36 }
 0x98a   :  { %v5876_v38 = vpop.eup %5875 }
 0x98b   :  { %v946_v42 = vmul.f32 %v5876_v38, %v941_v40 }
 0x98d   :  { %v947_v31 = vpack.c.bf16 %v946_v42, %v946_v42 }
 0x98f   :  { %4730 = vmatmul.mubr.bf16.vlgmr.msra.gmra.mrb[8].mxu0 %v947_v31  ;;  %4750 = vmatmul.mubr.bf16.vlgmr.msra.gmra.mrb[44].mxu1 %v947_v31  ;;  %v6708_v31 = vld [vmem:[#allocation4 + $0x88] sm:$0xff]  }
 0x990   :  { %4754 = vmatpush3.bf16.msra.mxu0 %v6282_v23  ;;  %4774 = vmatpush3.bf16.msra.mxu1 %v6089_v43  ;;  %v6712_v43 = vld [vmem:[#allocation4 + $0x90] sm:$0xff]  }
 0x991   :  { %4755 = vmatprep.subr.bf16.mxu0 %v6143_v0  ;;  %4775 = vmatprep.subr.bf16.mxu1 %v6143_v0 }
 0x992   :  { %4769 = vmatprep.mubr.msk.bf16.mxu0 %vm6144_vm0, %v6143_v0  ;;  %4789 = vmatprep.mubr.msk.bf16.mxu1 %vm6144_vm0, %v6143_v0 }
 0x994   :  { %4756 = vmatpush3.bf16.msra.mxu0 %v6285_v24  ;;  %4776 = vmatpush3.bf16.msra.mxu1 %v6090_v44  ;;  %v6718_v44 = vld [vmem:[#allocation4 + $0x98] sm:$0xff]  }
 0x995   :  { %4757 = vmatprep.subr.bf16.mxu0 %v6143_v0  ;;  %4777 = vmatprep.subr.bf16.mxu1 %v6143_v0 }
 0x998   :  { %4758 = vmatpush3.bf16.msra.mxu0 %v6291_v25  ;;  %4778 = vmatpush3.bf16.msra.mxu1 %v6249_v15 }
 0x999   :  { %4759 = vmatprep.subr.bf16.mxu0 %v6143_v0  ;;  %4779 = vmatprep.subr.bf16.mxu1 %v6143_v0 }
 0x99c   :  { %4760 = vmatpush3.bf16.msra.mxu0 %v6317_v51  ;;  %4780 = vmatpush3.bf16.msra.mxu1 %v6253_v16 }
 0x99d   :  { %4761 = vmatprep.subr.bf16.mxu0 %v6143_v0  ;;  %4781 = vmatprep.subr.bf16.mxu1 %v6143_v0 }
 0x9a0   :  { %4762 = vmatpush3.bf16.msra.mxu0 %v6323_v52  ;;  %4782 = vmatpush3.bf16.msra.mxu1 %v6259_v17 }
 0x9a1   :  { %4763 = vmatprep.subr.bf16.mxu0 %v6143_v0  ;;  %4783 = vmatprep.subr.bf16.mxu1 %v6143_v0 }
 0x9a4   :  { %4764 = vmatpush3.bf16.msra.mxu0 %v6328_v53  ;;  %4784 = vmatpush3.bf16.msra.mxu1 %v6263_v18 }
 0x9a5   :  { %4765 = vmatprep.subr.bf16.mxu0 %v6143_v0  ;;  %4785 = vmatprep.subr.bf16.mxu1 %v6143_v0 }
 0x9a8   :  { %4766 = vmatpush3.bf16.msra.mxu0 %v6332_v54  ;;  %4786 = vmatpush3.bf16.msra.mxu1 %v6267_v19 }
 0x9a9   :  { %4767 = vmatprep.subr.bf16.mxu0 %v6143_v0  ;;  %4787 = vmatprep.subr.bf16.mxu1 %v6143_v0 }
 0x9ac   :  { %4768 = vmatpush3.bf16.msra.mxu0 %v6340_v56  ;;  %4788 = vmatpush3.bf16.msra.mxu1 %v6272_v20 }
 0x9ad   :  { %4793 = vmatprep.subr.bf16.mxu0 %v6143_v0  ;;  %4833 = vmatprep.subr.bf16.mxu1 %v6143_v0 }
 0xa62   :  { %v1024_v15 = vpop.f32.mrb[44].mxu1 }
 0xa63   :  { %v1030_v16 = vadd.f32 %v1024_v15, %v6309_v35  ;;  %v4751_v17 = vpop.f32.mrb[45].mxu1 }
 0xa64   :  { %v1027_v18 = vpop.f32.mrb[46].mxu1  ;;  %v6722_v17 = vld [vmem:[#allocation4 + $0xa0] sm:$0xff]  }
 0xa65   :  { %v3852_v46 = vmul.f32 -1.442695, %v1030_v16  ;;  %5877 = vtanh.f32 %v1030_v16  ;;  %v4752_v19 = vpop.f32.mrb[47].mxu1  ;;  %v6726_v18 = vld [vmem:[#allocation4 + $0xa8] sm:$0xff]  }
 0xa67   :  { %5879 = vpow2.f32 %v3852_v46  ;;  %v6730_v46 = vld [vmem:[#allocation4 + $0xb0] sm:$0xff]  }
 0xa6f   :  { %v5878_v47 = vpop.eup %5877 }
 0xa70   :  { %1040 = vrot.lane.b32.xlu1 %v5878_v47, %s6147_s30  ;;  %v6735_v47 = vld [vmem:[#allocation4 + $0xb8] sm:$0xff]  }
 0xa71   :  { %v5880_v48 = vpop.eup %5879 }
 0xa72   :  { %v1034_v49 = vadd.f32 1.0, %v5880_v48 }
 0xa74   :  { %5881 = vrcp.f32 %v1034_v49  ;;  %v3856_v49 = vld [vmem:[%s7634_s5 + $0x8] sm:$0xff] }
 0xa7e   :  { %v5882_v20 = vpop.eup %5881 }
 0xa7f   :  { %1038 = vrot.lane.b32.xlu0 %v5882_v20, %s6146_s29 }
 0xa83   :  { %1042 = vrot.lane.b32.xlu0 %v5882_v20, %s6145_s28 }
 0xae2   :  { %v1041_v50 = vpop.permute.xlu1 %1040 }
 0xae3   :  { %v1045_v35 = vmul.f32 %v5882_v20, %v1041_v50 }
 0xaf1   :  { %v1039_v55 = vpop.permute.xlu0 %1038 }
 0xaf2   :  { %v1044_v57 = vmul.f32 %v1039_v55, %v6571_v36  ;;  %v6705_v36 = vld [vmem:[#allocation4 + $0x80] sm:$0xff]  }
 0xaf4   :  { %v1046_v58 = vadd.f32 %v1045_v35, %v1044_v57 }
 0xaf5   :  { %v1043_v60 = vpop.permute.xlu0 %1042 }
 0xaf6   :  { %5883 = vtanh.f32 %v1046_v58 }
 0xb00   :  { %v5884_v59 = vpop.eup %5883 }
 0xb01   :  { %v1048_v61 = vmul.f32 %v5884_v59, %v1043_v60 }
 0xb03   :  { %v1049_v62 = vpack.c.bf16 %v1048_v61, %v1048_v61  ;;  %v575_v61 = vadd.f32 %v6701_v30, %v6438_v45 }
 0xb05   :  { %4770 = vmatmul.mubr.bf16.vlgmr.msra.gmra.mrb[12].mxu0 %v1049_v62  ;;  %4790 = vmatmul.mubr.bf16.vlgmr.msra.gmra.mrb[48].mxu1 %v1049_v62 }
 0xb06   :  { %4794 = vmatpush3.bf16.msra.mxu0 %v6282_v23  ;;  %4809 = vmatprep.mubr.msk.bf16.mxu0 %vm6144_vm0, %v6143_v0 }
 0xb07   :  { %4795 = vmatprep.subr.bf16.mxu0 %v6143_v0  ;;  %4849 = vmatprep.mubr.msk.bf16.mxu1 %vm6144_vm0, %v6143_v0 }
 0xb08   :  { %4834 = vmatpush3.bf16.msra.mxu1 %v6705_v36 }
 0xb09   :  { %4835 = vmatprep.subr.bf16.mxu1 %v6143_v0 }
 0xb0a   :  { %4796 = vmatpush3.bf16.msra.mxu0 %v6285_v24 }
 0xb0b   :  { %4797 = vmatprep.subr.bf16.mxu0 %v6143_v0 }
 0xb0c   :  { %4836 = vmatpush3.bf16.msra.mxu1 %v6708_v31 }
 0xb0d   :  { %4837 = vmatprep.subr.bf16.mxu1 %v6143_v0 }
 0xb0e   :  { %4798 = vmatpush3.bf16.msra.mxu0 %v6291_v25 }
 0xb0f   :  { %4799 = vmatprep.subr.bf16.mxu0 %v6143_v0 }
 0xb10   :  { %4838 = vmatpush3.bf16.msra.mxu1 %v6712_v43 }
 0xb11   :  { %4839 = vmatprep.subr.bf16.mxu1 %v6143_v0 }
 0xb12   :  { %4800 = vmatpush3.bf16.msra.mxu0 %v6317_v51 }
 0xb13   :  { %4801 = vmatprep.subr.bf16.mxu0 %v6143_v0 }
 0xb14   :  { %4840 = vmatpush3.bf16.msra.mxu1 %v6718_v44 }
 0xb15   :  { %4841 = vmatprep.subr.bf16.mxu1 %v6143_v0 }
 0xb16   :  { %4802 = vmatpush3.bf16.msra.mxu0 %v6323_v52 }
 0xb17   :  { %4803 = vmatprep.subr.bf16.mxu0 %v6143_v0 }
 0xb18   :  { %4842 = vmatpush3.bf16.msra.mxu1 %v6722_v17 }
 0xb19   :  { %4843 = vmatprep.subr.bf16.mxu1 %v6143_v0 }
 0xb1a   :  { %4804 = vmatpush3.bf16.msra.mxu0 %v6328_v53 }
 0xb1b   :  { %4805 = vmatprep.subr.bf16.mxu0 %v6143_v0 }
 0xb1c   :  { %4844 = vmatpush3.bf16.msra.mxu1 %v6726_v18 }
 0xb1d   :  { %4845 = vmatprep.subr.bf16.mxu1 %v6143_v0 }
 0xb1e   :  { %4806 = vmatpush3.bf16.msra.mxu0 %v6332_v54 }
 0xb1f   :  { %4807 = vmatprep.subr.bf16.mxu0 %v6143_v0 }
 0xb20   :  { %4846 = vmatpush3.bf16.msra.mxu1 %v6730_v46 }
 0xb21   :  { %4847 = vmatprep.subr.bf16.mxu1 %v6143_v0 }
 0xb22   :  { %4808 = vmatpush3.bf16.msra.mxu0 %v6340_v56 }
 0xb23   :  { %4813 = vmatprep.subr.bf16.mxu0 %v6143_v0 }
 0xb24   :  { %4848 = vmatpush3.bf16.msra.mxu1 %v6735_v47 }
 0xb25   :  { %4873 = vmatprep.subr.bf16.mxu1 %v6143_v0 }
 0xbd8   :  { %v1126_v23 = vpop.f32.mrb[48].mxu1 }
 0xbd9   :  { %v1132_v24 = vadd.f32 %v1126_v23, %v6313_v39  ;;  %v4791_v25 = vpop.f32.mrb[49].mxu1 }
 0xbda   :  { %v1129_v51 = vpop.f32.mrb[50].mxu1 }
 0xbdb   :  { %v3853_v52 = vmul.f32 -1.442695, %v1132_v24  ;;  %5885 = vtanh.f32 %v1132_v24  ;;  %v4792_v63 = vpop.f32.mrb[51].mxu1 }
 0xbdd   :  { %5887 = vpow2.f32 %v3853_v52 }
 0xbe5   :  { %v5886_v53 = vpop.eup %5885 }
 0xbe6   :  { %1142 = vrot.lane.b32.xlu0 %v5886_v53, %s6147_s30 }
 0xbe7   :  { %v5888_v1 = vpop.eup %5887 }
 0xbe8   :  { %v1136_v54 = vadd.f32 1.0, %v5888_v1 }
 0xbea   :  { %5889 = vrcp.f32 %v1136_v54 }
 0xbf4   :  { %v5890_v2 = vpop.eup %5889 }
 0xbf5   :  { %1140 = vrot.lane.b32.xlu1 %v5890_v2, %s6146_s29 }
 0xbf9   :  { %1144 = vrot.lane.b32.xlu1 %v5890_v2, %s6145_s28 }
 0xc58   :  { %v1143_v56 = vpop.permute.xlu0 %1142 }
 0xc59   :  { %v1147_v39 = vmul.f32 %v5890_v2, %v1143_v56 }
 0xc67   :  { %v1141_v28 = vpop.permute.xlu1 %1140 }
 0xc68   :  { %v1146_v37 = vmul.f32 %v1141_v28, %v1046_v58 }
 0xc6a   :  { %v1148_v3 = vadd.f32 %v1147_v39, %v1146_v37 }
 0xc6b   :  { %v1145_v6 = vpop.permute.xlu1 %1144 }
 0xc6c   :  { %5891 = vtanh.f32 %v1148_v3  ;;  %1194 = vst [vmem:[%s7639_s10] sm:$0xff] %v1148_v3 }
 0xc76   :  { %v5892_v4 = vpop.eup %5891 }
 0xc77   :  { %v1150_v7 = vmul.f32 %v5892_v4, %v1145_v6 }
 0xc79   :  { %v1151_v9 = vpack.c.bf16 %v1150_v7, %v1150_v7  ;;  %1193 = vst [vmem:[%s7638_s9] sm:$0xff] %v1150_v7  ;;  %v677_v7 = vadd.f32 %v6701_v30, %v6484_v10 }
 0xc7b   :  { %4810 = vmatmul.mubr.bf16.vlgmr.msra.gmra.mrb[16].mxu0 %v1151_v9 }
 0xc7c   :  { %4814 = vmatpush3.bf16.msra.mxu0 %v6640_v8  ;;  %4829 = vmatprep.mubr.msk.bf16.mxu0 %vm6144_vm0, %v6143_v0 }
 0xc7d   :  { %4815 = vmatprep.subr.bf16.mxu0 %v6143_v0 }
 0xc80   :  { %4816 = vmatpush3.bf16.msra.mxu0 %v6646_v11 }
 0xc81   :  { %4817 = vmatprep.subr.bf16.mxu0 %v6143_v0 }
 0xc84   :  { %4818 = vmatpush3.bf16.msra.mxu0 %v6652_v13 }
 0xc85   :  { %4819 = vmatprep.subr.bf16.mxu0 %v6143_v0 }
 0xc88   :  { %4820 = vmatpush3.bf16.msra.mxu0 %v6656_v12 }
 0xc89   :  { %4821 = vmatprep.subr.bf16.mxu0 %v6143_v0 }
 0xc8c   :  { %4822 = vmatpush3.bf16.msra.mxu0 %v6660_v14 }
 0xc8d   :  { %4823 = vmatprep.subr.bf16.mxu0 %v6143_v0 }
 0xc90   :  { %4824 = vmatpush3.bf16.msra.mxu0 %v6664_v21 }
 0xc91   :  { %4825 = vmatprep.subr.bf16.mxu0 %v6143_v0 }
 0xc94   :  { %4826 = vmatpush3.bf16.msra.mxu0 %v6668_v22 }
 0xc95   :  { %4827 = vmatprep.subr.bf16.mxu0 %v6143_v0 }
 0xc98   :  { %4828 = vmatpush3.bf16.msra.mxu0 %v6672_v26 }
 0xc99   :  { %4853 = vmatprep.subr.bf16.mxu0 %v6143_v0 }
 0xc9b   :  { %4830 = vmatmul.mubr.bf16.vlgmr.msra.gmra.mrb[20].mxu0 %v1235_v29 }
 0xc9c   :  { %4854 = vmatpush3.bf16.msra.mxu0 %v6640_v8  ;;  %4869 = vmatprep.mubr.msk.bf16.mxu0 %vm6144_vm0, %v6143_v0 }
 0xc9d   :  { %4855 = vmatprep.subr.bf16.mxu0 %v6143_v0 }
 0xca0   :  { %4856 = vmatpush3.bf16.msra.mxu0 %v6646_v11 }
 0xca1   :  { %4857 = vmatprep.subr.bf16.mxu0 %v6143_v0 }
 0xca4   :  { %4858 = vmatpush3.bf16.msra.mxu0 %v6652_v13 }
 0xca5   :  { %4859 = vmatprep.subr.bf16.mxu0 %v6143_v0 }
 0xca8   :  { %4860 = vmatpush3.bf16.msra.mxu0 %v6656_v12 }
 0xca9   :  { %4861 = vmatprep.subr.bf16.mxu0 %v6143_v0 }
 0xcac   :  { %4862 = vmatpush3.bf16.msra.mxu0 %v6660_v14 }
 0xcad   :  { %4863 = vmatprep.subr.bf16.mxu0 %v6143_v0 }
 0xcb0   :  { %4864 = vmatpush3.bf16.msra.mxu0 %v6664_v21 }
 0xcb1   :  { %4865 = vmatprep.subr.bf16.mxu0 %v6143_v0 }
 0xcb4   :  { %4866 = vmatpush3.bf16.msra.mxu0 %v6668_v22 }
 0xcb5   :  { %4867 = vmatprep.subr.bf16.mxu0 %v6143_v0 }
 0xcb8   :  { %4868 = vmatpush3.bf16.msra.mxu0 %v6672_v26 }
 0xcb9   :  { %4893 = vmatprep.subr.bf16.mxu0 %v6143_v0 }
 0xd6e   :  { %v1319_v34 = vpop.f32.mrb[20].mxu0 }
 0xd6f   :  { %v1325_v41 = vadd.f32 %v1319_v34, %v473_v32  ;;  %v4831_v33 = vpop.f32.mrb[21].mxu0 }
 0xd70   :  { %v1322_v38 = vpop.f32.mrb[22].mxu0 }
 0xd71   :  { %v3865_v40 = vmul.f32 -1.442695, %v1325_v41  ;;  %5893 = vtanh.f32 %v1325_v41  ;;  %v4832_v42 = vpop.f32.mrb[23].mxu0 }
 0xd73   :  { %5895 = vpow2.f32 %v3865_v40 }
 0xd7b   :  { %v5894_v5 = vpop.eup %5893 }
 0xd7c   :  { %1335 = vrot.lane.b32.xlu1 %v5894_v5, %s6147_s30 }
 0xd7d   :  { %v5896_v15 = vpop.eup %5895 }
 0xd7e   :  { %v1329_v16 = vadd.f32 1.0, %v5896_v15 }
 0xd80   :  { %5897 = vrcp.f32 %v1329_v16 }
 0xd8a   :  { %v5898_v19 = vpop.eup %5897 }
 0xd8b   :  { %1333 = vrot.lane.b32.xlu0 %v5898_v19, %s6146_s29 }
 0xd8f   :  { %1337 = vrot.lane.b32.xlu0 %v5898_v19, %s6145_s28 }
 0xdee   :  { %v1336_v48 = vpop.permute.xlu1 %1335 }
 0xdef   :  { %v1340_v50 = vmul.f32 %v5898_v19, %v1336_v48 }
 0xdfd   :  { %v1334_v20 = vpop.permute.xlu0 %1333 }
 0xdfe   :  { %v1339_v55 = vmul.f32 %v3856_v49, %v1334_v20 }
 0xe00   :  { %v1341_v35 = vadd.f32 %v1340_v50, %v1339_v55 }
 0xe01   :  { %v1338_v58 = vpop.permute.xlu0 %1337 }
 0xe02   :  { %5899 = vtanh.f32 %v1341_v35 }
 0xe0c   :  { %v5900_v57 = vpop.eup %5899 }
 0xe0d   :  { %v1343_v59 = vmul.f32 %v5900_v57, %v1338_v58 }
 0xe0f   :  { %v1344_v60 = vpack.c.bf16 %v1343_v59, %v1343_v59 }
 0xe11   :  { %4850 = vmatmul.mubr.bf16.vlgmr.msra.gmra.mrb[52].mxu1 %v1344_v60  ;;  %4870 = vmatmul.mubr.bf16.vlgmr.msra.gmra.mrb[24].mxu0 %v1344_v60 }
 0xe12   :  { %4874 = vmatpush3.bf16.msra.mxu1 %v6705_v36  ;;  %4894 = vmatpush3.bf16.msra.mxu0 %v6640_v8 }
 0xe13   :  { %4875 = vmatprep.subr.bf16.mxu1 %v6143_v0  ;;  %4895 = vmatprep.subr.bf16.mxu0 %v6143_v0 }
 0xe14   :  { %4889 = vmatprep.mubr.msk.bf16.mxu1 %vm6144_vm0, %v6143_v0  ;;  %4909 = vmatprep.mubr.msk.bf16.mxu0 %vm6144_vm0, %v6143_v0 }
 0xe16   :  { %4876 = vmatpush3.bf16.msra.mxu1 %v6708_v31  ;;  %4896 = vmatpush3.bf16.msra.mxu0 %v6646_v11 }
 0xe17   :  { %4877 = vmatprep.subr.bf16.mxu1 %v6143_v0  ;;  %4897 = vmatprep.subr.bf16.mxu0 %v6143_v0 }
 0xe1a   :  { %4878 = vmatpush3.bf16.msra.mxu1 %v6712_v43  ;;  %4898 = vmatpush3.bf16.msra.mxu0 %v6652_v13 }
 0xe1b   :  { %4879 = vmatprep.subr.bf16.mxu1 %v6143_v0  ;;  %4899 = vmatprep.subr.bf16.mxu0 %v6143_v0 }
 0xe1e   :  { %4880 = vmatpush3.bf16.msra.mxu1 %v6718_v44  ;;  %4900 = vmatpush3.bf16.msra.mxu0 %v6656_v12 }
 0xe1f   :  { %4881 = vmatprep.subr.bf16.mxu1 %v6143_v0  ;;  %4901 = vmatprep.subr.bf16.mxu0 %v6143_v0 }
 0xe22   :  { %4882 = vmatpush3.bf16.msra.mxu1 %v6722_v17  ;;  %4902 = vmatpush3.bf16.msra.mxu0 %v6660_v14 }
 0xe23   :  { %4883 = vmatprep.subr.bf16.mxu1 %v6143_v0  ;;  %4903 = vmatprep.subr.bf16.mxu0 %v6143_v0 }
 0xe26   :  { %4884 = vmatpush3.bf16.msra.mxu1 %v6726_v18  ;;  %4904 = vmatpush3.bf16.msra.mxu0 %v6664_v21 }
 0xe27   :  { %4885 = vmatprep.subr.bf16.mxu1 %v6143_v0  ;;  %4905 = vmatprep.subr.bf16.mxu0 %v6143_v0 }
 0xe2a   :  { %4886 = vmatpush3.bf16.msra.mxu1 %v6730_v46  ;;  %4906 = vmatpush3.bf16.msra.mxu0 %v6668_v22 }
 0xe2b   :  { %4887 = vmatprep.subr.bf16.mxu1 %v6143_v0  ;;  %4907 = vmatprep.subr.bf16.mxu0 %v6143_v0 }
 0xe2e   :  { %4888 = vmatpush3.bf16.msra.mxu1 %v6735_v47  ;;  %4908 = vmatpush3.bf16.msra.mxu0 %v6672_v26 }
 0xe2f   :  { %4913 = vmatprep.subr.bf16.mxu1 %v6143_v0  ;;  %4933 = vmatprep.subr.bf16.mxu0 %v6143_v0 }
 0xee4   :  { %v1475_v62 = vpop.f32.mrb[24].mxu0 }
 0xee5   :  { %v1481_v23 = vadd.f32 %v1475_v62, %v575_v61  ;;  %v4871_v24 = vpop.f32.mrb[25].mxu0 }
 0xee6   :  { %v1478_v25 = vpop.f32.mrb[26].mxu0 }
 0xee7   :  { %v3875_v51 = vmul.f32 -1.442695, %v1481_v23  ;;  %5901 = vtanh.f32 %v1481_v23  ;;  %v4872_v52 = vpop.f32.mrb[27].mxu0 }
 0xee9   :  { %5903 = vpow2.f32 %v3875_v51 }
 0xef1   :  { %v5902_v63 = vpop.eup %5901 }
 0xef2   :  { %1491 = vrot.lane.b32.xlu0 %v5902_v63, %s6147_s30 }
 0xef3   :  { %v5904_v53 = vpop.eup %5903 }
 0xef4   :  { %v1485_v1 = vadd.f32 1.0, %v5904_v53 }
 0xef6   :  { %5905 = vrcp.f32 %v1485_v1 }
 0xf00   :  { %v5906_v54 = vpop.eup %5905 }
 0xf01   :  { %1489 = vrot.lane.b32.xlu1 %v5906_v54, %s6146_s29 }
 0xf05   :  { %1493 = vrot.lane.b32.xlu1 %v5906_v54, %s6145_s28 }
 0xf64   :  { %v1492_v45 = vpop.permute.xlu0 %1491 }
 0xf65   :  { %v1496_v56 = vmul.f32 %v5906_v54, %v1492_v45 }
 0xf73   :  { %v1490_v2 = vpop.permute.xlu1 %1489 }
 0xf74   :  { %v1495_v28 = vmul.f32 %v1490_v2, %v1341_v35 }
 0xf76   :  { %v1497_v39 = vadd.f32 %v1496_v56, %v1495_v28 }
 0xf77   :  { %v1494_v3 = vpop.permute.xlu1 %1493 }
 0xf78   :  { %5907 = vtanh.f32 %v1497_v39 }
 0xf82   :  { %v5908_v37 = vpop.eup %5907 }
 0xf83   :  { %v1499_v4 = vmul.f32 %v5908_v37, %v1494_v3 }
 0xf85   :  { %v1500_v6 = vpack.c.bf16 %v1499_v4, %v1499_v4 }
 0xf87   :  { %4890 = vmatmul.mubr.bf16.vlgmr.msra.gmra.mrb[56].mxu1 %v1500_v6  ;;  %4910 = vmatmul.mubr.bf16.vlgmr.msra.gmra.mrb[28].mxu0 %v1500_v6 }
 0xf88   :  { %4914 = vmatpush3.bf16.msra.mxu1 %v6705_v36  ;;  %4934 = vmatpush3.bf16.msra.mxu0 %v6640_v8 }
 0xf89   :  { %4915 = vmatprep.subr.bf16.mxu1 %v6143_v0  ;;  %4935 = vmatprep.subr.bf16.mxu0 %v6143_v0 }
 0xf8a   :  { %4929 = vmatprep.mubr.msk.bf16.mxu1 %vm6144_vm0, %v6143_v0  ;;  %4949 = vmatprep.mubr.msk.bf16.mxu0 %vm6144_vm0, %v6143_v0 }
 0xf8c   :  { %4916 = vmatpush3.bf16.msra.mxu1 %v6708_v31  ;;  %4936 = vmatpush3.bf16.msra.mxu0 %v6646_v11 }
 0xf8d   :  { %4917 = vmatprep.subr.bf16.mxu1 %v6143_v0  ;;  %4937 = vmatprep.subr.bf16.mxu0 %v6143_v0 }
 0xf90   :  { %4918 = vmatpush3.bf16.msra.mxu1 %v6712_v43  ;;  %4938 = vmatpush3.bf16.msra.mxu0 %v6652_v13 }
 0xf91   :  { %4919 = vmatprep.subr.bf16.mxu1 %v6143_v0  ;;  %4939 = vmatprep.subr.bf16.mxu0 %v6143_v0 }
 0xf94   :  { %4920 = vmatpush3.bf16.msra.mxu1 %v6718_v44  ;;  %4940 = vmatpush3.bf16.msra.mxu0 %v6656_v12 }
 0xf95   :  { %4921 = vmatprep.subr.bf16.mxu1 %v6143_v0  ;;  %4941 = vmatprep.subr.bf16.mxu0 %v6143_v0 }
 0xf98   :  { %4922 = vmatpush3.bf16.msra.mxu1 %v6722_v17  ;;  %4942 = vmatpush3.bf16.msra.mxu0 %v6660_v14 }
 0xf99   :  { %4923 = vmatprep.subr.bf16.mxu1 %v6143_v0  ;;  %4943 = vmatprep.subr.bf16.mxu0 %v6143_v0 }
 0xf9c   :  { %4924 = vmatpush3.bf16.msra.mxu1 %v6726_v18  ;;  %4944 = vmatpush3.bf16.msra.mxu0 %v6664_v21 }
 0xf9d   :  { %4925 = vmatprep.subr.bf16.mxu1 %v6143_v0  ;;  %4945 = vmatprep.subr.bf16.mxu0 %v6143_v0 }
 0xfa0   :  { %4926 = vmatpush3.bf16.msra.mxu1 %v6730_v46  ;;  %4946 = vmatpush3.bf16.msra.mxu0 %v6668_v22 }
 0xfa1   :  { %4927 = vmatprep.subr.bf16.mxu1 %v6143_v0  ;;  %4947 = vmatprep.subr.bf16.mxu0 %v6143_v0 }
 0xfa4   :  { %4928 = vmatpush3.bf16.msra.mxu1 %v6735_v47  ;;  %4948 = vmatpush3.bf16.msra.mxu0 %v6672_v26 }
 0xfa5   :  { %4953 = vmatprep.subr.bf16.mxu1 %v6143_v0  ;;  %4973 = vmatprep.subr.bf16.mxu0 %v6143_v0 }
0x105a   :  { %v1577_v9 = vpop.f32.mrb[28].mxu0 }
0x105b   :  { %v1583_v27 = vadd.f32 %v1577_v9, %v677_v7  ;;  %v4911_v29 = vpop.f32.mrb[29].mxu0 }
0x105c   :  { %v1580_v32 = vpop.f32.mrb[30].mxu0 }
0x105d   :  { %v3876_v34 = vmul.f32 -1.442695, %v1583_v27  ;;  %5909 = vtanh.f32 %v1583_v27  ;;  %v4912_v41 = vpop.f32.mrb[31].mxu0 }
0x105f   :  { %5911 = vpow2.f32 %v3876_v34 }
0x1067   :  { %v5910_v33 = vpop.eup %5909 }
0x1068   :  { %1593 = vrot.lane.b32.xlu1 %v5910_v33, %s6147_s30 }
0x1069   :  { %v5912_v38 = vpop.eup %5911 }
0x106a   :  { %v1587_v40 = vadd.f32 1.0, %v5912_v38 }
0x106c   :  { %5913 = vrcp.f32 %v1587_v40 }
0x1076   :  { %v5914_v42 = vpop.eup %5913 }
0x1077   :  { %1591 = vrot.lane.b32.xlu0 %v5914_v42, %s6146_s29 }
0x107b   :  { %1595 = vrot.lane.b32.xlu0 %v5914_v42, %s6145_s28 }
0x10da   :  { %v1594_v10 = vpop.permute.xlu1 %1593 }
0x10db   :  { %v1598_v15 = vmul.f32 %v5914_v42, %v1594_v10 }
0x10e9   :  { %v1592_v5 = vpop.permute.xlu0 %1591 }
0x10ea   :  { %v1597_v16 = vmul.f32 %v1592_v5, %v1497_v39 }
0x10ec   :  { %v1599_v19 = vadd.f32 %v1598_v15, %v1597_v16 }
0x10ed   :  { %v1596_v49 = vpop.permute.xlu0 %1595 }
0x10ee   :  { %5915 = vtanh.f32 %v1599_v19 }
0x10f8   :  { %v5916_v48 = vpop.eup %5915 }
0x10f9   :  { %v1601_v20 = vmul.f32 %v5916_v48, %v1596_v49 }
0x10fb   :  { %v1602_v50 = vpack.c.bf16 %v1601_v20, %v1601_v20 }
0x10fd   :  { %4930 = vmatmul.mubr.bf16.vlgmr.msra.gmra.mrb[60].mxu1 %v1602_v50  ;;  %4950 = vmatmul.mubr.bf16.vlgmr.msra.gmra.mrb[0].mxu0 %v1602_v50 }
0x10fe   :  { %4954 = vmatpush3.bf16.msra.mxu1 %v6705_v36  ;;  %4974 = vmatpush3.bf16.msra.mxu0 %v6640_v8 }
0x10ff   :  { %4955 = vmatprep.subr.bf16.mxu1 %v6143_v0  ;;  %4975 = vmatprep.subr.bf16.mxu0 %v6143_v0 }
0x1100   :  { %4969 = vmatprep.mubr.msk.bf16.mxu1 %vm6144_vm0, %v6143_v0  ;;  %4989 = vmatprep.mubr.msk.bf16.mxu0 %vm6144_vm0, %v6143_v0 }
0x1102   :  { %4956 = vmatpush3.bf16.msra.mxu1 %v6708_v31  ;;  %4976 = vmatpush3.bf16.msra.mxu0 %v6646_v11 }
0x1103   :  { %4957 = vmatprep.subr.bf16.mxu1 %v6143_v0  ;;  %4977 = vmatprep.subr.bf16.mxu0 %v6143_v0 }
0x1106   :  { %4958 = vmatpush3.bf16.msra.mxu1 %v6712_v43  ;;  %4978 = vmatpush3.bf16.msra.mxu0 %v6652_v13 }
0x1107   :  { %4959 = vmatprep.subr.bf16.mxu1 %v6143_v0  ;;  %4979 = vmatprep.subr.bf16.mxu0 %v6143_v0 }
0x110a   :  { %4960 = vmatpush3.bf16.msra.mxu1 %v6718_v44  ;;  %4980 = vmatpush3.bf16.msra.mxu0 %v6656_v12 }
0x110b   :  { %4961 = vmatprep.subr.bf16.mxu1 %v6143_v0  ;;  %4981 = vmatprep.subr.bf16.mxu0 %v6143_v0 }
0x110e   :  { %4962 = vmatpush3.bf16.msra.mxu1 %v6722_v17  ;;  %4982 = vmatpush3.bf16.msra.mxu0 %v6660_v14 }
0x110f   :  { %4963 = vmatprep.subr.bf16.mxu1 %v6143_v0  ;;  %4983 = vmatprep.subr.bf16.mxu0 %v6143_v0 }
0x1112   :  { %4964 = vmatpush3.bf16.msra.mxu1 %v6726_v18  ;;  %4984 = vmatpush3.bf16.msra.mxu0 %v6664_v21 }
0x1113   :  { %4965 = vmatprep.subr.bf16.mxu1 %v6143_v0  ;;  %4985 = vmatprep.subr.bf16.mxu0 %v6143_v0 }
0x1116   :  { %4966 = vmatpush3.bf16.msra.mxu1 %v6730_v46  ;;  %4986 = vmatpush3.bf16.msra.mxu0 %v6668_v22 }
0x1117   :  { %4967 = vmatprep.subr.bf16.mxu1 %v6143_v0  ;;  %4987 = vmatprep.subr.bf16.mxu0 %v6143_v0 }
0x111a   :  { %4968 = vmatpush3.bf16.msra.mxu1 %v6735_v47  ;;  %4988 = vmatpush3.bf16.msra.mxu0 %v6672_v26 }
0x111b   :  { %4993 = vmatprep.subr.bf16.mxu1 %v6143_v0  ;;  %5013 = vmatprep.subr.bf16.mxu0 %v6143_v0 }
0x11d0   :  { %v1679_v55 = vpop.f32.mrb[0].mxu0 }
0x11d1   :  { %v5639_v35 = vadd.f32 %v6701_v30, %v1679_v55  ;;  %v4951_v57 = vpop.f32.mrb[1].mxu0 }
0x11d2   :  { %v1682_v58 = vpop.f32.mrb[2].mxu0 }
0x11d3   :  { %v3877_v59 = vmul.f32 -1.442695, %v5639_v35  ;;  %5917 = vtanh.f32 %v5639_v35  ;;  %v4952_v60 = vpop.f32.mrb[3].mxu0 }
0x11d5   :  { %5919 = vpow2.f32 %v3877_v59 }
0x11dd   :  { %v5918_v61 = vpop.eup %5917 }
0x11de   :  { %1695 = vrot.lane.b32.xlu0 %v5918_v61, %s6147_s30 }
0x11df   :  { %v5920_v62 = vpop.eup %5919 }
0x11e0   :  { %v1689_v23 = vadd.f32 1.0, %v5920_v62 }
0x11e2   :  { %5921 = vrcp.f32 %v1689_v23 }
0x11ec   :  { %v5922_v24 = vpop.eup %5921 }
0x11ed   :  { %1693 = vrot.lane.b32.xlu1 %v5922_v24, %s6146_s29 }
0x11f1   :  { %1697 = vrot.lane.b32.xlu1 %v5922_v24, %s6145_s28 }
0x1250   :  { %v1696_v25 = vpop.permute.xlu0 %1695 }
0x1251   :  { %v1700_v52 = vmul.f32 %v5922_v24, %v1696_v25 }
0x125f   :  { %v1694_v51 = vpop.permute.xlu1 %1693 }
0x1260   :  { %v1699_v63 = vmul.f32 %v1694_v51, %v1599_v19 }
0x1262   :  { %v1701_v53 = vadd.f32 %v1700_v52, %v1699_v63 }
0x1263   :  { %v1698_v54 = vpop.permute.xlu1 %1697 }
0x1264   :  { %5923 = vtanh.f32 %v1701_v53 }
0x126e   :  { %v5924_v1 = vpop.eup %5923 }
0x126f   :  { %v1703_v45 = vmul.f32 %v5924_v1, %v1698_v54 }
0x1271   :  { %v1704_v2 = vpack.c.bf16 %v1703_v45, %v1703_v45 }
0x1273   :  { %4970 = vmatmul.mubr.bf16.vlgmr.msra.gmra.mrb[64].mxu1 %v1704_v2  ;;  %4990 = vmatmul.mubr.bf16.vlgmr.msra.gmra.mrb[4].mxu0 %v1704_v2 }
0x1274   :  { %4994 = vmatpush3.bf16.msra.mxu1 %v6705_v36  ;;  %5014 = vmatpush3.bf16.msra.mxu0 %v6640_v8 }
0x1275   :  { %4995 = vmatprep.subr.bf16.mxu1 %v6143_v0  ;;  %5015 = vmatprep.subr.bf16.mxu0 %v6143_v0 }
0x1276   :  { %5009 = vmatprep.mubr.msk.bf16.mxu1 %vm6144_vm0, %v6143_v0  ;;  %5029 = vmatprep.mubr.msk.bf16.mxu0 %vm6144_vm0, %v6143_v0 }
0x1278   :  { %4996 = vmatpush3.bf16.msra.mxu1 %v6708_v31  ;;  %5016 = vmatpush3.bf16.msra.mxu0 %v6646_v11 }
0x1279   :  { %4997 = vmatprep.subr.bf16.mxu1 %v6143_v0  ;;  %5017 = vmatprep.subr.bf16.mxu0 %v6143_v0 }
0x127c   :  { %4998 = vmatpush3.bf16.msra.mxu1 %v6712_v43  ;;  %5018 = vmatpush3.bf16.msra.mxu0 %v6652_v13 }
0x127d   :  { %4999 = vmatprep.subr.bf16.mxu1 %v6143_v0  ;;  %5019 = vmatprep.subr.bf16.mxu0 %v6143_v0 }
0x1280   :  { %5000 = vmatpush3.bf16.msra.mxu1 %v6718_v44  ;;  %5020 = vmatpush3.bf16.msra.mxu0 %v6656_v12 }
0x1281   :  { %5001 = vmatprep.subr.bf16.mxu1 %v6143_v0  ;;  %5021 = vmatprep.subr.bf16.mxu0 %v6143_v0 }
0x1284   :  { %5002 = vmatpush3.bf16.msra.mxu1 %v6722_v17  ;;  %5022 = vmatpush3.bf16.msra.mxu0 %v6660_v14 }
0x1285   :  { %5003 = vmatprep.subr.bf16.mxu1 %v6143_v0  ;;  %5023 = vmatprep.subr.bf16.mxu0 %v6143_v0 }
0x1288   :  { %5004 = vmatpush3.bf16.msra.mxu1 %v6726_v18  ;;  %5024 = vmatpush3.bf16.msra.mxu0 %v6664_v21 }
0x1289   :  { %5005 = vmatprep.subr.bf16.mxu1 %v6143_v0  ;;  %5025 = vmatprep.subr.bf16.mxu0 %v6143_v0 }
0x128c   :  { %5006 = vmatpush3.bf16.msra.mxu1 %v6730_v46  ;;  %5026 = vmatpush3.bf16.msra.mxu0 %v6668_v22 }
0x128d   :  { %5007 = vmatprep.subr.bf16.mxu1 %v6143_v0  ;;  %5027 = vmatprep.subr.bf16.mxu0 %v6143_v0 }
0x1290   :  { %5008 = vmatpush3.bf16.msra.mxu1 %v6735_v47  ;;  %5028 = vmatpush3.bf16.msra.mxu0 %v6672_v26 }
0x1291   :  { %5033 = vmatprep.subr.bf16.mxu1 %v6143_v0  ;;  %5053 = vmatprep.subr.bf16.mxu0 %v6143_v0 }
0x1346   :  { %v1781_v56 = vpop.f32.mrb[4].mxu0 }
0x1347   :  { %v5640_v28 = vadd.f32 %v6701_v30, %v1781_v56  ;;  %v4991_v39 = vpop.f32.mrb[5].mxu0 }
0x1348   :  { %v1784_v37 = vpop.f32.mrb[6].mxu0 }
0x1349   :  { %v3878_v3 = vmul.f32 -1.442695, %v5640_v28  ;;  %5925 = vtanh.f32 %v5640_v28  ;;  %v4992_v4 = vpop.f32.mrb[7].mxu0 }
0x134b   :  { %5927 = vpow2.f32 %v3878_v3 }
0x1353   :  { %v5926_v6 = vpop.eup %5925 }
0x1354   :  { %1797 = vrot.lane.b32.xlu1 %v5926_v6, %s6147_s30 }
0x1355   :  { %v5928_v7 = vpop.eup %5927 }
0x1356   :  { %v1791_v9 = vadd.f32 1.0, %v5928_v7 }
0x1358   :  { %5929 = vrcp.f32 %v1791_v9 }
0x1362   :  { %v5930_v27 = vpop.eup %5929 }
0x1363   :  { %1795 = vrot.lane.b32.xlu0 %v5930_v27, %s6146_s29 }
0x1367   :  { %1799 = vrot.lane.b32.xlu0 %v5930_v27, %s6145_s28 }
0x13c6   :  { %v1798_v29 = vpop.permute.xlu1 %1797 }
0x13c7   :  { %v1802_v34 = vmul.f32 %v5930_v27, %v1798_v29 }
0x13d5   :  { %v1796_v32 = vpop.permute.xlu0 %1795 }
0x13d6   :  { %v1801_v41 = vmul.f32 %v1796_v32, %v1701_v53 }
0x13d8   :  { %v1803_v33 = vadd.f32 %v1802_v34, %v1801_v41  ;;  %v7012_v34 = vld [vmem:[#allocation6 + $0x80] sm:$0xff]  }
0x13d9   :  { %v1800_v40 = vpop.permute.xlu0 %1799 }
0x13da   :  { %5931 = vtanh.f32 %v1803_v33 }
0x13e4   :  { %v5932_v38 = vpop.eup %5931 }
0x13e5   :  { %v1805_v42 = vmul.f32 %v5932_v38, %v1800_v40  ;;  %v7024_v38 = vld [vmem:[#allocation6 + $0x90] sm:$0xff]   ;;  %v7028_v40 = vld [vmem:[#allocation6 + $0x98] sm:$0xff]  }
0x13e7   :  { %v1806_v10 = vpack.c.bf16 %v1805_v42, %v1805_v42  ;;  %v7032_v42 = vld [vmem:[#allocation6 + $0xa0] sm:$0xff]  }
0x13e9   :  { %5010 = vmatmul.mubr.bf16.vlgmr.msra.gmra.mrb[68].mxu1 %v1806_v10  ;;  %5030 = vmatmul.mubr.bf16.vlgmr.msra.gmra.mrb[8].mxu0 %v1806_v10  ;;  %v7036_v10 = vld [vmem:[#allocation6 + $0xa8] sm:$0xff]  }
0x13ea   :  { %5034 = vmatpush3.bf16.msra.mxu1 %v6705_v36  ;;  %5054 = vmatpush3.bf16.msra.mxu0 %v6640_v8 }
0x13eb   :  { %5035 = vmatprep.subr.bf16.mxu1 %v6143_v0  ;;  %5055 = vmatprep.subr.bf16.mxu0 %v6143_v0 }
0x13ec   :  { %5049 = vmatprep.mubr.msk.bf16.mxu1 %vm6144_vm0, %v6143_v0  ;;  %5069 = vmatprep.mubr.msk.bf16.mxu0 %vm6144_vm0, %v6143_v0 }
0x13ee   :  { %5036 = vmatpush3.bf16.msra.mxu1 %v6708_v31  ;;  %5056 = vmatpush3.bf16.msra.mxu0 %v6646_v11 }
0x13ef   :  { %5037 = vmatprep.subr.bf16.mxu1 %v6143_v0  ;;  %5057 = vmatprep.subr.bf16.mxu0 %v6143_v0 }
0x13f2   :  { %5038 = vmatpush3.bf16.msra.mxu1 %v6712_v43  ;;  %5058 = vmatpush3.bf16.msra.mxu0 %v6652_v13 }
0x13f3   :  { %5039 = vmatprep.subr.bf16.mxu1 %v6143_v0  ;;  %5059 = vmatprep.subr.bf16.mxu0 %v6143_v0 }
0x13f6   :  { %5040 = vmatpush3.bf16.msra.mxu1 %v6718_v44  ;;  %5060 = vmatpush3.bf16.msra.mxu0 %v6656_v12 }
0x13f7   :  { %5041 = vmatprep.subr.bf16.mxu1 %v6143_v0  ;;  %5061 = vmatprep.subr.bf16.mxu0 %v6143_v0 }
0x13fa   :  { %5042 = vmatpush3.bf16.msra.mxu1 %v6722_v17  ;;  %5062 = vmatpush3.bf16.msra.mxu0 %v6660_v14 }
0x13fb   :  { %5043 = vmatprep.subr.bf16.mxu1 %v6143_v0  ;;  %5063 = vmatprep.subr.bf16.mxu0 %v6143_v0 }
0x13fe   :  { %5044 = vmatpush3.bf16.msra.mxu1 %v6726_v18  ;;  %5064 = vmatpush3.bf16.msra.mxu0 %v6664_v21 }
0x13ff   :  { %5045 = vmatprep.subr.bf16.mxu1 %v6143_v0  ;;  %5065 = vmatprep.subr.bf16.mxu0 %v6143_v0 }
0x1402   :  { %5046 = vmatpush3.bf16.msra.mxu1 %v6730_v46  ;;  %5066 = vmatpush3.bf16.msra.mxu0 %v6668_v22 }
0x1403   :  { %5047 = vmatprep.subr.bf16.mxu1 %v6143_v0  ;;  %5067 = vmatprep.subr.bf16.mxu0 %v6143_v0 }
0x1406   :  { %5048 = vmatpush3.bf16.msra.mxu1 %v6735_v47  ;;  %5068 = vmatpush3.bf16.msra.mxu0 %v6672_v26 }
0x1407   :  { %5073 = vmatprep.subr.bf16.mxu1 %v6143_v0  ;;  %5093 = vmatprep.subr.bf16.mxu0 %v6143_v0 }
0x14bc   :  { %v1883_v5 = vpop.f32.mrb[8].mxu0 }
0x14bd   :  { %v5641_v15 = vadd.f32 %v6701_v30, %v1883_v5  ;;  %v5031_v16 = vpop.f32.mrb[9].mxu0  ;;  %v7040_v5 = vld [vmem:[#allocation6 + $0xb0] sm:$0xff]  }
0x14be   :  { %v1886_v19 = vpop.f32.mrb[10].mxu0  ;;  %v3885_v16 = vld [vmem:[%s7633_s4 + $0x10] sm:$0xff] }
0x14bf   :  { %v3879_v48 = vmul.f32 -1.442695, %v5641_v15  ;;  %5933 = vtanh.f32 %v5641_v15  ;;  %v5032_v49 = vpop.f32.mrb[11].mxu0  ;;  %v7044_v15 = vld [vmem:[#allocation6 + $0xb8] sm:$0xff]   ;;  %v2198_v19 = vpack.c.bf16 %v3885_v16, %v3885_v16 }
0x14c1   :  { %5935 = vpow2.f32 %v3879_v48  ;;  %v7073_v48 = vld [vmem:[%s7632_s3 + $0x2] ss:$0 sm:$0xff] }
0x14c9   :  { %v5934_v20 = vpop.eup %5933 }
0x14ca   :  { %1899 = vrot.lane.b32.xlu0 %v5934_v20, %s6147_s30 }
0x14cb   :  { %v5936_v50 = vpop.eup %5935 }
0x14cc   :  { %v1893_v55 = vadd.f32 1.0, %v5936_v50 }
0x14ce   :  { %5937 = vrcp.f32 %v1893_v55  ;;  %v7076_v55 = vld [vmem:[#allocation4 + $0xc0] sm:$0xff]  }
0x14d8   :  { %v5938_v35 = vpop.eup %5937 }
0x14d9   :  { %1897 = vrot.lane.b32.xlu1 %v5938_v35, %s6146_s29 }
0x14dd   :  { %1901 = vrot.lane.b32.xlu1 %v5938_v35, %s6145_s28 }
0x153c   :  { %v1900_v57 = vpop.permute.xlu0 %1899 }
0x153d   :  { %v1904_v59 = vmul.f32 %v5938_v35, %v1900_v57 }
0x154b   :  { %v1898_v58 = vpop.permute.xlu1 %1897 }
0x154c   :  { %v1903_v60 = vmul.f32 %v1898_v58, %v1803_v33  ;;  %v7018_v33 = vld [vmem:[#allocation6 + $0x88] sm:$0xff]  }
0x154e   :  { %v1905_v61 = vadd.f32 %v1904_v59, %v1903_v60  ;;  %v7079_v59 = vld [vmem:[#allocation4 + $0xc8] sm:$0xff]   ;;  %v7083_v60 = vld [vmem:[#allocation4 + $0xd0] sm:$0xff]  }
0x154f   :  { %v1902_v23 = vpop.permute.xlu1 %1901 }
0x1550   :  { %5939 = vtanh.f32 %v1905_v61 }
0x155a   :  { %v5940_v62 = vpop.eup %5939 }
0x155b   :  { %v1907_v24 = vmul.f32 %v5940_v62, %v1902_v23  ;;  %v7089_v62 = vld [vmem:[#allocation4 + $0xd8] sm:$0xff]  }
0x155d   :  { %v1908_v25 = vpack.c.bf16 %v1907_v24, %v1907_v24 }
0x155f   :  { %5050 = vmatmul.mubr.bf16.vlgmr.msra.gmra.mrb[72].mxu1 %v1908_v25  ;;  %5070 = vmatmul.mubr.bf16.vlgmr.msra.gmra.mrb[12].mxu0 %v1908_v25  ;;  %v7093_v25 = vld [vmem:[#allocation4 + $0xe0] sm:$0xff]  }
0x1560   :  { %5074 = vmatpush3.bf16.msra.mxu1 %v6705_v36  ;;  %5094 = vmatpush3.bf16.msra.mxu0 %v6640_v8 }
0x1561   :  { %5075 = vmatprep.subr.bf16.mxu1 %v6143_v0  ;;  %5095 = vmatprep.subr.bf16.mxu0 %v6143_v0 }
0x1562   :  { %5089 = vmatprep.mubr.msk.bf16.mxu1 %vm6144_vm0, %v6143_v0  ;;  %5109 = vmatprep.mubr.msk.bf16.mxu0 %vm6144_vm0, %v6143_v0 }
0x1564   :  { %5076 = vmatpush3.bf16.msra.mxu1 %v6708_v31  ;;  %5096 = vmatpush3.bf16.msra.mxu0 %v6646_v11 }
0x1565   :  { %5077 = vmatprep.subr.bf16.mxu1 %v6143_v0  ;;  %5097 = vmatprep.subr.bf16.mxu0 %v6143_v0 }
0x1568   :  { %5078 = vmatpush3.bf16.msra.mxu1 %v6712_v43  ;;  %5098 = vmatpush3.bf16.msra.mxu0 %v6652_v13 }
0x1569   :  { %5079 = vmatprep.subr.bf16.mxu1 %v6143_v0  ;;  %5099 = vmatprep.subr.bf16.mxu0 %v6143_v0 }
0x156c   :  { %5080 = vmatpush3.bf16.msra.mxu1 %v6718_v44  ;;  %5100 = vmatpush3.bf16.msra.mxu0 %v6656_v12 }
0x156d   :  { %5081 = vmatprep.subr.bf16.mxu1 %v6143_v0  ;;  %5101 = vmatprep.subr.bf16.mxu0 %v6143_v0 }
0x1570   :  { %5082 = vmatpush3.bf16.msra.mxu1 %v6722_v17  ;;  %5102 = vmatpush3.bf16.msra.mxu0 %v6660_v14 }
0x1571   :  { %5083 = vmatprep.subr.bf16.mxu1 %v6143_v0  ;;  %5103 = vmatprep.subr.bf16.mxu0 %v6143_v0 }
0x1574   :  { %5084 = vmatpush3.bf16.msra.mxu1 %v6726_v18  ;;  %5104 = vmatpush3.bf16.msra.mxu0 %v6664_v21 }
0x1575   :  { %5085 = vmatprep.subr.bf16.mxu1 %v6143_v0  ;;  %5105 = vmatprep.subr.bf16.mxu0 %v6143_v0 }
0x1578   :  { %5086 = vmatpush3.bf16.msra.mxu1 %v6730_v46  ;;  %5106 = vmatpush3.bf16.msra.mxu0 %v6668_v22 }
0x1579   :  { %5087 = vmatprep.subr.bf16.mxu1 %v6143_v0  ;;  %5107 = vmatprep.subr.bf16.mxu0 %v6143_v0 }
0x157c   :  { %5088 = vmatpush3.bf16.msra.mxu1 %v6735_v47  ;;  %5108 = vmatpush3.bf16.msra.mxu0 %v6672_v26 }
0x157d   :  { %5113 = vmatprep.subr.bf16.mxu1 %v6143_v0  ;;  %5153 = vmatprep.subr.bf16.mxu0 %v6143_v0 }
0x1632   :  { %v1985_v8 = vpop.f32.mrb[12].mxu0 }
0x1633   :  { %v5642_v11 = vadd.f32 %v6701_v30, %v1985_v8  ;;  %v5071_v13 = vpop.f32.mrb[13].mxu0  ;;  %v7097_v8 = vld [vmem:[#allocation4 + $0xe8] sm:$0xff]  }
0x1634   :  { %v1988_v12 = vpop.f32.mrb[14].mxu0 }
0x1635   :  { %v3880_v14 = vmul.f32 -1.442695, %v5642_v11  ;;  %5941 = vtanh.f32 %v5642_v11  ;;  %v5072_v21 = vpop.f32.mrb[15].mxu0  ;;  %v7101_v11 = vld [vmem:[#allocation4 + $0xf0] sm:$0xff]   ;;  %v7106_v12 = vld [vmem:[#allocation4 + $0xf8] sm:$0xff]  }
0x1636   :  { %v3886_v21 = vld [vmem:[%s7634_s5 + $0x10] sm:$0xff] }
0x1637   :  { %5943 = vpow2.f32 %v3880_v14 }
0x163f   :  { %v5942_v22 = vpop.eup %5941 }
0x1640   :  { %2001 = vrot.lane.b32.xlu1 %v5942_v22, %s6147_s30 }
0x1641   :  { %v5944_v51 = vpop.eup %5943 }
0x1642   :  { %v1995_v52 = vadd.f32 1.0, %v5944_v51 }
0x1644   :  { %5945 = vrcp.f32 %v1995_v52 }
0x164e   :  { %v5946_v26 = vpop.eup %5945 }
0x164f   :  { %1999 = vrot.lane.b32.xlu0 %v5946_v26, %s6146_s29 }
0x1653   :  { %2003 = vrot.lane.b32.xlu0 %v5946_v26, %s6145_s28 }
0x16b2   :  { %v2002_v63 = vpop.permute.xlu1 %2001 }
0x16b3   :  { %v2006_v1 = vmul.f32 %v5946_v26, %v2002_v63 }
0x16c1   :  { %v2000_v53 = vpop.permute.xlu0 %1999 }
0x16c2   :  { %v2005_v54 = vmul.f32 %v2000_v53, %v1905_v61 }
0x16c4   :  { %v2007_v45 = vadd.f32 %v2006_v1, %v2005_v54 }
0x16c5   :  { %v2004_v56 = vpop.permute.xlu0 %2003 }
0x16c6   :  { %5947 = vtanh.f32 %v2007_v45 }
0x16d0   :  { %v5948_v2 = vpop.eup %5947 }
0x16d1   :  { %v2009_v28 = vmul.f32 %v5948_v2, %v2004_v56 }
0x16d3   :  { %v2010_v39 = vpack.c.bf16 %v2009_v28, %v2009_v28 }
0x16d5   :  { %5090 = vmatmul.mubr.bf16.vlgmr.msra.gmra.mrb[76].mxu1 %v2010_v39  ;;  %5110 = vmatmul.mubr.bf16.vlgmr.msra.gmra.mrb[16].mxu0 %v2010_v39 }
0x16d6   :  { %5114 = vmatpush3.bf16.msra.mxu1 %v6705_v36  ;;  %5129 = vmatprep.mubr.msk.bf16.mxu1 %vm6144_vm0, %v6143_v0 }
0x16d7   :  { %5115 = vmatprep.subr.bf16.mxu1 %v6143_v0  ;;  %5169 = vmatprep.mubr.msk.bf16.mxu0 %vm6144_vm0, %v6143_v0 }
0x16d8   :  { %5154 = vmatpush3.bf16.msra.mxu0 %v7076_v55 }
0x16d9   :  { %5155 = vmatprep.subr.bf16.mxu0 %v6143_v0 }
0x16da   :  { %5116 = vmatpush3.bf16.msra.mxu1 %v6708_v31 }
0x16db   :  { %5117 = vmatprep.subr.bf16.mxu1 %v6143_v0 }
0x16dc   :  { %5156 = vmatpush3.bf16.msra.mxu0 %v7079_v59 }
0x16dd   :  { %5157 = vmatprep.subr.bf16.mxu0 %v6143_v0 }
0x16de   :  { %5118 = vmatpush3.bf16.msra.mxu1 %v6712_v43 }
0x16df   :  { %5119 = vmatprep.subr.bf16.mxu1 %v6143_v0 }
0x16e0   :  { %5158 = vmatpush3.bf16.msra.mxu0 %v7083_v60 }
0x16e1   :  { %5159 = vmatprep.subr.bf16.mxu0 %v6143_v0 }
0x16e2   :  { %5120 = vmatpush3.bf16.msra.mxu1 %v6718_v44 }
0x16e3   :  { %5121 = vmatprep.subr.bf16.mxu1 %v6143_v0 }
0x16e4   :  { %5160 = vmatpush3.bf16.msra.mxu0 %v7089_v62 }
0x16e5   :  { %5161 = vmatprep.subr.bf16.mxu0 %v6143_v0 }
0x16e6   :  { %5122 = vmatpush3.bf16.msra.mxu1 %v6722_v17 }
0x16e7   :  { %5123 = vmatprep.subr.bf16.mxu1 %v6143_v0 }
0x16e8   :  { %5162 = vmatpush3.bf16.msra.mxu0 %v7093_v25 }
0x16e9   :  { %5163 = vmatprep.subr.bf16.mxu0 %v6143_v0 }
0x16ea   :  { %5124 = vmatpush3.bf16.msra.mxu1 %v6726_v18 }
0x16eb   :  { %5125 = vmatprep.subr.bf16.mxu1 %v6143_v0 }
0x16ec   :  { %5164 = vmatpush3.bf16.msra.mxu0 %v7097_v8 }
0x16ed   :  { %5165 = vmatprep.subr.bf16.mxu0 %v6143_v0 }
0x16ee   :  { %5126 = vmatpush3.bf16.msra.mxu1 %v6730_v46 }
0x16ef   :  { %5127 = vmatprep.subr.bf16.mxu1 %v6143_v0 }
0x16f0   :  { %5166 = vmatpush3.bf16.msra.mxu0 %v7101_v11 }
0x16f1   :  { %5167 = vmatprep.subr.bf16.mxu0 %v6143_v0 }
0x16f2   :  { %5128 = vmatpush3.bf16.msra.mxu1 %v6735_v47 }
0x16f3   :  { %5133 = vmatprep.subr.bf16.mxu1 %v6143_v0 }
0x16f4   :  { %5168 = vmatpush3.bf16.msra.mxu0 %v7106_v12 }
0x16f5   :  { %5193 = vmatprep.subr.bf16.mxu0 %v6143_v0 }
0x17a8   :  { %v2087_v36 = vpop.f32.mrb[16].mxu0 }
0x17a9   :  { %v5643_v31 = vadd.f32 %v6701_v30, %v2087_v36  ;;  %v5111_v43 = vpop.f32.mrb[17].mxu0 }
0x17aa   :  { %v2090_v44 = vpop.f32.mrb[18].mxu0 }
0x17ab   :  { %v3881_v17 = vmul.f32 -1.442695, %v5643_v31  ;;  %5949 = vtanh.f32 %v5643_v31  ;;  %v5112_v37 = vpop.f32.mrb[19].mxu0 }
0x17ad   :  { %5951 = vpow2.f32 %v3881_v17 }
0x17b5   :  { %v5950_v18 = vpop.eup %5949 }
0x17b6   :  { %2103 = vrot.lane.b32.xlu0 %v5950_v18, %s6147_s30 }
0x17b7   :  { %v5952_v3 = vpop.eup %5951 }
0x17b8   :  { %v2097_v46 = vadd.f32 1.0, %v5952_v3 }
0x17ba   :  { %5953 = vrcp.f32 %v2097_v46 }
0x17c4   :  { %v5954_v4 = vpop.eup %5953 }
0x17c5   :  { %2101 = vrot.lane.b32.xlu1 %v5954_v4, %s6146_s29 }
0x17c9   :  { %2105 = vrot.lane.b32.xlu1 %v5954_v4, %s6145_s28 }
0x1828   :  { %v2104_v47 = vpop.permute.xlu0 %2103 }
0x1829   :  { %v2108_v30 = vmul.f32 %v5954_v4, %v2104_v47 }
0x1837   :  { %v2102_v6 = vpop.permute.xlu1 %2101 }
0x1838   :  { %v2107_v7 = vmul.f32 %v2102_v6, %v2007_v45 }
0x183a   :  { %v2109_v9 = vadd.f32 %v2108_v30, %v2107_v7 }
0x183b   :  { %v2106_v29 = vpop.permute.xlu1 %2105 }
0x183c   :  { %5955 = vtanh.f32 %v2109_v9  ;;  %3883 = vst [vmem:[%s7639_s10 + $0x8] sm:$0xff] %v2109_v9 }
0x1846   :  { %v5956_v27 = vpop.eup %5955 }
0x1847   :  { %v2111_v32 = vmul.f32 %v5956_v27, %v2106_v29 }
0x1849   :  { %v2112_v41 = vpack.c.bf16 %v2111_v32, %v2111_v32  ;;  %3882 = vst [vmem:[%s7638_s9 + $0x8] sm:$0xff] %v2111_v32 }
0x184b   :  { %5130 = vmatmul.mubr.bf16.vlgmr.msra.gmra.mrb[80].mxu1 %v2112_v41 }
0x184c   :  { %5134 = vmatpush3.bf16.msra.mxu1 %v7012_v34  ;;  %5149 = vmatprep.mubr.msk.bf16.mxu1 %vm6144_vm0, %v6143_v0 }
0x184d   :  { %5135 = vmatprep.subr.bf16.mxu1 %v6143_v0 }
0x1850   :  { %5136 = vmatpush3.bf16.msra.mxu1 %v7018_v33 }
0x1851   :  { %5137 = vmatprep.subr.bf16.mxu1 %v6143_v0 }
0x1854   :  { %5138 = vmatpush3.bf16.msra.mxu1 %v7024_v38 }
0x1855   :  { %5139 = vmatprep.subr.bf16.mxu1 %v6143_v0 }
0x1858   :  { %5140 = vmatpush3.bf16.msra.mxu1 %v7028_v40 }
0x1859   :  { %5141 = vmatprep.subr.bf16.mxu1 %v6143_v0 }
0x185c   :  { %5142 = vmatpush3.bf16.msra.mxu1 %v7032_v42 }
0x185d   :  { %5143 = vmatprep.subr.bf16.mxu1 %v6143_v0 }
0x1860   :  { %5144 = vmatpush3.bf16.msra.mxu1 %v7036_v10 }
0x1861   :  { %5145 = vmatprep.subr.bf16.mxu1 %v6143_v0 }
0x1864   :  { %5146 = vmatpush3.bf16.msra.mxu1 %v7040_v5 }
0x1865   :  { %5147 = vmatprep.subr.bf16.mxu1 %v6143_v0 }
0x1868   :  { %5148 = vmatpush3.bf16.msra.mxu1 %v7044_v15 }
0x1869   :  { %5173 = vmatprep.subr.bf16.mxu1 %v6143_v0 }
0x186b   :  { %5150 = vmatmul.mubr.bf16.vlgmr.msra.gmra.mrb[52].mxu1 %v2198_v19 }
0x186c   :  { %5174 = vmatpush3.bf16.msra.mxu1 %v7012_v34  ;;  %5189 = vmatprep.mubr.msk.bf16.mxu1 %vm6144_vm0, %v6143_v0 }
0x186d   :  { %5175 = vmatprep.subr.bf16.mxu1 %v6143_v0 }
0x1870   :  { %5176 = vmatpush3.bf16.msra.mxu1 %v7018_v33 }
0x1871   :  { %5177 = vmatprep.subr.bf16.mxu1 %v6143_v0 }
0x1874   :  { %5178 = vmatpush3.bf16.msra.mxu1 %v7024_v38 }
0x1875   :  { %5179 = vmatprep.subr.bf16.mxu1 %v6143_v0 }
0x1878   :  { %5180 = vmatpush3.bf16.msra.mxu1 %v7028_v40 }
0x1879   :  { %5181 = vmatprep.subr.bf16.mxu1 %v6143_v0 }
0x187c   :  { %5182 = vmatpush3.bf16.msra.mxu1 %v7032_v42 }
0x187d   :  { %5183 = vmatprep.subr.bf16.mxu1 %v6143_v0 }
0x1880   :  { %5184 = vmatpush3.bf16.msra.mxu1 %v7036_v10 }
0x1881   :  { %5185 = vmatprep.subr.bf16.mxu1 %v6143_v0 }
0x1884   :  { %5186 = vmatpush3.bf16.msra.mxu1 %v7040_v5 }
0x1885   :  { %5187 = vmatprep.subr.bf16.mxu1 %v6143_v0 }
0x1888   :  { %5188 = vmatpush3.bf16.msra.mxu1 %v7044_v15 }
0x1889   :  { %5213 = vmatprep.subr.bf16.mxu1 %v6143_v0 }
0x193e   :  { %v2282_v49 = vpop.f32.mrb[52].mxu1 }
0x193f   :  { %v5644_v20 = vadd.f32 %v7073_v48, %v2282_v49  ;;  %v5151_v50 = vpop.f32.mrb[53].mxu1 }
0x1940   :  { %v2285_v35 = vpop.f32.mrb[54].mxu1 }
0x1941   :  { %v3895_v57 = vmul.f32 -1.442695, %v5644_v20  ;;  %5957 = vtanh.f32 %v5644_v20  ;;  %v5152_v58 = vpop.f32.mrb[55].mxu1 }
0x1943   :  { %5959 = vpow2.f32 %v3895_v57 }
0x194b   :  { %v5958_v61 = vpop.eup %5957 }
0x194c   :  { %2298 = vrot.lane.b32.xlu1 %v5958_v61, %s6147_s30 }
0x194d   :  { %v5960_v23 = vpop.eup %5959 }
0x194e   :  { %v2292_v24 = vadd.f32 1.0, %v5960_v23 }
0x1950   :  { %5961 = vrcp.f32 %v2292_v24 }
0x195a   :  { %v5962_v13 = vpop.eup %5961 }
0x195b   :  { %2296 = vrot.lane.b32.xlu0 %v5962_v13, %s6146_s29 }
0x195f   :  { %2300 = vrot.lane.b32.xlu0 %v5962_v13, %s6145_s28 }
0x19be   :  { %v2299_v14 = vpop.permute.xlu1 %2298 }
0x19bf   :  { %v2303_v51 = vmul.f32 %v5962_v13, %v2299_v14 }
0x19cd   :  { %v2297_v22 = vpop.permute.xlu0 %2296 }
0x19ce   :  { %v2302_v52 = vmul.f32 %v3886_v21, %v2297_v22 }
0x19d0   :  { %v2304_v26 = vadd.f32 %v2303_v51, %v2302_v52 }
0x19d1   :  { %v2301_v53 = vpop.permute.xlu0 %2300 }
0x19d2   :  { %5963 = vtanh.f32 %v2304_v26 }
0x19dc   :  { %v5964_v63 = vpop.eup %5963 }
0x19dd   :  { %v2306_v1 = vmul.f32 %v5964_v63, %v2301_v53 }
0x19df   :  { %v2307_v54 = vpack.c.bf16 %v2306_v1, %v2306_v1 }
0x19e1   :  { %5170 = vmatmul.mubr.bf16.vlgmr.msra.gmra.mrb[32].mxu0 %v2307_v54  ;;  %5190 = vmatmul.mubr.bf16.vlgmr.msra.gmra.mrb[56].mxu1 %v2307_v54 }
0x19e2   :  { %5194 = vmatpush3.bf16.msra.mxu0 %v7076_v55  ;;  %5214 = vmatpush3.bf16.msra.mxu1 %v7012_v34 }
0x19e3   :  { %5195 = vmatprep.subr.bf16.mxu0 %v6143_v0  ;;  %5215 = vmatprep.subr.bf16.mxu1 %v6143_v0 }
0x19e4   :  { %5209 = vmatprep.mubr.msk.bf16.mxu0 %vm6144_vm0, %v6143_v0  ;;  %5229 = vmatprep.mubr.msk.bf16.mxu1 %vm6144_vm0, %v6143_v0 }
0x19e6   :  { %5196 = vmatpush3.bf16.msra.mxu0 %v7079_v59  ;;  %5216 = vmatpush3.bf16.msra.mxu1 %v7018_v33 }
0x19e7   :  { %5197 = vmatprep.subr.bf16.mxu0 %v6143_v0  ;;  %5217 = vmatprep.subr.bf16.mxu1 %v6143_v0 }
0x19ea   :  { %5198 = vmatpush3.bf16.msra.mxu0 %v7083_v60  ;;  %5218 = vmatpush3.bf16.msra.mxu1 %v7024_v38 }
0x19eb   :  { %5199 = vmatprep.subr.bf16.mxu0 %v6143_v0  ;;  %5219 = vmatprep.subr.bf16.mxu1 %v6143_v0 }
0x19ee   :  { %5200 = vmatpush3.bf16.msra.mxu0 %v7089_v62  ;;  %5220 = vmatpush3.bf16.msra.mxu1 %v7028_v40 }
0x19ef   :  { %5201 = vmatprep.subr.bf16.mxu0 %v6143_v0  ;;  %5221 = vmatprep.subr.bf16.mxu1 %v6143_v0 }
0x19f2   :  { %5202 = vmatpush3.bf16.msra.mxu0 %v7093_v25  ;;  %5222 = vmatpush3.bf16.msra.mxu1 %v7032_v42 }
0x19f3   :  { %5203 = vmatprep.subr.bf16.mxu0 %v6143_v0  ;;  %5223 = vmatprep.subr.bf16.mxu1 %v6143_v0 }
0x19f6   :  { %5204 = vmatpush3.bf16.msra.mxu0 %v7097_v8  ;;  %5224 = vmatpush3.bf16.msra.mxu1 %v7036_v10 }
0x19f7   :  { %5205 = vmatprep.subr.bf16.mxu0 %v6143_v0  ;;  %5225 = vmatprep.subr.bf16.mxu1 %v6143_v0 }
0x19fa   :  { %5206 = vmatpush3.bf16.msra.mxu0 %v7101_v11  ;;  %5226 = vmatpush3.bf16.msra.mxu1 %v7040_v5 }
0x19fb   :  { %5207 = vmatprep.subr.bf16.mxu0 %v6143_v0  ;;  %5227 = vmatprep.subr.bf16.mxu1 %v6143_v0 }
0x19fe   :  { %5208 = vmatpush3.bf16.msra.mxu0 %v7106_v12  ;;  %5228 = vmatpush3.bf16.msra.mxu1 %v7044_v15 }
0x19ff   :  { %5233 = vmatprep.subr.bf16.mxu0 %v6143_v0  ;;  %5253 = vmatprep.subr.bf16.mxu1 %v6143_v0 }
0x1ab4   :  { %v2438_v45 = vpop.f32.mrb[56].mxu1 }
0x1ab5   :  { %v5645_v2 = vadd.f32 %v7073_v48, %v2438_v45  ;;  %v5191_v56 = vpop.f32.mrb[57].mxu1 }
0x1ab6   :  { %v2441_v28 = vpop.f32.mrb[58].mxu1 }
0x1ab7   :  { %v3905_v39 = vmul.f32 -1.442695, %v5645_v2  ;;  %5965 = vtanh.f32 %v5645_v2  ;;  %v5192_v36 = vpop.f32.mrb[59].mxu1 }
0x1ab9   :  { %5967 = vpow2.f32 %v3905_v39 }
0x1ac1   :  { %v5966_v31 = vpop.eup %5965 }
0x1ac2   :  { %2454 = vrot.lane.b32.xlu0 %v5966_v31, %s6147_s30 }
0x1ac3   :  { %v5968_v43 = vpop.eup %5967 }
0x1ac4   :  { %v2448_v44 = vadd.f32 1.0, %v5968_v43 }
0x1ac6   :  { %5969 = vrcp.f32 %v2448_v44 }
0x1ad0   :  { %v5970_v17 = vpop.eup %5969 }
0x1ad1   :  { %2452 = vrot.lane.b32.xlu1 %v5970_v17, %s6146_s29 }
0x1ad5   :  { %2456 = vrot.lane.b32.xlu1 %v5970_v17, %s6145_s28 }
0x1b34   :  { %v2455_v37 = vpop.permute.xlu0 %2454 }
0x1b35   :  { %v2459_v3 = vmul.f32 %v5970_v17, %v2455_v37 }
0x1b43   :  { %v2453_v18 = vpop.permute.xlu1 %2452 }
0x1b44   :  { %v2458_v46 = vmul.f32 %v2453_v18, %v2304_v26 }
0x1b46   :  { %v2460_v4 = vadd.f32 %v2459_v3, %v2458_v46 }
0x1b47   :  { %v2457_v6 = vpop.permute.xlu1 %2456 }
0x1b48   :  { %5971 = vtanh.f32 %v2460_v4 }
0x1b52   :  { %v5972_v47 = vpop.eup %5971 }
0x1b53   :  { %v2462_v30 = vmul.f32 %v5972_v47, %v2457_v6 }
0x1b55   :  { %v2463_v7 = vpack.c.bf16 %v2462_v30, %v2462_v30 }
0x1b57   :  { %5210 = vmatmul.mubr.bf16.vlgmr.msra.gmra.mrb[36].mxu0 %v2463_v7  ;;  %5230 = vmatmul.mubr.bf16.vlgmr.msra.gmra.mrb[60].mxu1 %v2463_v7 }
0x1b58   :  { %5234 = vmatpush3.bf16.msra.mxu0 %v7076_v55  ;;  %5254 = vmatpush3.bf16.msra.mxu1 %v7012_v34 }
0x1b59   :  { %5235 = vmatprep.subr.bf16.mxu0 %v6143_v0  ;;  %5255 = vmatprep.subr.bf16.mxu1 %v6143_v0 }
0x1b5a   :  { %5249 = vmatprep.mubr.msk.bf16.mxu0 %vm6144_vm0, %v6143_v0  ;;  %5269 = vmatprep.mubr.msk.bf16.mxu1 %vm6144_vm0, %v6143_v0 }
0x1b5c   :  { %5236 = vmatpush3.bf16.msra.mxu0 %v7079_v59  ;;  %5256 = vmatpush3.bf16.msra.mxu1 %v7018_v33 }
0x1b5d   :  { %5237 = vmatprep.subr.bf16.mxu0 %v6143_v0  ;;  %5257 = vmatprep.subr.bf16.mxu1 %v6143_v0 }
0x1b60   :  { %5238 = vmatpush3.bf16.msra.mxu0 %v7083_v60  ;;  %5258 = vmatpush3.bf16.msra.mxu1 %v7024_v38 }
0x1b61   :  { %5239 = vmatprep.subr.bf16.mxu0 %v6143_v0  ;;  %5259 = vmatprep.subr.bf16.mxu1 %v6143_v0 }
0x1b64   :  { %5240 = vmatpush3.bf16.msra.mxu0 %v7089_v62  ;;  %5260 = vmatpush3.bf16.msra.mxu1 %v7028_v40 }
0x1b65   :  { %5241 = vmatprep.subr.bf16.mxu0 %v6143_v0  ;;  %5261 = vmatprep.subr.bf16.mxu1 %v6143_v0 }
0x1b68   :  { %5242 = vmatpush3.bf16.msra.mxu0 %v7093_v25  ;;  %5262 = vmatpush3.bf16.msra.mxu1 %v7032_v42 }
0x1b69   :  { %5243 = vmatprep.subr.bf16.mxu0 %v6143_v0  ;;  %5263 = vmatprep.subr.bf16.mxu1 %v6143_v0 }
0x1b6c   :  { %5244 = vmatpush3.bf16.msra.mxu0 %v7097_v8  ;;  %5264 = vmatpush3.bf16.msra.mxu1 %v7036_v10 }
0x1b6d   :  { %5245 = vmatprep.subr.bf16.mxu0 %v6143_v0  ;;  %5265 = vmatprep.subr.bf16.mxu1 %v6143_v0 }
0x1b70   :  { %5246 = vmatpush3.bf16.msra.mxu0 %v7101_v11  ;;  %5266 = vmatpush3.bf16.msra.mxu1 %v7040_v5 }
0x1b71   :  { %5247 = vmatprep.subr.bf16.mxu0 %v6143_v0  ;;  %5267 = vmatprep.subr.bf16.mxu1 %v6143_v0 }
0x1b74   :  { %5248 = vmatpush3.bf16.msra.mxu0 %v7106_v12  ;;  %5268 = vmatpush3.bf16.msra.mxu1 %v7044_v15 }
0x1b75   :  { %5273 = vmatprep.subr.bf16.mxu0 %v6143_v0  ;;  %5293 = vmatprep.subr.bf16.mxu1 %v6143_v0 }
0x1c2a   :  { %v2540_v9 = vpop.f32.mrb[60].mxu1 }
0x1c2b   :  { %v5646_v27 = vadd.f32 %v7073_v48, %v2540_v9  ;;  %v5231_v29 = vpop.f32.mrb[61].mxu1 }
0x1c2c   :  { %v2543_v32 = vpop.f32.mrb[62].mxu1 }
0x1c2d   :  { %v3906_v41 = vmul.f32 -1.442695, %v5646_v27  ;;  %5973 = vtanh.f32 %v5646_v27  ;;  %v5232_v16 = vpop.f32.mrb[63].mxu1 }
0x1c2f   :  { %5975 = vpow2.f32 %v3906_v41 }
0x1c37   :  { %v5974_v19 = vpop.eup %5973 }
0x1c38   :  { %2556 = vrot.lane.b32.xlu1 %v5974_v19, %s6147_s30 }
0x1c39   :  { %v5976_v49 = vpop.eup %5975 }
0x1c3a   :  { %v2550_v20 = vadd.f32 1.0, %v5976_v49 }
0x1c3c   :  { %5977 = vrcp.f32 %v2550_v20 }
0x1c46   :  { %v5978_v50 = vpop.eup %5977 }
0x1c47   :  { %2554 = vrot.lane.b32.xlu0 %v5978_v50, %s6146_s29 }
0x1c4b   :  { %2558 = vrot.lane.b32.xlu0 %v5978_v50, %s6145_s28 }
0x1caa   :  { %v2557_v35 = vpop.permute.xlu1 %2556 }
0x1cab   :  { %v2561_v58 = vmul.f32 %v5978_v50, %v2557_v35 }
0x1cb9   :  { %v2555_v57 = vpop.permute.xlu0 %2554 }
0x1cba   :  { %v2560_v61 = vmul.f32 %v2555_v57, %v2460_v4 }
0x1cbc   :  { %v2562_v23 = vadd.f32 %v2561_v58, %v2560_v61 }
0x1cbd   :  { %v2559_v13 = vpop.permute.xlu0 %2558 }
0x1cbe   :  { %5979 = vtanh.f32 %v2562_v23 }
0x1cc8   :  { %v5980_v24 = vpop.eup %5979 }
0x1cc9   :  { %v2564_v14 = vmul.f32 %v5980_v24, %v2559_v13 }
0x1ccb   :  { %v2565_v21 = vpack.c.bf16 %v2564_v14, %v2564_v14 }
0x1ccd   :  { %5250 = vmatmul.mubr.bf16.vlgmr.msra.gmra.mrb[40].mxu0 %v2565_v21  ;;  %5270 = vmatmul.mubr.bf16.vlgmr.msra.gmra.mrb[64].mxu1 %v2565_v21 }
0x1cce   :  { %5274 = vmatpush3.bf16.msra.mxu0 %v7076_v55  ;;  %5294 = vmatpush3.bf16.msra.mxu1 %v7012_v34 }
0x1ccf   :  { %5275 = vmatprep.subr.bf16.mxu0 %v6143_v0  ;;  %5295 = vmatprep.subr.bf16.mxu1 %v6143_v0 }
0x1cd0   :  { %5289 = vmatprep.mubr.msk.bf16.mxu0 %vm6144_vm0, %v6143_v0  ;;  %5309 = vmatprep.mubr.msk.bf16.mxu1 %vm6144_vm0, %v6143_v0 }
0x1cd2   :  { %5276 = vmatpush3.bf16.msra.mxu0 %v7079_v59  ;;  %5296 = vmatpush3.bf16.msra.mxu1 %v7018_v33 }
0x1cd3   :  { %5277 = vmatprep.subr.bf16.mxu0 %v6143_v0  ;;  %5297 = vmatprep.subr.bf16.mxu1 %v6143_v0 }
0x1cd6   :  { %5278 = vmatpush3.bf16.msra.mxu0 %v7083_v60  ;;  %5298 = vmatpush3.bf16.msra.mxu1 %v7024_v38 }
0x1cd7   :  { %5279 = vmatprep.subr.bf16.mxu0 %v6143_v0  ;;  %5299 = vmatprep.subr.bf16.mxu1 %v6143_v0 }
0x1cda   :  { %5280 = vmatpush3.bf16.msra.mxu0 %v7089_v62  ;;  %5300 = vmatpush3.bf16.msra.mxu1 %v7028_v40 }
0x1cdb   :  { %5281 = vmatprep.subr.bf16.mxu0 %v6143_v0  ;;  %5301 = vmatprep.subr.bf16.mxu1 %v6143_v0 }
0x1cde   :  { %5282 = vmatpush3.bf16.msra.mxu0 %v7093_v25  ;;  %5302 = vmatpush3.bf16.msra.mxu1 %v7032_v42 }
0x1cdf   :  { %5283 = vmatprep.subr.bf16.mxu0 %v6143_v0  ;;  %5303 = vmatprep.subr.bf16.mxu1 %v6143_v0 }
0x1ce2   :  { %5284 = vmatpush3.bf16.msra.mxu0 %v7097_v8  ;;  %5304 = vmatpush3.bf16.msra.mxu1 %v7036_v10 }
0x1ce3   :  { %5285 = vmatprep.subr.bf16.mxu0 %v6143_v0  ;;  %5305 = vmatprep.subr.bf16.mxu1 %v6143_v0 }
0x1ce6   :  { %5286 = vmatpush3.bf16.msra.mxu0 %v7101_v11  ;;  %5306 = vmatpush3.bf16.msra.mxu1 %v7040_v5 }
0x1ce7   :  { %5287 = vmatprep.subr.bf16.mxu0 %v6143_v0  ;;  %5307 = vmatprep.subr.bf16.mxu1 %v6143_v0 }
0x1cea   :  { %5288 = vmatpush3.bf16.msra.mxu0 %v7106_v12  ;;  %5308 = vmatpush3.bf16.msra.mxu1 %v7044_v15 }
0x1ceb   :  { %5313 = vmatprep.subr.bf16.mxu0 %v6143_v0  ;;  %5333 = vmatprep.subr.bf16.mxu1 %v6143_v0 }
0x1da0   :  { %v2642_v22 = vpop.f32.mrb[64].mxu1 }
0x1da1   :  { %v5647_v51 = vadd.f32 %v7073_v48, %v2642_v22  ;;  %v5271_v52 = vpop.f32.mrb[65].mxu1 }
0x1da2   :  { %v2645_v26 = vpop.f32.mrb[66].mxu1 }
0x1da3   :  { %v3907_v63 = vmul.f32 -1.442695, %v5647_v51  ;;  %5981 = vtanh.f32 %v5647_v51  ;;  %v5272_v53 = vpop.f32.mrb[67].mxu1 }
0x1da5   :  { %5983 = vpow2.f32 %v3907_v63 }
0x1dad   :  { %v5982_v1 = vpop.eup %5981 }
0x1dae   :  { %2658 = vrot.lane.b32.xlu0 %v5982_v1, %s6147_s30 }
0x1daf   :  { %v5984_v54 = vpop.eup %5983 }
0x1db0   :  { %v2652_v45 = vadd.f32 1.0, %v5984_v54 }
0x1db2   :  { %5985 = vrcp.f32 %v2652_v45 }
0x1dbc   :  { %v5986_v2 = vpop.eup %5985 }
0x1dbd   :  { %2656 = vrot.lane.b32.xlu1 %v5986_v2, %s6146_s29 }
0x1dc1   :  { %2660 = vrot.lane.b32.xlu1 %v5986_v2, %s6145_s28 }
0x1e20   :  { %v2659_v56 = vpop.permute.xlu0 %2658 }
0x1e21   :  { %v2663_v39 = vmul.f32 %v5986_v2, %v2659_v56 }
0x1e2f   :  { %v2657_v28 = vpop.permute.xlu1 %2656 }
0x1e30   :  { %v2662_v36 = vmul.f32 %v2657_v28, %v2562_v23 }
0x1e32   :  { %v2664_v31 = vadd.f32 %v2663_v39, %v2662_v36 }
0x1e33   :  { %v2661_v44 = vpop.permute.xlu1 %2660 }
0x1e34   :  { %5987 = vtanh.f32 %v2664_v31 }
0x1e3e   :  { %v5988_v43 = vpop.eup %5987 }
0x1e3f   :  { %v2666_v17 = vmul.f32 %v5988_v43, %v2661_v44 }
0x1e41   :  { %v2667_v37 = vpack.c.bf16 %v2666_v17, %v2666_v17 }
0x1e43   :  { %5290 = vmatmul.mubr.bf16.vlgmr.msra.gmra.mrb[44].mxu0 %v2667_v37  ;;  %5310 = vmatmul.mubr.bf16.vlgmr.msra.gmra.mrb[68].mxu1 %v2667_v37 }
0x1e44   :  { %5314 = vmatpush3.bf16.msra.mxu0 %v7076_v55  ;;  %5334 = vmatpush3.bf16.msra.mxu1 %v7012_v34 }
0x1e45   :  { %5315 = vmatprep.subr.bf16.mxu0 %v6143_v0  ;;  %5335 = vmatprep.subr.bf16.mxu1 %v6143_v0 }
0x1e46   :  { %5329 = vmatprep.mubr.msk.bf16.mxu0 %vm6144_vm0, %v6143_v0  ;;  %5349 = vmatprep.mubr.msk.bf16.mxu1 %vm6144_vm0, %v6143_v0 }
0x1e48   :  { %5316 = vmatpush3.bf16.msra.mxu0 %v7079_v59  ;;  %5336 = vmatpush3.bf16.msra.mxu1 %v7018_v33 }
0x1e49   :  { %5317 = vmatprep.subr.bf16.mxu0 %v6143_v0  ;;  %5337 = vmatprep.subr.bf16.mxu1 %v6143_v0 }
0x1e4c   :  { %5318 = vmatpush3.bf16.msra.mxu0 %v7083_v60  ;;  %5338 = vmatpush3.bf16.msra.mxu1 %v7024_v38 }
0x1e4d   :  { %5319 = vmatprep.subr.bf16.mxu0 %v6143_v0  ;;  %5339 = vmatprep.subr.bf16.mxu1 %v6143_v0 }
0x1e50   :  { %5320 = vmatpush3.bf16.msra.mxu0 %v7089_v62  ;;  %5340 = vmatpush3.bf16.msra.mxu1 %v7028_v40 }
0x1e51   :  { %5321 = vmatprep.subr.bf16.mxu0 %v6143_v0  ;;  %5341 = vmatprep.subr.bf16.mxu1 %v6143_v0 }
0x1e54   :  { %5322 = vmatpush3.bf16.msra.mxu0 %v7093_v25  ;;  %5342 = vmatpush3.bf16.msra.mxu1 %v7032_v42 }
0x1e55   :  { %5323 = vmatprep.subr.bf16.mxu0 %v6143_v0  ;;  %5343 = vmatprep.subr.bf16.mxu1 %v6143_v0 }
0x1e58   :  { %5324 = vmatpush3.bf16.msra.mxu0 %v7097_v8  ;;  %5344 = vmatpush3.bf16.msra.mxu1 %v7036_v10 }
0x1e59   :  { %5325 = vmatprep.subr.bf16.mxu0 %v6143_v0  ;;  %5345 = vmatprep.subr.bf16.mxu1 %v6143_v0 }
0x1e5c   :  { %5326 = vmatpush3.bf16.msra.mxu0 %v7101_v11  ;;  %5346 = vmatpush3.bf16.msra.mxu1 %v7040_v5 }
0x1e5d   :  { %5327 = vmatprep.subr.bf16.mxu0 %v6143_v0  ;;  %5347 = vmatprep.subr.bf16.mxu1 %v6143_v0 }
0x1e60   :  { %5328 = vmatpush3.bf16.msra.mxu0 %v7106_v12  ;;  %5348 = vmatpush3.bf16.msra.mxu1 %v7044_v15 }
0x1e61   :  { %5353 = vmatprep.subr.bf16.mxu0 %v6143_v0  ;;  %5373 = vmatprep.subr.bf16.mxu1 %v6143_v0 }
0x1f16   :  { %v2744_v18 = vpop.f32.mrb[68].mxu1 }
0x1f17   :  { %v5648_v3 = vadd.f32 %v7073_v48, %v2744_v18  ;;  %v5311_v46 = vpop.f32.mrb[69].mxu1 }
0x1f18   :  { %v2747_v4 = vpop.f32.mrb[70].mxu1 }
0x1f19   :  { %v3908_v47 = vmul.f32 -1.442695, %v5648_v3  ;;  %5989 = vtanh.f32 %v5648_v3  ;;  %v5312_v6 = vpop.f32.mrb[71].mxu1 }
0x1f1b   :  { %5991 = vpow2.f32 %v3908_v47 }
0x1f23   :  { %v5990_v30 = vpop.eup %5989 }
0x1f24   :  { %2760 = vrot.lane.b32.xlu1 %v5990_v30, %s6147_s30 }
0x1f25   :  { %v5992_v7 = vpop.eup %5991 }
0x1f26   :  { %v2754_v9 = vadd.f32 1.0, %v5992_v7 }
0x1f28   :  { %5993 = vrcp.f32 %v2754_v9 }
0x1f32   :  { %v5994_v27 = vpop.eup %5993 }
0x1f33   :  { %2758 = vrot.lane.b32.xlu0 %v5994_v27, %s6146_s29 }
0x1f37   :  { %2762 = vrot.lane.b32.xlu0 %v5994_v27, %s6145_s28 }
0x1f96   :  { %v2761_v29 = vpop.permute.xlu1 %2760 }
0x1f97   :  { %v2765_v41 = vmul.f32 %v5994_v27, %v2761_v29 }
0x1fa5   :  { %v2759_v32 = vpop.permute.xlu0 %2758 }
0x1fa6   :  { %v2764_v16 = vmul.f32 %v2759_v32, %v2664_v31 }
0x1fa8   :  { %v2766_v19 = vadd.f32 %v2765_v41, %v2764_v16  ;;  %v7381_v41 = vld [vmem:[#allocation6 + $0xc0] sm:$0xff]  }
0x1fa9   :  { %v2763_v20 = vpop.permute.xlu0 %2762 }
0x1faa   :  { %5995 = vtanh.f32 %v2766_v19 }
0x1fb4   :  { %v5996_v49 = vpop.eup %5995 }
0x1fb5   :  { %v2768_v50 = vmul.f32 %v5996_v49, %v2763_v20  ;;  %v7393_v49 = vld [vmem:[#allocation6 + $0xd0] sm:$0xff]   ;;  %v7397_v20 = vld [vmem:[#allocation6 + $0xd8] sm:$0xff]  }
0x1fb7   :  { %v2769_v35 = vpack.c.bf16 %v2768_v50, %v2768_v50  ;;  %v7401_v50 = vld [vmem:[#allocation6 + $0xe0] sm:$0xff]  }
0x1fb9   :  { %5330 = vmatmul.mubr.bf16.vlgmr.msra.gmra.mrb[48].mxu0 %v2769_v35  ;;  %5350 = vmatmul.mubr.bf16.vlgmr.msra.gmra.mrb[72].mxu1 %v2769_v35  ;;  %v7405_v35 = vld [vmem:[#allocation6 + $0xe8] sm:$0xff]  }
0x1fba   :  { %5354 = vmatpush3.bf16.msra.mxu0 %v7076_v55  ;;  %5374 = vmatpush3.bf16.msra.mxu1 %v7012_v34 }
0x1fbb   :  { %5355 = vmatprep.subr.bf16.mxu0 %v6143_v0  ;;  %5375 = vmatprep.subr.bf16.mxu1 %v6143_v0 }
0x1fbc   :  { %5369 = vmatprep.mubr.msk.bf16.mxu0 %vm6144_vm0, %v6143_v0  ;;  %5389 = vmatprep.mubr.msk.bf16.mxu1 %vm6144_vm0, %v6143_v0 }
0x1fbe   :  { %5356 = vmatpush3.bf16.msra.mxu0 %v7079_v59  ;;  %5376 = vmatpush3.bf16.msra.mxu1 %v7018_v33 }
0x1fbf   :  { %5357 = vmatprep.subr.bf16.mxu0 %v6143_v0  ;;  %5377 = vmatprep.subr.bf16.mxu1 %v6143_v0 }
0x1fc2   :  { %5358 = vmatpush3.bf16.msra.mxu0 %v7083_v60  ;;  %5378 = vmatpush3.bf16.msra.mxu1 %v7024_v38 }
0x1fc3   :  { %5359 = vmatprep.subr.bf16.mxu0 %v6143_v0  ;;  %5379 = vmatprep.subr.bf16.mxu1 %v6143_v0 }
0x1fc6   :  { %5360 = vmatpush3.bf16.msra.mxu0 %v7089_v62  ;;  %5380 = vmatpush3.bf16.msra.mxu1 %v7028_v40 }
0x1fc7   :  { %5361 = vmatprep.subr.bf16.mxu0 %v6143_v0  ;;  %5381 = vmatprep.subr.bf16.mxu1 %v6143_v0 }
0x1fca   :  { %5362 = vmatpush3.bf16.msra.mxu0 %v7093_v25  ;;  %5382 = vmatpush3.bf16.msra.mxu1 %v7032_v42 }
0x1fcb   :  { %5363 = vmatprep.subr.bf16.mxu0 %v6143_v0  ;;  %5383 = vmatprep.subr.bf16.mxu1 %v6143_v0 }
0x1fce   :  { %5364 = vmatpush3.bf16.msra.mxu0 %v7097_v8  ;;  %5384 = vmatpush3.bf16.msra.mxu1 %v7036_v10 }
0x1fcf   :  { %5365 = vmatprep.subr.bf16.mxu0 %v6143_v0  ;;  %5385 = vmatprep.subr.bf16.mxu1 %v6143_v0 }
0x1fd2   :  { %5366 = vmatpush3.bf16.msra.mxu0 %v7101_v11  ;;  %5386 = vmatpush3.bf16.msra.mxu1 %v7040_v5 }
0x1fd3   :  { %5367 = vmatprep.subr.bf16.mxu0 %v6143_v0  ;;  %5387 = vmatprep.subr.bf16.mxu1 %v6143_v0 }
0x1fd6   :  { %5368 = vmatpush3.bf16.msra.mxu0 %v7106_v12  ;;  %5388 = vmatpush3.bf16.msra.mxu1 %v7044_v15 }
0x1fd7   :  { %5393 = vmatprep.subr.bf16.mxu0 %v6143_v0  ;;  %5413 = vmatprep.subr.bf16.mxu1 %v6143_v0 }
0x208c   :  { %v2846_v57 = vpop.f32.mrb[72].mxu1 }
0x208d   :  { %v5649_v58 = vadd.f32 %v7073_v48, %v2846_v57  ;;  %v5351_v61 = vpop.f32.mrb[73].mxu1  ;;  %v7409_v57 = vld [vmem:[#allocation6 + $0xf0] sm:$0xff]  }
0x208e   :  { %v2849_v23 = vpop.f32.mrb[74].mxu1  ;;  %v3914_v61 = vld [vmem:[%s7633_s4 + $0x18] sm:$0xff] }
0x208f   :  { %v3909_v24 = vmul.f32 -1.442695, %v5649_v58  ;;  %5997 = vtanh.f32 %v5649_v58  ;;  %v5352_v13 = vpop.f32.mrb[75].mxu1  ;;  %v7413_v58 = vld [vmem:[#allocation6 + $0xf8] sm:$0xff]   ;;  %v3142_v23 = vpack.c.bf16 %v3914_v61, %v3914_v61 }
0x2091   :  { %5999 = vpow2.f32 %v3909_v24  ;;  %v7442_v24 = vld [vmem:[%s7632_s3 + $0x3] ss:$0 sm:$0xff] }
0x2099   :  { %v5998_v14 = vpop.eup %5997 }
0x209a   :  { %2862 = vrot.lane.b32.xlu0 %v5998_v14, %s6147_s30 }
0x209b   :  { %v6000_v21 = vpop.eup %5999 }
0x209c   :  { %v2856_v22 = vadd.f32 1.0, %v6000_v21 }
0x209e   :  { %6001 = vrcp.f32 %v2856_v22 }
0x20a8   :  { %v6002_v51 = vpop.eup %6001 }
0x20a9   :  { %2860 = vrot.lane.b32.xlu1 %v6002_v51, %s6146_s29 }
0x20ad   :  { %2864 = vrot.lane.b32.xlu1 %v6002_v51, %s6145_s28 }
0x210c   :  { %v2863_v52 = vpop.permute.xlu0 %2862 }
0x210d   :  { %v2867_v63 = vmul.f32 %v6002_v51, %v2863_v52 }
0x211b   :  { %v2861_v26 = vpop.permute.xlu1 %2860 }
0x211c   :  { %v2866_v53 = vmul.f32 %v2861_v26, %v2766_v19  ;;  %v7387_v19 = vld [vmem:[#allocation6 + $0xc8] sm:$0xff]  }
0x211e   :  { %v2868_v1 = vadd.f32 %v2867_v63, %v2866_v53 }
0x211f   :  { %v2865_v45 = vpop.permute.xlu1 %2864 }
0x2120   :  { %6003 = vtanh.f32 %v2868_v1 }
0x212a   :  { %v6004_v54 = vpop.eup %6003 }
0x212b   :  { %v2870_v2 = vmul.f32 %v6004_v54, %v2865_v45  ;;  %v3915_v45 = vld [vmem:[%s7634_s5 + $0x18] sm:$0xff] }
0x212d   :  { %v2871_v56 = vpack.c.bf16 %v2870_v2, %v2870_v2 }
0x212f   :  { %5370 = vmatmul.mubr.bf16.vlgmr.msra.gmra.mrb[52].mxu0 %v2871_v56  ;;  %5390 = vmatmul.mubr.bf16.vlgmr.msra.gmra.mrb[76].mxu1 %v2871_v56 }
0x2130   :  { %5394 = vmatpush3.bf16.msra.mxu0 %v7076_v55  ;;  %5414 = vmatpush3.bf16.msra.mxu1 %v7012_v34 }
0x2131   :  { %5395 = vmatprep.subr.bf16.mxu0 %v6143_v0  ;;  %5415 = vmatprep.subr.bf16.mxu1 %v6143_v0 }
0x2132   :  { %5409 = vmatprep.mubr.msk.bf16.mxu0 %vm6144_vm0, %v6143_v0  ;;  %5429 = vmatprep.mubr.msk.bf16.mxu1 %vm6144_vm0, %v6143_v0 }
0x2134   :  { %5396 = vmatpush3.bf16.msra.mxu0 %v7079_v59  ;;  %5416 = vmatpush3.bf16.msra.mxu1 %v7018_v33 }
0x2135   :  { %5397 = vmatprep.subr.bf16.mxu0 %v6143_v0  ;;  %5417 = vmatprep.subr.bf16.mxu1 %v6143_v0 }
0x2138   :  { %5398 = vmatpush3.bf16.msra.mxu0 %v7083_v60  ;;  %5418 = vmatpush3.bf16.msra.mxu1 %v7024_v38 }
0x2139   :  { %5399 = vmatprep.subr.bf16.mxu0 %v6143_v0  ;;  %5419 = vmatprep.subr.bf16.mxu1 %v6143_v0 }
0x213c   :  { %5400 = vmatpush3.bf16.msra.mxu0 %v7089_v62  ;;  %5420 = vmatpush3.bf16.msra.mxu1 %v7028_v40 }
0x213d   :  { %5401 = vmatprep.subr.bf16.mxu0 %v6143_v0  ;;  %5421 = vmatprep.subr.bf16.mxu1 %v6143_v0 }
0x2140   :  { %5402 = vmatpush3.bf16.msra.mxu0 %v7093_v25  ;;  %5422 = vmatpush3.bf16.msra.mxu1 %v7032_v42 }
0x2141   :  { %5403 = vmatprep.subr.bf16.mxu0 %v6143_v0  ;;  %5423 = vmatprep.subr.bf16.mxu1 %v6143_v0 }
0x2144   :  { %5404 = vmatpush3.bf16.msra.mxu0 %v7097_v8  ;;  %5424 = vmatpush3.bf16.msra.mxu1 %v7036_v10 }
0x2145   :  { %5405 = vmatprep.subr.bf16.mxu0 %v6143_v0  ;;  %5425 = vmatprep.subr.bf16.mxu1 %v6143_v0 }
0x2148   :  { %5406 = vmatpush3.bf16.msra.mxu0 %v7101_v11  ;;  %5426 = vmatpush3.bf16.msra.mxu1 %v7040_v5 }
0x2149   :  { %5407 = vmatprep.subr.bf16.mxu0 %v6143_v0  ;;  %5427 = vmatprep.subr.bf16.mxu1 %v6143_v0 }
0x214c   :  { %5408 = vmatpush3.bf16.msra.mxu0 %v7106_v12  ;;  %5428 = vmatpush3.bf16.msra.mxu1 %v7044_v15 }
0x214d   :  { %5433 = vmatprep.subr.bf16.mxu0 %v6143_v0  ;;  %5613 = vmatprep.subr.bf16.mxu1 %v6143_v0 }
0x2202   :  { %v2948_v34 = vpop.f32.mrb[76].mxu1 }
0x2203   :  { %v5650_v33 = vadd.f32 %v7073_v48, %v2948_v34  ;;  %v5391_v38 = vpop.f32.mrb[77].mxu1 }
0x2204   :  { %v2951_v40 = vpop.f32.mrb[78].mxu1 }
0x2205   :  { %v3910_v42 = vmul.f32 -1.442695, %v5650_v33  ;;  %6005 = vtanh.f32 %v5650_v33  ;;  %v5392_v10 = vpop.f32.mrb[79].mxu1 }
0x2207   :  { %6007 = vpow2.f32 %v3910_v42 }
0x220f   :  { %v6006_v5 = vpop.eup %6005 }
0x2210   :  { %2964 = vrot.lane.b32.xlu1 %v6006_v5, %s6147_s30 }
0x2211   :  { %v6008_v28 = vpop.eup %6007 }
0x2212   :  { %v2958_v39 = vadd.f32 1.0, %v6008_v28 }
0x2214   :  { %6009 = vrcp.f32 %v2958_v39 }
0x221e   :  { %v6010_v15 = vpop.eup %6009 }
0x221f   :  { %2962 = vrot.lane.b32.xlu0 %v6010_v15, %s6146_s29 }
0x2223   :  { %2966 = vrot.lane.b32.xlu0 %v6010_v15, %s6145_s28 }
0x2282   :  { %v2965_v36 = vpop.permute.xlu1 %2964 }
0x2283   :  { %v2969_v43 = vmul.f32 %v6010_v15, %v2965_v36 }
0x2291   :  { %v2963_v31 = vpop.permute.xlu0 %2962 }
0x2292   :  { %v2968_v44 = vmul.f32 %v2963_v31, %v2868_v1 }
0x2294   :  { %v2970_v17 = vadd.f32 %v2969_v43, %v2968_v44 }
0x2295   :  { %v2967_v18 = vpop.permute.xlu0 %2966 }
0x2296   :  { %6011 = vtanh.f32 %v2970_v17 }
0x22a0   :  { %v6012_v37 = vpop.eup %6011 }
0x22a1   :  { %v2972_v3 = vmul.f32 %v6012_v37, %v2967_v18 }
0x22a3   :  { %v2973_v46 = vpack.c.bf16 %v2972_v3, %v2972_v3 }
0x22a5   :  { %5410 = vmatmul.mubr.bf16.vlgmr.msra.gmra.mrb[56].mxu0 %v2973_v46  ;;  %5430 = vmatmul.mubr.bf16.vlgmr.msra.gmra.mrb[80].mxu1 %v2973_v46 }
0x22a6   :  { %5434 = vmatpush3.bf16.msra.mxu0 %v7076_v55  ;;  %5449 = vmatprep.mubr.msk.bf16.mxu0 %vm6144_vm0, %v6143_v0 }
0x22a7   :  { %5435 = vmatprep.subr.bf16.mxu0 %v6143_v0  ;;  %5629 = vmatprep.mubr.msk.bf16.mxu1 %vm6144_vm0, %v6143_v0 }
0x22aa   :  { %5436 = vmatpush3.bf16.msra.mxu0 %v7079_v59 }
0x22ab   :  { %5437 = vmatprep.subr.bf16.mxu0 %v6143_v0 }
0x22ae   :  { %5438 = vmatpush3.bf16.msra.mxu0 %v7083_v60 }
0x22af   :  { %5439 = vmatprep.subr.bf16.mxu0 %v6143_v0 }
0x22b2   :  { %5440 = vmatpush3.bf16.msra.mxu0 %v7089_v62 }
0x22b3   :  { %5441 = vmatprep.subr.bf16.mxu0 %v6143_v0 }
0x22b6   :  { %5442 = vmatpush3.bf16.msra.mxu0 %v7093_v25 }
0x22b7   :  { %5443 = vmatprep.subr.bf16.mxu0 %v6143_v0 }
0x22ba   :  { %5444 = vmatpush3.bf16.msra.mxu0 %v7097_v8 }
0x22bb   :  { %5445 = vmatprep.subr.bf16.mxu0 %v6143_v0 }
0x22be   :  { %5446 = vmatpush3.bf16.msra.mxu0 %v7101_v11 }
0x22bf   :  { %5447 = vmatprep.subr.bf16.mxu0 %v6143_v0 }
0x22c2   :  { %5448 = vmatpush3.bf16.msra.mxu0 %v7106_v12 }
0x22c3   :  { %5453 = vmatprep.subr.bf16.mxu0 %v6143_v0 }
0x2378   :  { %v3050_v55 = vpop.f32.mrb[80].mxu1 }
0x2379   :  { %v5651_v59 = vadd.f32 %v7073_v48, %v3050_v55  ;;  %v5431_v60 = vpop.f32.mrb[81].mxu1 }
0x237a   :  { %v3053_v62 = vpop.f32.mrb[82].mxu1 }
0x237b   :  { %v3911_v25 = vmul.f32 -1.442695, %v5651_v59  ;;  %6013 = vtanh.f32 %v5651_v59  ;;  %v5432_v4 = vpop.f32.mrb[83].mxu1 }
0x237d   :  { %6015 = vpow2.f32 %v3911_v25 }
0x2385   :  { %v6014_v8 = vpop.eup %6013 }
0x2386   :  { %3066 = vrot.lane.b32.xlu0 %v6014_v8, %s6147_s30 }
0x2387   :  { %v6016_v47 = vpop.eup %6015 }
0x2388   :  { %v3060_v11 = vadd.f32 1.0, %v6016_v47 }
0x238a   :  { %6017 = vrcp.f32 %v3060_v11 }
0x2394   :  { %v6018_v6 = vpop.eup %6017 }
0x2395   :  { %3064 = vrot.lane.b32.xlu1 %v6018_v6, %s6146_s29 }
0x2399   :  { %3068 = vrot.lane.b32.xlu1 %v6018_v6, %s6145_s28 }
0x23f8   :  { %v3067_v12 = vpop.permute.xlu0 %3066 }
0x23f9   :  { %v3071_v48 = vmul.f32 %v6018_v6, %v3067_v12 }
0x2407   :  { %v3065_v30 = vpop.permute.xlu1 %3064 }
0x2408   :  { %v3070_v7 = vmul.f32 %v3065_v30, %v2970_v17 }
0x240a   :  { %v3072_v9 = vadd.f32 %v3071_v48, %v3070_v7 }
0x240b   :  { %v3069_v29 = vpop.permute.xlu1 %3068 }
0x240c   :  { %6019 = vtanh.f32 %v3072_v9  ;;  %3913 = vst [vmem:[%s7639_s10 + $0x10] sm:$0xff] %v3072_v9 }
0x2416   :  { %v6020_v27 = vpop.eup %6019 }
0x2417   :  { %v3074_v32 = vmul.f32 %v6020_v27, %v3069_v29 }
0x2419   :  { %v3075_v16 = vpack.c.bf16 %v3074_v32, %v3074_v32  ;;  %3912 = vst [vmem:[%s7638_s9 + $0x10] sm:$0xff] %v3074_v32 }
0x241b   :  { %5450 = vmatmul.mubr.bf16.vlgmr.msra.gmra.mrb[60].mxu0 %v3075_v16 }
0x241c   :  { %5454 = vmatpush3.bf16.msra.mxu0 %v7381_v41  ;;  %5469 = vmatprep.mubr.msk.bf16.mxu0 %vm6144_vm0, %v6143_v0 }
0x241d   :  { %5455 = vmatprep.subr.bf16.mxu0 %v6143_v0 }
0x2420   :  { %5456 = vmatpush3.bf16.msra.mxu0 %v7387_v19 }
0x2421   :  { %5457 = vmatprep.subr.bf16.mxu0 %v6143_v0 }
0x2424   :  { %5458 = vmatpush3.bf16.msra.mxu0 %v7393_v49 }
0x2425   :  { %5459 = vmatprep.subr.bf16.mxu0 %v6143_v0 }
0x2428   :  { %5460 = vmatpush3.bf16.msra.mxu0 %v7397_v20 }
0x2429   :  { %5461 = vmatprep.subr.bf16.mxu0 %v6143_v0 }
0x242c   :  { %5462 = vmatpush3.bf16.msra.mxu0 %v7401_v50 }
0x242d   :  { %5463 = vmatprep.subr.bf16.mxu0 %v6143_v0 }
0x2430   :  { %5464 = vmatpush3.bf16.msra.mxu0 %v7405_v35 }
0x2431   :  { %5465 = vmatprep.subr.bf16.mxu0 %v6143_v0 }
0x2434   :  { %5466 = vmatpush3.bf16.msra.mxu0 %v7409_v57 }
0x2435   :  { %5467 = vmatprep.subr.bf16.mxu0 %v6143_v0 }
0x2438   :  { %5468 = vmatpush3.bf16.msra.mxu0 %v7413_v58 }
0x2439   :  { %5473 = vmatprep.subr.bf16.mxu0 %v6143_v0 }
0x243b   :  { %5470 = vmatmul.mubr.bf16.vlgmr.msra.gmra.mrb[32].mxu0 %v3142_v23 }
0x243c   :  { %5474 = vmatpush3.bf16.msra.mxu0 %v7381_v41  ;;  %5489 = vmatprep.mubr.msk.bf16.mxu0 %vm6144_vm0, %v6143_v0 }
0x243d   :  { %5475 = vmatprep.subr.bf16.mxu0 %v6143_v0 }
0x2440   :  { %5476 = vmatpush3.bf16.msra.mxu0 %v7387_v19 }
0x2441   :  { %5477 = vmatprep.subr.bf16.mxu0 %v6143_v0 }
0x2444   :  { %5478 = vmatpush3.bf16.msra.mxu0 %v7393_v49 }
0x2445   :  { %5479 = vmatprep.subr.bf16.mxu0 %v6143_v0 }
0x2448   :  { %5480 = vmatpush3.bf16.msra.mxu0 %v7397_v20 }
0x2449   :  { %5481 = vmatprep.subr.bf16.mxu0 %v6143_v0 }
0x244c   :  { %5482 = vmatpush3.bf16.msra.mxu0 %v7401_v50 }
0x244d   :  { %5483 = vmatprep.subr.bf16.mxu0 %v6143_v0 }
0x2450   :  { %5484 = vmatpush3.bf16.msra.mxu0 %v7405_v35 }
0x2451   :  { %5485 = vmatprep.subr.bf16.mxu0 %v6143_v0 }
0x2454   :  { %5486 = vmatpush3.bf16.msra.mxu0 %v7409_v57 }
0x2455   :  { %5487 = vmatprep.subr.bf16.mxu0 %v6143_v0 }
0x2458   :  { %5488 = vmatpush3.bf16.msra.mxu0 %v7413_v58 }
0x2459   :  { %5493 = vmatprep.subr.bf16.mxu0 %v6143_v0 }
0x250e   :  { %v3226_v13 = vpop.f32.mrb[32].mxu0 }
0x250f   :  { %v5652_v14 = vadd.f32 %v7442_v24, %v3226_v13  ;;  %v5471_v21 = vpop.f32.mrb[33].mxu0 }
0x2510   :  { %v3229_v22 = vpop.f32.mrb[34].mxu0 }
0x2511   :  { %v3924_v51 = vmul.f32 -1.442695, %v5652_v14  ;;  %6021 = vtanh.f32 %v5652_v14  ;;  %v5472_v52 = vpop.f32.mrb[35].mxu0 }
0x2513   :  { %6023 = vpow2.f32 %v3924_v51 }
0x251b   :  { %v6022_v26 = vpop.eup %6021 }
0x251c   :  { %3242 = vrot.lane.b32.xlu1 %v6022_v26, %s6147_s30 }
0x251d   :  { %v6024_v63 = vpop.eup %6023 }
0x251e   :  { %v3236_v53 = vadd.f32 1.0, %v6024_v63 }
0x2520   :  { %6025 = vrcp.f32 %v3236_v53 }
0x252a   :  { %v6026_v1 = vpop.eup %6025 }
0x252b   :  { %3240 = vrot.lane.b32.xlu0 %v6026_v1, %s6146_s29 }
0x252f   :  { %3244 = vrot.lane.b32.xlu0 %v6026_v1, %s6145_s28 }
0x258e   :  { %v3243_v54 = vpop.permute.xlu1 %3242 }
0x258f   :  { %v3247_v56 = vmul.f32 %v6026_v1, %v3243_v54 }
0x259d   :  { %v3241_v2 = vpop.permute.xlu0 %3240 }
0x259e   :  { %v3246_v34 = vmul.f32 %v3915_v45, %v3241_v2 }
0x25a0   :  { %v3248_v33 = vadd.f32 %v3247_v56, %v3246_v34 }
0x25a1   :  { %v3245_v40 = vpop.permute.xlu0 %3244 }
0x25a2   :  { %6027 = vtanh.f32 %v3248_v33 }
0x25ac   :  { %v6028_v38 = vpop.eup %6027 }
0x25ad   :  { %v3250_v42 = vmul.f32 %v6028_v38, %v3245_v40 }
0x25af   :  { %v3251_v10 = vpack.c.bf16 %v3250_v42, %v3250_v42 }
0x25b1   :  { %5490 = vmatmul.mubr.bf16.vlgmr.msra.gmra.mrb[36].mxu0 %v3251_v10 }
0x25b2   :  { %5494 = vmatpush3.bf16.msra.mxu0 %v7381_v41  ;;  %5509 = vmatprep.mubr.msk.bf16.mxu0 %vm6144_vm0, %v6143_v0 }
0x25b3   :  { %5495 = vmatprep.subr.bf16.mxu0 %v6143_v0 }
0x25b6   :  { %5496 = vmatpush3.bf16.msra.mxu0 %v7387_v19 }
0x25b7   :  { %5497 = vmatprep.subr.bf16.mxu0 %v6143_v0 }
0x25ba   :  { %5498 = vmatpush3.bf16.msra.mxu0 %v7393_v49 }
0x25bb   :  { %5499 = vmatprep.subr.bf16.mxu0 %v6143_v0 }
0x25be   :  { %5500 = vmatpush3.bf16.msra.mxu0 %v7397_v20 }
0x25bf   :  { %5501 = vmatprep.subr.bf16.mxu0 %v6143_v0 }
0x25c2   :  { %5502 = vmatpush3.bf16.msra.mxu0 %v7401_v50 }
0x25c3   :  { %5503 = vmatprep.subr.bf16.mxu0 %v6143_v0 }
0x25c6   :  { %5504 = vmatpush3.bf16.msra.mxu0 %v7405_v35 }
0x25c7   :  { %5505 = vmatprep.subr.bf16.mxu0 %v6143_v0 }
0x25ca   :  { %5506 = vmatpush3.bf16.msra.mxu0 %v7409_v57 }
0x25cb   :  { %5507 = vmatprep.subr.bf16.mxu0 %v6143_v0 }
0x25ce   :  { %5508 = vmatpush3.bf16.msra.mxu0 %v7413_v58 }
0x25cf   :  { %5513 = vmatprep.subr.bf16.mxu0 %v6143_v0 }
0x2684   :  { %v3287_v5 = vpop.f32.mrb[36].mxu0 }
0x2685   :  { %v5653_v28 = vadd.f32 %v7442_v24, %v3287_v5  ;;  %v5491_v39 = vpop.f32.mrb[37].mxu0 }
0x2686   :  { %v3290_v15 = vpop.f32.mrb[38].mxu0 }
0x2687   :  { %v3925_v36 = vmul.f32 -1.442695, %v5653_v28  ;;  %6029 = vtanh.f32 %v5653_v28  ;;  %v5492_v31 = vpop.f32.mrb[39].mxu0 }
0x2689   :  { %6031 = vpow2.f32 %v3925_v36 }
0x2691   :  { %v6030_v43 = vpop.eup %6029 }
0x2692   :  { %3303 = vrot.lane.b32.xlu0 %v6030_v43, %s6147_s30 }
0x2693   :  { %v6032_v44 = vpop.eup %6031 }
0x2694   :  { %v3297_v17 = vadd.f32 1.0, %v6032_v44 }
0x2696   :  { %6033 = vrcp.f32 %v3297_v17 }
0x26a0   :  { %v6034_v37 = vpop.eup %6033 }
0x26a1   :  { %3301 = vrot.lane.b32.xlu1 %v6034_v37, %s6146_s29 }
0x26a5   :  { %3305 = vrot.lane.b32.xlu1 %v6034_v37, %s6145_s28 }
0x2704   :  { %v3304_v18 = vpop.permute.xlu0 %3303 }
0x2705   :  { %v3308_v46 = vmul.f32 %v6034_v37, %v3304_v18 }
0x2713   :  { %v3302_v3 = vpop.permute.xlu1 %3301 }
0x2714   :  { %v3307_v55 = vmul.f32 %v3302_v3, %v3248_v33 }
0x2716   :  { %v3309_v59 = vadd.f32 %v3308_v46, %v3307_v55 }
0x2717   :  { %v3306_v62 = vpop.permute.xlu1 %3305 }
0x2718   :  { %6035 = vtanh.f32 %v3309_v59 }
0x2722   :  { %v6036_v60 = vpop.eup %6035 }
0x2723   :  { %v3311_v25 = vmul.f32 %v6036_v60, %v3306_v62 }
0x2725   :  { %v3312_v4 = vpack.c.bf16 %v3311_v25, %v3311_v25 }
0x2727   :  { %5510 = vmatmul.mubr.bf16.vlgmr.msra.gmra.mrb[40].mxu0 %v3312_v4 }
0x2728   :  { %5514 = vmatpush3.bf16.msra.mxu0 %v7381_v41  ;;  %5529 = vmatprep.mubr.msk.bf16.mxu0 %vm6144_vm0, %v6143_v0 }
0x2729   :  { %5515 = vmatprep.subr.bf16.mxu0 %v6143_v0 }
0x272c   :  { %5516 = vmatpush3.bf16.msra.mxu0 %v7387_v19 }
0x272d   :  { %5517 = vmatprep.subr.bf16.mxu0 %v6143_v0 }
0x2730   :  { %5518 = vmatpush3.bf16.msra.mxu0 %v7393_v49 }
0x2731   :  { %5519 = vmatprep.subr.bf16.mxu0 %v6143_v0 }
0x2734   :  { %5520 = vmatpush3.bf16.msra.mxu0 %v7397_v20 }
0x2735   :  { %5521 = vmatprep.subr.bf16.mxu0 %v6143_v0 }
0x2738   :  { %5522 = vmatpush3.bf16.msra.mxu0 %v7401_v50 }
0x2739   :  { %5523 = vmatprep.subr.bf16.mxu0 %v6143_v0 }
0x273c   :  { %5524 = vmatpush3.bf16.msra.mxu0 %v7405_v35 }
0x273d   :  { %5525 = vmatprep.subr.bf16.mxu0 %v6143_v0 }
0x2740   :  { %5526 = vmatpush3.bf16.msra.mxu0 %v7409_v57 }
0x2741   :  { %5527 = vmatprep.subr.bf16.mxu0 %v6143_v0 }
0x2744   :  { %5528 = vmatpush3.bf16.msra.mxu0 %v7413_v58 }
0x2745   :  { %5533 = vmatprep.subr.bf16.mxu0 %v6143_v0 }
0x27fa   :  { %v3348_v8 = vpop.f32.mrb[40].mxu0 }
0x27fb   :  { %v5654_v47 = vadd.f32 %v7442_v24, %v3348_v8  ;;  %v5511_v11 = vpop.f32.mrb[41].mxu0 }
0x27fc   :  { %v3351_v6 = vpop.f32.mrb[42].mxu0 }
0x27fd   :  { %v3926_v12 = vmul.f32 -1.442695, %v5654_v47  ;;  %6037 = vtanh.f32 %v5654_v47  ;;  %v5512_v30 = vpop.f32.mrb[43].mxu0 }
0x27ff   :  { %6039 = vpow2.f32 %v3926_v12 }
0x2807   :  { %v6038_v48 = vpop.eup %6037 }
0x2808   :  { %3364 = vrot.lane.b32.xlu1 %v6038_v48, %s6147_s30 }
0x2809   :  { %v6040_v7 = vpop.eup %6039 }
0x280a   :  { %v3358_v9 = vadd.f32 1.0, %v6040_v7 }
0x280c   :  { %6041 = vrcp.f32 %v3358_v9 }
0x2816   :  { %v6042_v27 = vpop.eup %6041 }
0x2817   :  { %3362 = vrot.lane.b32.xlu0 %v6042_v27, %s6146_s29 }
0x281b   :  { %3366 = vrot.lane.b32.xlu0 %v6042_v27, %s6145_s28 }
0x287a   :  { %v3365_v29 = vpop.permute.xlu1 %3364 }
0x287b   :  { %v3369_v16 = vmul.f32 %v6042_v27, %v3365_v29 }
0x2889   :  { %v3363_v32 = vpop.permute.xlu0 %3362 }
0x288a   :  { %v3368_v61 = vmul.f32 %v3363_v32, %v3309_v59 }
0x288c   :  { %v3370_v23 = vadd.f32 %v3369_v16, %v3368_v61 }
0x288d   :  { %v3367_v14 = vpop.permute.xlu0 %3366 }
0x288e   :  { %6043 = vtanh.f32 %v3370_v23 }
0x2898   :  { %v6044_v13 = vpop.eup %6043 }
0x2899   :  { %v3372_v21 = vmul.f32 %v6044_v13, %v3367_v14 }
0x289b   :  { %v3373_v22 = vpack.c.bf16 %v3372_v21, %v3372_v21 }
0x289d   :  { %5530 = vmatmul.mubr.bf16.vlgmr.msra.gmra.mrb[44].mxu0 %v3373_v22 }
0x289e   :  { %5534 = vmatpush3.bf16.msra.mxu0 %v7381_v41  ;;  %5549 = vmatprep.mubr.msk.bf16.mxu0 %vm6144_vm0, %v6143_v0 }
0x289f   :  { %5535 = vmatprep.subr.bf16.mxu0 %v6143_v0 }
0x28a2   :  { %5536 = vmatpush3.bf16.msra.mxu0 %v7387_v19 }
0x28a3   :  { %5537 = vmatprep.subr.bf16.mxu0 %v6143_v0 }
0x28a6   :  { %5538 = vmatpush3.bf16.msra.mxu0 %v7393_v49 }
0x28a7   :  { %5539 = vmatprep.subr.bf16.mxu0 %v6143_v0 }
0x28aa   :  { %5540 = vmatpush3.bf16.msra.mxu0 %v7397_v20 }
0x28ab   :  { %5541 = vmatprep.subr.bf16.mxu0 %v6143_v0 }
0x28ae   :  { %5542 = vmatpush3.bf16.msra.mxu0 %v7401_v50 }
0x28af   :  { %5543 = vmatprep.subr.bf16.mxu0 %v6143_v0 }
0x28b2   :  { %5544 = vmatpush3.bf16.msra.mxu0 %v7405_v35 }
0x28b3   :  { %5545 = vmatprep.subr.bf16.mxu0 %v6143_v0 }
0x28b6   :  { %5546 = vmatpush3.bf16.msra.mxu0 %v7409_v57 }
0x28b7   :  { %5547 = vmatprep.subr.bf16.mxu0 %v6143_v0 }
0x28ba   :  { %5548 = vmatpush3.bf16.msra.mxu0 %v7413_v58 }
0x28bb   :  { %5553 = vmatprep.subr.bf16.mxu0 %v6143_v0 }
0x2970   :  { %v3409_v51 = vpop.f32.mrb[44].mxu0 }
0x2971   :  { %v5655_v52 = vadd.f32 %v7442_v24, %v3409_v51  ;;  %v5531_v26 = vpop.f32.mrb[45].mxu0 }
0x2972   :  { %v3412_v63 = vpop.f32.mrb[46].mxu0 }
0x2973   :  { %v3927_v53 = vmul.f32 -1.442695, %v5655_v52  ;;  %6045 = vtanh.f32 %v5655_v52  ;;  %v5532_v1 = vpop.f32.mrb[47].mxu0 }
0x2975   :  { %6047 = vpow2.f32 %v3927_v53 }
0x297d   :  { %v6046_v54 = vpop.eup %6045 }
0x297e   :  { %3425 = vrot.lane.b32.xlu0 %v6046_v54, %s6147_s30 }
0x297f   :  { %v6048_v45 = vpop.eup %6047 }
0x2980   :  { %v3419_v2 = vadd.f32 1.0, %v6048_v45 }
0x2982   :  { %6049 = vrcp.f32 %v3419_v2 }
0x298c   :  { %v6050_v56 = vpop.eup %6049 }
0x298d   :  { %3423 = vrot.lane.b32.xlu1 %v6050_v56, %s6146_s29 }
0x2991   :  { %3427 = vrot.lane.b32.xlu1 %v6050_v56, %s6145_s28 }
0x29f0   :  { %v3426_v34 = vpop.permute.xlu0 %3425 }
0x29f1   :  { %v3430_v38 = vmul.f32 %v6050_v56, %v3426_v34 }
0x29ff   :  { %v3424_v33 = vpop.permute.xlu1 %3423 }
0x2a00   :  { %v3429_v40 = vmul.f32 %v3424_v33, %v3370_v23 }
0x2a02   :  { %v3431_v42 = vadd.f32 %v3430_v38, %v3429_v40 }
0x2a03   :  { %v3428_v5 = vpop.permute.xlu1 %3427 }
0x2a04   :  { %6051 = vtanh.f32 %v3431_v42 }
0x2a0e   :  { %v6052_v10 = vpop.eup %6051 }
0x2a0f   :  { %v3433_v28 = vmul.f32 %v6052_v10, %v3428_v5 }
0x2a11   :  { %v3434_v39 = vpack.c.bf16 %v3433_v28, %v3433_v28  ;;  %v5821_v28 = vld [vmem:[%s7635_s6] sm:$0xff]  }
0x2a12   :  { %5614 = vmatpush3.bf16.msra.mxu1 %v5821_v28 }
0x2a13   :  { %5550 = vmatmul.mubr.bf16.vlgmr.msra.gmra.mrb[48].mxu0 %v3434_v39  ;;  %5615 = vmatprep.subr.bf16.mxu1 %v6143_v0 }
0x2a14   :  { %5554 = vmatpush3.bf16.msra.mxu0 %v7381_v41  ;;  %5569 = vmatprep.mubr.msk.bf16.mxu0 %vm6144_vm0, %v6143_v0 }
0x2a15   :  { %5555 = vmatprep.subr.bf16.mxu0 %v6143_v0 }
0x2a18   :  { %5556 = vmatpush3.bf16.msra.mxu0 %v7387_v19 }
0x2a19   :  { %5557 = vmatprep.subr.bf16.mxu0 %v6143_v0 }
0x2a1c   :  { %5558 = vmatpush3.bf16.msra.mxu0 %v7393_v49 }
0x2a1d   :  { %5559 = vmatprep.subr.bf16.mxu0 %v6143_v0 }
0x2a20   :  { %5560 = vmatpush3.bf16.msra.mxu0 %v7397_v20 }
0x2a21   :  { %5561 = vmatprep.subr.bf16.mxu0 %v6143_v0 }
0x2a24   :  { %5562 = vmatpush3.bf16.msra.mxu0 %v7401_v50 }
0x2a25   :  { %5563 = vmatprep.subr.bf16.mxu0 %v6143_v0 }
0x2a28   :  { %5564 = vmatpush3.bf16.msra.mxu0 %v7405_v35 }
0x2a29   :  { %5565 = vmatprep.subr.bf16.mxu0 %v6143_v0 }
0x2a2c   :  { %5566 = vmatpush3.bf16.msra.mxu0 %v7409_v57 }
0x2a2d   :  { %5567 = vmatprep.subr.bf16.mxu0 %v6143_v0 }
0x2a30   :  { %5568 = vmatpush3.bf16.msra.mxu0 %v7413_v58 }
0x2a31   :  { %5573 = vmatprep.subr.bf16.mxu0 %v6143_v0 }
0x2ae6   :  { %v3470_v15 = vpop.f32.mrb[48].mxu0 }
0x2ae7   :  { %v5656_v36 = vadd.f32 %v7442_v24, %v3470_v15  ;;  %v5551_v31 = vpop.f32.mrb[49].mxu0 }
0x2ae8   :  { %v3473_v43 = vpop.f32.mrb[50].mxu0  ;;  %v5822_v31 = vld [vmem:[%s7635_s6 + $0x8] sm:$0xff]  }
0x2ae9   :  { %v3928_v44 = vmul.f32 -1.442695, %v5656_v36  ;;  %6053 = vtanh.f32 %v5656_v36  ;;  %v5552_v17 = vpop.f32.mrb[51].mxu0  ;;  %5616 = vmatpush3.bf16.msra.mxu1 %v5822_v31 }
0x2aea   :  { %5617 = vmatprep.subr.bf16.mxu1 %v6143_v0 }
0x2aeb   :  { %6055 = vpow2.f32 %v3928_v44  ;;  %v5824_v44 = vld [vmem:[%s7635_s6 + $0x18] sm:$0xff]  }
0x2af3   :  { %v6054_v37 = vpop.eup %6053 }
0x2af4   :  { %3486 = vrot.lane.b32.xlu1 %v6054_v37, %s6147_s30 }
0x2af5   :  { %v6056_v18 = vpop.eup %6055 }
0x2af6   :  { %v3480_v3 = vadd.f32 1.0, %v6056_v18  ;;  %v5825_v18 = vld [vmem:[%s7635_s6 + $0x20] sm:$0xff]  }
0x2af8   :  { %6057 = vrcp.f32 %v3480_v3  ;;  %v5826_v3 = vld [vmem:[%s7635_s6 + $0x28] sm:$0xff]  }
0x2b02   :  { %v6058_v46 = vpop.eup %6057 }
0x2b03   :  { %3484 = vrot.lane.b32.xlu0 %v6058_v46, %s6146_s29 }
0x2b07   :  { %3488 = vrot.lane.b32.xlu0 %v6058_v46, %s6145_s28 }
0x2b66   :  { %v3487_v55 = vpop.permute.xlu1 %3486 }
0x2b67   :  { %v3491_v60 = vmul.f32 %v6058_v46, %v3487_v55  ;;  %v5827_v46 = vld [vmem:[%s7635_s6 + $0x30] sm:$0xff]  }
0x2b75   :  { %v3485_v59 = vpop.permute.xlu0 %3484 }
0x2b76   :  { %v3490_v62 = vmul.f32 %v3485_v59, %v3431_v42  ;;  %v5828_v59 = vld [vmem:[%s7635_s6 + $0x38] sm:$0xff]  }
0x2b78   :  { %v3492_v25 = vadd.f32 %v3491_v60, %v3490_v62 }
0x2b79   :  { %v3489_v8 = vpop.permute.xlu0 %3488 }
0x2b7a   :  { %6059 = vtanh.f32 %v3492_v25 }
0x2b84   :  { %v6060_v4 = vpop.eup %6059 }
0x2b85   :  { %v3494_v47 = vmul.f32 %v6060_v4, %v3489_v8 }
0x2b87   :  { %v3495_v11 = vpack.c.bf16 %v3494_v47, %v3494_v47 }
0x2b89   :  { %5570 = vmatmul.mubr.bf16.vlgmr.msra.gmra.mrb[52].mxu0 %v3495_v11 }
0x2b8a   :  { %5574 = vmatpush3.bf16.msra.mxu0 %v7381_v41  ;;  %5589 = vmatprep.mubr.msk.bf16.mxu0 %vm6144_vm0, %v6143_v0 }
0x2b8b   :  { %5575 = vmatprep.subr.bf16.mxu0 %v6143_v0 }
0x2b8e   :  { %5576 = vmatpush3.bf16.msra.mxu0 %v7387_v19 }
0x2b8f   :  { %5577 = vmatprep.subr.bf16.mxu0 %v6143_v0 }
0x2b92   :  { %5578 = vmatpush3.bf16.msra.mxu0 %v7393_v49 }
0x2b93   :  { %5579 = vmatprep.subr.bf16.mxu0 %v6143_v0 }
0x2b96   :  { %5580 = vmatpush3.bf16.msra.mxu0 %v7397_v20 }
0x2b97   :  { %5581 = vmatprep.subr.bf16.mxu0 %v6143_v0 }
0x2b9a   :  { %5582 = vmatpush3.bf16.msra.mxu0 %v7401_v50 }
0x2b9b   :  { %5583 = vmatprep.subr.bf16.mxu0 %v6143_v0 }
0x2b9e   :  { %5584 = vmatpush3.bf16.msra.mxu0 %v7405_v35 }
0x2b9f   :  { %5585 = vmatprep.subr.bf16.mxu0 %v6143_v0 }
0x2ba2   :  { %5586 = vmatpush3.bf16.msra.mxu0 %v7409_v57 }
0x2ba3   :  { %5587 = vmatprep.subr.bf16.mxu0 %v6143_v0 }
0x2ba6   :  { %5588 = vmatpush3.bf16.msra.mxu0 %v7413_v58 }
0x2ba7   :  { %5593 = vmatprep.subr.bf16.mxu0 %v6143_v0 }
0x2c5c   :  { %v3531_v6 = vpop.f32.mrb[52].mxu0 }
0x2c5d   :  { %v5657_v12 = vadd.f32 %v7442_v24, %v3531_v6  ;;  %v5571_v30 = vpop.f32.mrb[53].mxu0 }
0x2c5e   :  { %v3534_v48 = vpop.f32.mrb[54].mxu0 }
0x2c5f   :  { %v3929_v7 = vmul.f32 -1.442695, %v5657_v12  ;;  %6061 = vtanh.f32 %v5657_v12  ;;  %v5572_v9 = vpop.f32.mrb[55].mxu0  ;;  %v3934_v12 = vld [vmem:[%s7636_s7] ss:$0 sm:$0xff] }
0x2c61   :  { %6063 = vpow2.f32 %v3929_v7 }
0x2c69   :  { %v6062_v27 = vpop.eup %6061 }
0x2c6a   :  { %3547 = vrot.lane.b32.xlu0 %v6062_v27, %s6147_s30 }
0x2c6b   :  { %v6064_v29 = vpop.eup %6063 }
0x2c6c   :  { %v3541_v32 = vadd.f32 1.0, %v6064_v29 }
0x2c6e   :  { %6065 = vrcp.f32 %v3541_v32 }
0x2c78   :  { %v6066_v16 = vpop.eup %6065 }
0x2c79   :  { %3545 = vrot.lane.b32.xlu1 %v6066_v16, %s6146_s29 }
0x2c7d   :  { %3549 = vrot.lane.b32.xlu1 %v6066_v16, %s6145_s28 }
0x2cdc   :  { %v3548_v61 = vpop.permute.xlu0 %3547 }
0x2cdd   :  { %v3552_v13 = vmul.f32 %v6066_v16, %v3548_v61 }
0x2ceb   :  { %v3546_v23 = vpop.permute.xlu1 %3545 }
0x2cec   :  { %v3551_v14 = vmul.f32 %v3546_v23, %v3492_v25 }
0x2cee   :  { %v3553_v21 = vadd.f32 %v3552_v13, %v3551_v14 }
0x2cef   :  { %v3550_v51 = vpop.permute.xlu1 %3549 }
0x2cf0   :  { %6067 = vtanh.f32 %v3553_v21 }
0x2cfa   :  { %v6068_v22 = vpop.eup %6067 }
0x2cfb   :  { %v3555_v52 = vmul.f32 %v6068_v22, %v3550_v51 }
0x2cfd   :  { %v3556_v26 = vpack.c.bf16 %v3555_v52, %v3555_v52 }
0x2cff   :  { %5590 = vmatmul.mubr.bf16.vlgmr.msra.gmra.mrb[56].mxu0 %v3556_v26 }
0x2d00   :  { %5594 = vmatpush3.bf16.msra.mxu0 %v7381_v41  ;;  %5609 = vmatprep.mubr.msk.bf16.mxu0 %vm6144_vm0, %v6143_v0 }
0x2d01   :  { %5595 = vmatprep.subr.bf16.mxu0 %v6143_v0 }
0x2d04   :  { %5596 = vmatpush3.bf16.msra.mxu0 %v7387_v19 }
0x2d05   :  { %5597 = vmatprep.subr.bf16.mxu0 %v6143_v0 }
0x2d08   :  { %5598 = vmatpush3.bf16.msra.mxu0 %v7393_v49 }
0x2d09   :  { %5599 = vmatprep.subr.bf16.mxu0 %v6143_v0 }
0x2d0c   :  { %5600 = vmatpush3.bf16.msra.mxu0 %v7397_v20 }
0x2d0d   :  { %5601 = vmatprep.subr.bf16.mxu0 %v6143_v0 }
0x2d10   :  { %5602 = vmatpush3.bf16.msra.mxu0 %v7401_v50 }
0x2d11   :  { %5603 = vmatprep.subr.bf16.mxu0 %v6143_v0 }
0x2d14   :  { %5604 = vmatpush3.bf16.msra.mxu0 %v7405_v35 }
0x2d15   :  { %5605 = vmatprep.subr.bf16.mxu0 %v6143_v0 }
0x2d18   :  { %5606 = vmatpush3.bf16.msra.mxu0 %v7409_v57 }
0x2d19   :  { %5607 = vmatprep.subr.bf16.mxu0 %v6143_v0 }
0x2d1c   :  { %5608 = vmatpush3.bf16.msra.mxu0 %v7413_v58 }
0x2dd2   :  { %v3592_v41 = vpop.f32.mrb[56].mxu0 }
0x2dd3   :  { %v5658_v19 = vadd.f32 %v7442_v24, %v3592_v41  ;;  %v5591_v49 = vpop.f32.mrb[57].mxu0 }
0x2dd4   :  { %v3595_v20 = vpop.f32.mrb[58].mxu0 }
0x2dd5   :  { %v3930_v63 = vmul.f32 -1.442695, %v5658_v19  ;;  %6069 = vtanh.f32 %v5658_v19  ;;  %v5592_v50 = vpop.f32.mrb[59].mxu0 }
0x2dd7   :  { %6071 = vpow2.f32 %v3930_v63 }
0x2ddf   :  { %v6070_v53 = vpop.eup %6069 }
0x2de0   :  { %3608 = vrot.lane.b32.xlu1 %v6070_v53, %s6147_s30 }
0x2de1   :  { %v6072_v35 = vpop.eup %6071 }
0x2de2   :  { %v3602_v1 = vadd.f32 1.0, %v6072_v35 }
0x2de4   :  { %6073 = vrcp.f32 %v3602_v1 }
0x2dee   :  { %v6074_v57 = vpop.eup %6073 }
0x2def   :  { %3606 = vrot.lane.b32.xlu0 %v6074_v57, %s6146_s29 }
0x2df3   :  { %3610 = vrot.lane.b32.xlu0 %v6074_v57, %s6145_s28 }
0x2e52   :  { %v3609_v58 = vpop.permute.xlu1 %3608 }
0x2e53   :  { %v3613_v45 = vmul.f32 %v6074_v57, %v3609_v58 }
0x2e61   :  { %v3607_v54 = vpop.permute.xlu0 %3606 }
0x2e62   :  { %v3612_v2 = vmul.f32 %v3607_v54, %v3553_v21 }
0x2e64   :  { %v3614_v56 = vadd.f32 %v3613_v45, %v3612_v2 }
0x2e65   :  { %v3611_v33 = vpop.permute.xlu0 %3610 }
0x2e66   :  { %6075 = vtanh.f32 %v3614_v56 }
0x2e70   :  { %v6076_v34 = vpop.eup %6075 }
0x2e71   :  { %v3616_v38 = vmul.f32 %v6076_v34, %v3611_v33 }
0x2e73   :  { %v3617_v40 = vpack.c.bf16 %v3616_v38, %v3616_v38 }
0x2e75   :  { %5610 = vmatmul.mubr.bf16.vlgmr.msra.gmra.mrb[60].mxu0 %v3617_v40 }
0x2f48   :  { %v3653_v42 = vpop.f32.mrb[60].mxu0 }
0x2f49   :  { %v5659_v10 = vadd.f32 %v7442_v24, %v3653_v42  ;;  %v5611_v5 = vpop.f32.mrb[61].mxu0  ;;  %v5823_v24 = vld [vmem:[%s7635_s6 + $0x10] sm:$0xff]  }
0x2f4a   :  { %v3656_v39 = vpop.f32.mrb[62].mxu0  ;;  %5618 = vmatpush3.bf16.msra.mxu1 %v5823_v24 }
0x2f4b   :  { %v3931_v15 = vmul.f32 -1.442695, %v5659_v10  ;;  %6077 = vtanh.f32 %v5659_v10  ;;  %v5612_v36 = vpop.f32.mrb[63].mxu0  ;;  %5619 = vmatprep.subr.bf16.mxu1 %v6143_v0 }
0x2f4d   :  { %6079 = vpow2.f32 %v3931_v15 }
0x2f4e   :  { %5620 = vmatpush3.bf16.msra.mxu1 %v5824_v44 }
0x2f4f   :  { %5621 = vmatprep.subr.bf16.mxu1 %v6143_v0 }
0x2f52   :  { %5622 = vmatpush3.bf16.msra.mxu1 %v5825_v18 }
0x2f53   :  { %5623 = vmatprep.subr.bf16.mxu1 %v6143_v0 }
0x2f55   :  { %v6078_v43 = vpop.eup %6077 }
0x2f56   :  { %3669 = vrot.lane.b32.xlu0 %v6078_v43, %s6147_s30  ;;  %5624 = vmatpush3.bf16.msra.mxu1 %v5826_v3 }
0x2f57   :  { %v6080_v17 = vpop.eup %6079  ;;  %5625 = vmatprep.subr.bf16.mxu1 %v6143_v0 }
0x2f58   :  { %v3663_v37 = vadd.f32 1.0, %v6080_v17 }
0x2f5a   :  { %6081 = vrcp.f32 %v3663_v37  ;;  %5626 = vmatpush3.bf16.msra.mxu1 %v5827_v46 }
0x2f5b   :  { %5627 = vmatprep.subr.bf16.mxu1 %v6143_v0 }
0x2f5e   :  { %5628 = vmatpush3.bf16.msra.mxu1 %v5828_v59 }
0x2f64   :  { %v6082_v55 = vpop.eup %6081 }
0x2f65   :  { %3667 = vrot.lane.b32.xlu1 %v6082_v55, %s6146_s29 }
0x2f69   :  { %3671 = vrot.lane.b32.xlu1 %v6082_v55, %s6145_s28 }
0x2fc8   :  { %v3670_v60 = vpop.permute.xlu0 %3669 }
0x2fc9   :  { %v3674_v25 = vmul.f32 %v6082_v55, %v3670_v60 }
0x2fd7   :  { %v3668_v62 = vpop.permute.xlu1 %3667 }
0x2fd8   :  { %v3673_v4 = vmul.f32 %v3668_v62, %v3614_v56 }
0x2fda   :  { %v3675_v8 = vadd.f32 %v3674_v25, %v3673_v4 }
0x2fdb   :  { %v3672_v11 = vpop.permute.xlu1 %3671 }
0x2fdc   :  { %6083 = vtanh.f32 %v3675_v8  ;;  %3933 = vst [vmem:[%s7639_s10 + $0x18] sm:$0xff] %v3675_v8 }
0x2fe6   :  { %v6084_v47 = vpop.eup %6083 }
0x2fe7   :  { %v3677_v0 = vmul.f32 %v6084_v47, %v3672_v11 }
0x2fe9   :  { %v3678_v6 = vpack.c.bf16 %v3677_v0, %v3677_v0  ;;  %3932 = vst [vmem:[%s7638_s9 + $0x18] sm:$0xff] %v3677_v0 }
0x2feb   :  { %5630 = vmatmul.mubr.bf16.vlgmr.msra.gmra.mrb[84].mxu1 %v3678_v6 }
0x30be   :  { %v3788_v30 = vpop.f32.mrb[84].mxu1 }
0x30bf   :  { %v3789_v48 = vadd.f32 %v3934_v12, %v3788_v30  ;;  %v5631_v7 = vpop.f32.mrb[85].mxu1 }
0x30c0   :  { %v3791_v9 = vpop.f32.mrb[86].mxu1 }
0x30c1   :  { %v3943_v27 = vmul.f32 -1.442695, %v3789_v48  ;;  %v5632_v29 = vpop.f32.mrb[87].mxu1 }
0x30c3   :  { %6085 = vpow2.f32 %v3943_v27 }
0x30cd   :  { %v6086_v32 = vpop.eup %6085 }
0x30ce   :  { %v3797_v16 = vadd.f32 1.0, %v6086_v32 }
0x30d0   :  { %6087 = vrcp.f32 %v3797_v16 }
0x30da   :  { %v6088_v61 = vpop.eup %6087 }
0x30db   :  { %3800 = vst [vmem:[%s7637_s8] sm:$0xff] %v6088_v61 }
0x30dc   :  { %3813 = vsyncpa [#allocation5], 1 }
0x30dd   :  { %3814 = vsyncpa [#allocation7], 1 }

</bundles_post_ra>
